<compile_context>
chip_gen: v7x
topology: tpu7x:2x2x1
jax: 0.10.0
libtpu: 0.0.40
codegen_flags: <defaults>
</compile_context>

<pallas_src>
import functools
import numpy as np

import jax
import jax.numpy as jnp
from jax.experimental import pallas as pl
from jax.experimental.pallas import tpu as pltpu

# ---------------- model config: Net(1, [10], [8, 10], kernel=5, pad=0, n_classes=10, False) ----
IN_C = 1
ENC_SIZES = [10]          # enc_sizes = [1, 10]
LOC_SIZES = [8, 10]       # loc_sizes = [1, 8, 10]
KERNEL = 5
PAD = 0
N_CLASSES = 10
H_IN = W_IN = 28          # required by the module's hard-coded 4*4 / 12*12 sizes

CPAD = 128                # conv output channels padded to a full lane group (lane-dense stores)
P_OUT = H_IN * W_IN       # 784 output pixels of the resampler
P_PAD = 896               # 7 * 128 -> lane-dense resampler output
SRC_PAD = 32              # 28 -> 32 source rows/cols (sublane-aligned)


# ---------------- Pallas kernels ----------------

def _conv_pool_relu_kernel(p_ref, w_ref, b_ref, o_ref):
    # p_ref: (1, 4, M, K)   im2col patches of one image, grouped by 2x2 pool quadrant
    # w_ref: (K, CPAD)      conv weight, output channels zero-padded to CPAD
    # b_ref: (1, CPAD)
    # o_ref: (1, M, CPAD)   pooled + ReLU activation (M = Hp*Wp), lane-dense
    w = w_ref[...]
    m = jnp.dot(p_ref[0, 0], w, preferred_element_type=jnp.float32)
    for d in range(1, 4):
        m = jnp.maximum(m, jnp.dot(p_ref[0, d], w, preferred_element_type=jnp.float32))
    # max over quadrants commutes with the (shared) bias add and the ReLU.
    o_ref[0] = jnp.maximum(m + b_ref[...], 0.0)


def _mlp2_kernel(x_ref, w1_ref, b1_ref, w2_ref, b2_ref, o_ref):
    # Fused Linear -> ReLU -> Linear (dropout between them is identity in eval mode).
    h = jnp.dot(x_ref[...], w1_ref[...], preferred_element_type=jnp.float32) + b1_ref[...]
    h = jnp.maximum(h, 0.0)
    o_ref[...] = jnp.dot(h, w2_ref[...], preferred_element_type=jnp.float32) + b2_ref[...]


def _grid_sample_kernel(ix_ref, iy_ref, img_ref, o_ref, *, n_chan):
    # ix_ref / iy_ref: (1, 1, P)         source pixel coords of the P (padded) output pixels
    # img_ref:         (1, C, S, S)      zero-padded source image (S = SRC_PAD)
    # o_ref:           (1, C, P)         bilinear resample, flattened row-major output pixels
    S = img_ref.shape[2]
    P = o_ref.shape[2]
    ix = ix_ref[0]                                   # (1, P)
    iy = iy_ref[0]
    ix0 = jnp.floor(ix)
    iy0 = jnp.floor(iy)
    fx1 = ix - ix0
    fy1 = iy - iy0
    xs = jax.lax.broadcasted_iota(jnp.int32, (S, P), 0).astype(jnp.float32)
    ys = jax.lax.broadcasted_iota(jnp.int32, (S, P), 0).astype(jnp.float32)
    # Separable bilinear weights.  Comparing against the in-range iota doubles as the
    # zero-padding mask: out-of-range corners never match -> weight 0 (and corners that
    # land in the zero-padded 28..31 band hit zero pixels) == grid_sample padding_mode='zeros'.
    wx = jnp.where(xs == ix0, 1.0 - fx1, 0.0) + jnp.where(xs == ix0 + 1.0, fx1, 0.0)   # (S, P)
    wy = jnp.where(ys == iy0, 1.0 - fy1, 0.0) + jnp.where(ys == iy0 + 1.0, fy1, 0.0)   # (S, P)
    for c in range(n_chan):
        v = jnp.dot(img_ref[0, c], wx, preferred_element_type=jnp.float32)             # (S, P)
        o_ref[0, pl.ds(c, 1)] = jnp.sum(wy * v, axis=0, keepdims=True)                 # (1, P)


# ---------------- Pallas wrappers ----------------

def conv_pool_relu(x_nhwc, w, b):
    """Fused Conv2d(k, pad=0) + bias + ReLU + MaxPool2d(2).
    x_nhwc: (B, H, W, C_in); w: (C_out, C_in, k, k); b: (C_out,)
    Returns (B, Hp, Wp, CPAD), output channels zero-padded to CPAD."""
    B, H, W, C = x_nhwc.shape
    C_out, C_in, k, _ = w.shape
    assert C == C_in
    Ho, Wo = H - k + 1, W - k + 1
    Hp, Wp = Ho // 2, Wo // 2
    M, K = Hp * Wp, k * k * C

    # im2col grouped by 2x2 pool quadrant so the pool can be fused into the matmul kernel.
    # TODO(synk): at very large batch this still materializes ~k*k x the input in HBM; the
    #             k*k shifts could be moved inside the kernel as accumulating dots if needed.
    quads = []
    for dy in range(2):
        for dx in range(2):
            cols = []
            for i in range(k):
                for j in range(k):
                    cols.append(x_nhwc[:, dy + i: dy + i + 2 * Hp: 2,
                                       dx + j: dx + j + 2 * Wp: 2, :])      # (B, Hp, Wp, C)
            quads.append(jnp.concatenate(cols, axis=-1).reshape(B, M, K))
    patches = jnp.stack(quads, axis=1)                                      # (B, 4, M, K)

    # weight rows ordered (kh, kw, c_in) to match the patch layout; pad N to CPAD lanes.
    w2 = jnp.transpose(w, (2, 3, 1, 0)).reshape(K, C_out)
    w2 = jnp.pad(w2, ((0, 0), (0, CPAD - C_out)))
    b2 = jnp.pad(b, (0, CPAD - C_out)).reshape(1, CPAD)

    out = pl.pallas_call(
        _conv_pool_relu_kernel,
        out_shape=jax.ShapeDtypeStruct((B, M, CPAD), jnp.float32),
        grid=(B,),
        in_specs=[pl.BlockSpec((1, 4, M, K), lambda bi: (bi, 0, 0, 0)),
                  pl.BlockSpec((K, CPAD), lambda bi: (0, 0)),
                  pl.BlockSpec((1, CPAD), lambda bi: (0, 0))],
        out_specs=pl.BlockSpec((1, M, CPAD), lambda bi: (bi, 0, 0)),
        compiler_params=pltpu.CompilerParams(dimension_semantics=("parallel",)),
    )(patches, w2, b2)
    return out.reshape(B, Hp, Wp, CPAD)


def mlp2(x, w1, b1, w2, b2, *, block_m=128):
    """Fused Linear -> ReLU -> Linear in a single Pallas call, tiled over batch rows."""
    M, K = x.shape
    Hd = w1.shape[1]
    N = w2.shape[1]
    bm = min(block_m, M)
    return pl.pallas_call(
        _mlp2_kernel,
        out_shape=jax.ShapeDtypeStruct((M, N), jnp.float32),
        grid=(pl.cdiv(M, bm),),
        in_specs=[pl.BlockSpec((bm, K), lambda i: (i, 0)),
                  pl.BlockSpec((K, Hd), lambda i: (0, 0)),
                  pl.BlockSpec((1, Hd), lambda i: (0, 0)),
                  pl.BlockSpec((Hd, N), lambda i: (0, 0)),
                  pl.BlockSpec((1, N), lambda i: (0, 0))],
        out_specs=pl.BlockSpec((bm, N), lambda i: (i, 0)),
        compiler_params=pltpu.CompilerParams(dimension_semantics=("parallel",)),
    )(x, w1, b1.reshape(1, Hd), w2, b2.reshape(1, N))


def sample_coords(theta, H, W, p_pad):
    """F.affine_grid(theta, size, align_corners=True) followed by grid_sample's default
    align_corners=False un-normalization (this matches the PyTorch module exactly:
    affine_grid is called with align_corners=True, grid_sample with defaults).
    Returns (ix, iy), each (B, 1, p_pad); padded pixels get an always-invalid coord."""
    B = theta.shape[0]
    xn = jnp.linspace(-1.0, 1.0, W)
    yn = jnp.linspace(-1.0, 1.0, H)
    yv, xv = jnp.meshgrid(yn, xn, indexing="ij")
    base = jnp.stack([xv.ravel(), yv.ravel(), jnp.ones(H * W)], axis=-1)    # (P, 3)
    g = jnp.einsum("bij,pj->bpi", theta, base)                              # (B, P, 2)
    ix = ((g[..., 0] + 1.0) * W - 1.0) * 0.5
    iy = ((g[..., 1] + 1.0) * H - 1.0) * 0.5
    pad = jnp.full((B, p_pad - H * W), -10.0, jnp.float32)
    ix = jnp.concatenate([ix, pad], axis=1).reshape(B, 1, p_pad)
    iy = jnp.concatenate([iy, pad], axis=1).reshape(B, 1, p_pad)
    return ix, iy


def grid_sample(x_nchw, ix, iy):
    """Bilinear, zero-padding grid sample of x (B, C, H, W) at per-pixel coords (ix, iy)."""
    B, C, H, W = x_nchw.shape
    x_pad = jnp.pad(x_nchw, ((0, 0), (0, 0), (0, SRC_PAD - H), (0, SRC_PAD - W)))
    out = pl.pallas_call(
        functools.partial(_grid_sample_kernel, n_chan=C),
        out_shape=jax.ShapeDtypeStruct((B, C, P_PAD), jnp.float32),
        grid=(B,),
        in_specs=[pl.BlockSpec((1, 1, P_PAD), lambda bi: (bi, 0, 0)),
                  pl.BlockSpec((1, 1, P_PAD), lambda bi: (bi, 0, 0)),
                  pl.BlockSpec((1, C, SRC_PAD, SRC_PAD), lambda bi: (bi, 0, 0, 0))],
        out_specs=pl.BlockSpec((1, C, P_PAD), lambda bi: (bi, 0, 0)),
        compiler_params=pltpu.CompilerParams(dimension_semantics=("parallel",)),
    )(ix, iy, x_pad)
    return out[:, :, :H * W].reshape(B, C, H, W)


# ---------------- parameters (deterministic, PyTorch-like init shapes) ----------------

def _uinit(key, shape, fan_in):
    bound = 1.0 / np.sqrt(fan_in)
    return jax.random.uniform(key, shape, jnp.float32, -bound, bound)


def init_params(key):
    ks = jax.random.split(key, 16)
    p = {}
    # STN localization: loc_sizes = [1, 8, 10], kernel 5
    p["loc1_w"] = _uinit(ks[0], (LOC_SIZES[0], IN_C, KERNEL, KERNEL), IN_C * KERNEL * KERNEL)
    p["loc1_b"] = _uinit(ks[1], (LOC_SIZES[0],), IN_C * KERNEL * KERNEL)
    p["loc2_w"] = _uinit(ks[2], (LOC_SIZES[1], LOC_SIZES[0], KERNEL, KERNEL),
                         LOC_SIZES[0] * KERNEL * KERNEL)
    p["loc2_b"] = _uinit(ks[3], (LOC_SIZES[1],), LOC_SIZES[0] * KERNEL * KERNEL)
    # fc_loc: Linear(loc_sizes[-1]*4*4, 32) -> ReLU -> Linear(32, 6); last layer w=0, b=identity
    fin = LOC_SIZES[-1] * 4 * 4
    p["fc_loc1_w"] = _uinit(ks[4], (fin, 32), fin)              # stored (in, out)
    p["fc_loc1_b"] = _uinit(ks[5], (32,), fin)
    p["fc_loc2_w"] = jnp.zeros((32, 6), jnp.float32)
    p["fc_loc2_b"] = jnp.array([1, 0, 0, 0, 1, 0], jnp.float32)
    # Base: enc_sizes = [1, 10]
    p["base1_w"] = _uinit(ks[6], (ENC_SIZES[0], IN_C, KERNEL, KERNEL), IN_C * KERNEL * KERNEL)
    p["base1_b"] = _uinit(ks[7], (ENC_SIZES[0],), IN_C * KERNEL * KERNEL)
    # Heads: fc1(enc[-1]*12*12, 50), fc2(50, n_classes)
    fin1 = ENC_SIZES[-1] * 12 * 12
    p["fc1_w"] = _uinit(ks[8], (fin1, 50), fin1)
    p["fc1_b"] = _uinit(ks[9], (50,), fin1)
    p["fc2_w"] = _uinit(ks[10], (50, N_CLASSES), 50)
    p["fc2_b"] = _uinit(ks[11], (N_CLASSES,), 50)
    return p


# ---------------- full forward (Net.forward) ----------------

def net_forward(params, x):
    B = x.shape[0]
    x_nhwc = jnp.transpose(x, (0, 2, 3, 1))                                    # (B, 28, 28, 1)

    # ---- STN: localization -> theta ----
    xs = conv_pool_relu(x_nhwc, params["loc1_w"], params["loc1_b"])            # (B, 12, 12, 128)
    xs = conv_pool_relu(xs[..., :LOC_SIZES[0]],
                        params["loc2_w"], params["loc2_b"])                    # (B, 4, 4, 128)
    xs = xs[..., :LOC_SIZES[1]]                                                # (B, 4, 4, 10)
    xs = jnp.transpose(xs, (0, 3, 1, 2)).reshape(B, -1)                        # NCHW flatten (B, 160)
    theta = mlp2(xs, params["fc_loc1_w"], params["fc_loc1_b"],
                 params["fc_loc2_w"], params["fc_loc2_b"])                     # (B, 6)
    theta = theta.reshape(B, 2, 3)

    # ---- STN: resample the input ----
    ix, iy = sample_coords(theta, H_IN, W_IN, P_PAD)
    xt = grid_sample(x, ix, iy)                                                # (B, 1, 28, 28)

    # ---- Base conv + classifier head ----
    xb = conv_pool_relu(jnp.transpose(xt, (0, 2, 3, 1)),
                        params["base1_w"], params["base1_b"])                  # (B, 12, 12, 128)
    xb = xb[..., :ENC_SIZES[0]]                                                # (B, 12, 12, 10)
    feat = jnp.transpose(xb, (0, 3, 1, 2)).reshape(B, -1)                      # (B, 1440)
    # F.dropout: identity in eval mode (fused ReLU->dropout->Linear = ReLU->Linear).
    logits = mlp2(feat, params["fc1_w"], params["fc1_b"],
                  params["fc2_w"], params["fc2_b"])                            # (B, n_classes)
    return logits


if __name__ == "__main__":
    key = jax.random.PRNGKey(0)
    kp, kx = jax.random.split(key)
    params = init_params(kp)
    x = jax.random.normal(kx, (2, IN_C, H_IN, W_IN), jnp.float32)

    fwd = jax.jit(net_forward)
    out = jax.block_until_ready(fwd(params, x))
    assert out.shape == (2, N_CLASSES), out.shape
    assert bool(jnp.all(jnp.isfinite(out)))
    print("KERNEL_OK")
</pallas_src>

<mosaic_0001>
module attributes {stable_mosaic.version = 11 : i64} {
  func.func @_conv_pool_relu_kernel(%arg0: i32, %arg1: memref<1x4x144x25xf32, #tpu.memory_space<vmem>>, %arg2: memref<25x128xf32, #tpu.memory_space<vmem>>, %arg3: memref<1x128xf32, #tpu.memory_space<vmem>>, %arg4: memref<1x144x128xf32, #tpu.memory_space<vmem>>) attributes {dimension_semantics = [#tpu.dimension_semantics<parallel>], iteration_bounds = array<i64: 2>, scalar_prefetch = 0 : i64, scratch_operands = 0 : i64, tpu.core_type = #tpu.core_type<tc>, window_params = [{transform_indices = @transform_0, window_bounds = array<i64: 1, 4, 144, 25>}, {pipeline_mode = #tpu.pipeline_mode<synchronous>, transform_indices = @transform_1, window_bounds = array<i64: 25, 128>}, {pipeline_mode = #tpu.pipeline_mode<synchronous>, transform_indices = @transform_2, window_bounds = array<i64: 1, 128>}, {transform_indices = @transform_3, window_bounds = array<i64: 1, 144, 128>}]} {
    %c0 = arith.constant 0 : index
    %c0_0 = arith.constant 0 : index
    %0 = vector.load %arg2[%c0, %c0_0] : memref<25x128xf32, #tpu.memory_space<vmem>>, vector<25x128xf32>
    %c0_1 = arith.constant 0 : index
    %c0_2 = arith.constant 0 : index
    %c0_3 = arith.constant 0 : index
    %c0_4 = arith.constant 0 : index
    %1 = vector.load %arg1[%c0_1, %c0_2, %c0_3, %c0_4] : memref<1x4x144x25xf32, #tpu.memory_space<vmem>>, vector<1x1x144x25xf32>
    %2 = vector.shape_cast %1 : vector<1x1x144x25xf32> to vector<144x25xf32>
    %cst = arith.constant dense<0.000000e+00> : vector<144x128xf32>
    %3 = tpu.matmul %2, %0, %cst {dimension_numbers = #tpu.dot_dimension_numbers<[1], [0], [0], [1], [0, 0, 1, 1], [], []>} : vector<144x25xf32>, vector<25x128xf32>, vector<144x128xf32> -> vector<144x128xf32>
    %c0_5 = arith.constant 0 : index
    %c1 = arith.constant 1 : index
    %c0_6 = arith.constant 0 : index
    %c0_7 = arith.constant 0 : index
    %4 = vector.load %arg1[%c0_5, %c1, %c0_6, %c0_7] : memref<1x4x144x25xf32, #tpu.memory_space<vmem>>, vector<1x1x144x25xf32>
    %5 = vector.shape_cast %4 : vector<1x1x144x25xf32> to vector<144x25xf32>
    %cst_8 = arith.constant dense<0.000000e+00> : vector<144x128xf32>
    %6 = tpu.matmul %5, %0, %cst_8 {dimension_numbers = #tpu.dot_dimension_numbers<[1], [0], [0], [1], [0, 0, 1, 1], [], []>} : vector<144x25xf32>, vector<25x128xf32>, vector<144x128xf32> -> vector<144x128xf32>
    %7 = arith.maximumf %3, %6 : vector<144x128xf32>
    %c0_9 = arith.constant 0 : index
    %c2 = arith.constant 2 : index
    %c0_10 = arith.constant 0 : index
    %c0_11 = arith.constant 0 : index
    %8 = vector.load %arg1[%c0_9, %c2, %c0_10, %c0_11] : memref<1x4x144x25xf32, #tpu.memory_space<vmem>>, vector<1x1x144x25xf32>
    %9 = vector.shape_cast %8 : vector<1x1x144x25xf32> to vector<144x25xf32>
    %cst_12 = arith.constant dense<0.000000e+00> : vector<144x128xf32>
    %10 = tpu.matmul %9, %0, %cst_12 {dimension_numbers = #tpu.dot_dimension_numbers<[1], [0], [0], [1], [0, 0, 1, 1], [], []>} : vector<144x25xf32>, vector<25x128xf32>, vector<144x128xf32> -> vector<144x128xf32>
    %11 = arith.maximumf %7, %10 : vector<144x128xf32>
    %c0_13 = arith.constant 0 : index
    %c3 = arith.constant 3 : index
    %c0_14 = arith.constant 0 : index
    %c0_15 = arith.constant 0 : index
    %12 = vector.load %arg1[%c0_13, %c3, %c0_14, %c0_15] : memref<1x4x144x25xf32, #tpu.memory_space<vmem>>, vector<1x1x144x25xf32>
    %13 = vector.shape_cast %12 : vector<1x1x144x25xf32> to vector<144x25xf32>
    %cst_16 = arith.constant dense<0.000000e+00> : vector<144x128xf32>
    %14 = tpu.matmul %13, %0, %cst_16 {dimension_numbers = #tpu.dot_dimension_numbers<[1], [0], [0], [1], [0, 0, 1, 1], [], []>} : vector<144x25xf32>, vector<25x128xf32>, vector<144x128xf32> -> vector<144x128xf32>
    %15 = arith.maximumf %11, %14 : vector<144x128xf32>
    %c0_17 = arith.constant 0 : index
    %c0_18 = arith.constant 0 : index
    %16 = vector.load %arg3[%c0_17, %c0_18] : memref<1x128xf32, #tpu.memory_space<vmem>>, vector<1x128xf32>
    %17 = vector.broadcast %16 : vector<1x128xf32> to vector<144x128xf32>
    %18 = arith.addf %15, %17 : vector<144x128xf32>
    %cst_19 = arith.constant 0.000000e+00 : f32
    %19 = vector.broadcast %cst_19 : f32 to vector<144x128xf32>
    %20 = arith.maximumf %18, %19 : vector<144x128xf32>
    %c0_20 = arith.constant 0 : index
    %c0_21 = arith.constant 0 : index
    %c0_22 = arith.constant 0 : index
    %21 = vector.load %arg4[%c0_20, %c0_21, %c0_22] : memref<1x144x128xf32, #tpu.memory_space<vmem>>, vector<1x144x128xf32>
    %22 = vector.shape_cast %21 : vector<1x144x128xf32> to vector<144x128xf32>
    %23 = vector.shape_cast %20 : vector<144x128xf32> to vector<1x144x128xf32>
    tpu.vector_store %arg4[%c0_20, %c0_21, %c0_22], %23 {strides = array<i32>} : memref<1x144x128xf32, #tpu.memory_space<vmem>>, vector<1x144x128xf32>,
    return
  }
  func.func @transform_0(%arg0: i32) -> (i32, i32, i32, i32) {
    %c0_i32 = arith.constant 0 : i32
    %c0_i32_0 = arith.constant 0 : i32
    %c0_i32_1 = arith.constant 0 : i32
    %c0_i32_2 = arith.constant 0 : i32
    return %arg0, %c0_i32, %c0_i32_0, %c0_i32_1 : i32, i32, i32, i32
  }
  func.func @transform_1(%arg0: i32) -> (i32, i32) {
    %c0_i32 = arith.constant 0 : i32
    %c0_i32_0 = arith.constant 0 : i32
    %c0_i32_1 = arith.constant 0 : i32
    return %c0_i32, %c0_i32_0 : i32, i32
  }
  func.func @transform_2(%arg0: i32) -> (i32, i32) {
    %c0_i32 = arith.constant 0 : i32
    %c0_i32_0 = arith.constant 0 : i32
    %c0_i32_1 = arith.constant 0 : i32
    return %c0_i32, %c0_i32_0 : i32, i32
  }
  func.func @transform_3(%arg0: i32) -> (i32, i32, i32) {
    %c0_i32 = arith.constant 0 : i32
    %c0_i32_0 = arith.constant 0 : i32
    %c0_i32_1 = arith.constant 0 : i32
    return %arg0, %c0_i32, %c0_i32_0 : i32, i32, i32
  }
}

module attributes {stable_mosaic.version = 11 : i64} {
  func.func @_conv_pool_relu_kernel(%arg0: i32, %arg1: memref<1x4x16x200xf32, #tpu.memory_space<vmem>>, %arg2: memref<200x128xf32, #tpu.memory_space<vmem>>, %arg3: memref<1x128xf32, #tpu.memory_space<vmem>>, %arg4: memref<1x16x128xf32, #tpu.memory_space<vmem>>) attributes {dimension_semantics = [#tpu.dimension_semantics<parallel>], iteration_bounds = array<i64: 2>, scalar_prefetch = 0 : i64, scratch_operands = 0 : i64, tpu.core_type = #tpu.core_type<tc>, window_params = [{transform_indices = @transform_0, window_bounds = array<i64: 1, 4, 16, 200>}, {pipeline_mode = #tpu.pipeline_mode<synchronous>, transform_indices = @transform_1, window_bounds = array<i64: 200, 128>}, {pipeline_mode = #tpu.pipeline_mode<synchronous>, transform_indices = @transform_2, window_bounds = array<i64: 1, 128>}, {transform_indices = @transform_3, window_bounds = array<i64: 1, 16, 128>}]} {
    %c0 = arith.constant 0 : index
    %c0_0 = arith.constant 0 : index
    %0 = vector.load %arg2[%c0, %c0_0] : memref<200x128xf32, #tpu.memory_space<vmem>>, vector<200x128xf32>
    %c0_1 = arith.constant 0 : index
    %c0_2 = arith.constant 0 : index
    %c0_3 = arith.constant 0 : index
    %c0_4 = arith.constant 0 : index
    %1 = vector.load %arg1[%c0_1, %c0_2, %c0_3, %c0_4] : memref<1x4x16x200xf32, #tpu.memory_space<vmem>>, vector<1x1x16x200xf32>
    %2 = vector.shape_cast %1 : vector<1x1x16x200xf32> to vector<16x200xf32>
    %cst = arith.constant dense<0.000000e+00> : vector<16x128xf32>
    %3 = tpu.matmul %2, %0, %cst {dimension_numbers = #tpu.dot_dimension_numbers<[1], [0], [0], [1], [0, 0, 1, 1], [], []>} : vector<16x200xf32>, vector<200x128xf32>, vector<16x128xf32> -> vector<16x128xf32>
    %c0_5 = arith.constant 0 : index
    %c1 = arith.constant 1 : index
    %c0_6 = arith.constant 0 : index
    %c0_7 = arith.constant 0 : index
    %4 = vector.load %arg1[%c0_5, %c1, %c0_6, %c0_7] : memref<1x4x16x200xf32, #tpu.memory_space<vmem>>, vector<1x1x16x200xf32>
    %5 = vector.shape_cast %4 : vector<1x1x16x200xf32> to vector<16x200xf32>
    %cst_8 = arith.constant dense<0.000000e+00> : vector<16x128xf32>
    %6 = tpu.matmul %5, %0, %cst_8 {dimension_numbers = #tpu.dot_dimension_numbers<[1], [0], [0], [1], [0, 0, 1, 1], [], []>} : vector<16x200xf32>, vector<200x128xf32>, vector<16x128xf32> -> vector<16x128xf32>
    %7 = arith.maximumf %3, %6 : vector<16x128xf32>
    %c0_9 = arith.constant 0 : index
    %c2 = arith.constant 2 : index
    %c0_10 = arith.constant 0 : index
    %c0_11 = arith.constant 0 : index
    %8 = vector.load %arg1[%c0_9, %c2, %c0_10, %c0_11] : memref<1x4x16x200xf32, #tpu.memory_space<vmem>>, vector<1x1x16x200xf32>
    %9 = vector.shape_cast %8 : vector<1x1x16x200xf32> to vector<16x200xf32>
    %cst_12 = arith.constant dense<0.000000e+00> : vector<16x128xf32>
    %10 = tpu.matmul %9, %0, %cst_12 {dimension_numbers = #tpu.dot_dimension_numbers<[1], [0], [0], [1], [0, 0, 1, 1], [], []>} : vector<16x200xf32>, vector<200x128xf32>, vector<16x128xf32> -> vector<16x128xf32>
    %11 = arith.maximumf %7, %10 : vector<16x128xf32>
    %c0_13 = arith.constant 0 : index
    %c3 = arith.constant 3 : index
    %c0_14 = arith.constant 0 : index
    %c0_15 = arith.constant 0 : index
    %12 = vector.load %arg1[%c0_13, %c3, %c0_14, %c0_15] : memref<1x4x16x200xf32, #tpu.memory_space<vmem>>, vector<1x1x16x200xf32>
    %13 = vector.shape_cast %12 : vector<1x1x16x200xf32> to vector<16x200xf32>
    %cst_16 = arith.constant dense<0.000000e+00> : vector<16x128xf32>
    %14 = tpu.matmul %13, %0, %cst_16 {dimension_numbers = #tpu.dot_dimension_numbers<[1], [0], [0], [1], [0, 0, 1, 1], [], []>} : vector<16x200xf32>, vector<200x128xf32>, vector<16x128xf32> -> vector<16x128xf32>
    %15 = arith.maximumf %11, %14 : vector<16x128xf32>
    %c0_17 = arith.constant 0 : index
    %c0_18 = arith.constant 0 : index
    %16 = vector.load %arg3[%c0_17, %c0_18] : memref<1x128xf32, #tpu.memory_space<vmem>>, vector<1x128xf32>
    %17 = vector.broadcast %16 : vector<1x128xf32> to vector<16x128xf32>
    %18 = arith.addf %15, %17 : vector<16x128xf32>
    %cst_19 = arith.constant 0.000000e+00 : f32
    %19 = vector.broadcast %cst_19 : f32 to vector<16x128xf32>
    %20 = arith.maximumf %18, %19 : vector<16x128xf32>
    %c0_20 = arith.constant 0 : index
    %c0_21 = arith.constant 0 : index
    %c0_22 = arith.constant 0 : index
    %21 = vector.load %arg4[%c0_20, %c0_21, %c0_22] : memref<1x16x128xf32, #tpu.memory_space<vmem>>, vector<1x16x128xf32>
    %22 = vector.shape_cast %21 : vector<1x16x128xf32> to vector<16x128xf32>
    %23 = vector.shape_cast %20 : vector<16x128xf32> to vector<1x16x128xf32>
    tpu.vector_store %arg4[%c0_20, %c0_21, %c0_22], %23 {strides = array<i32>} : memref<1x16x128xf32, #tpu.memory_space<vmem>>, vector<1x16x128xf32>,
    return
  }
  func.func @transform_0(%arg0: i32) -> (i32, i32, i32, i32) {
    %c0_i32 = arith.constant 0 : i32
    %c0_i32_0 = arith.constant 0 : i32
    %c0_i32_1 = arith.constant 0 : i32
    %c0_i32_2 = arith.constant 0 : i32
    return %arg0, %c0_i32, %c0_i32_0, %c0_i32_1 : i32, i32, i32, i32
  }
  func.func @transform_1(%arg0: i32) -> (i32, i32) {
    %c0_i32 = arith.constant 0 : i32
    %c0_i32_0 = arith.constant 0 : i32
    %c0_i32_1 = arith.constant 0 : i32
    return %c0_i32, %c0_i32_0 : i32, i32
  }
  func.func @transform_2(%arg0: i32) -> (i32, i32) {
    %c0_i32 = arith.constant 0 : i32
    %c0_i32_0 = arith.constant 0 : i32
    %c0_i32_1 = arith.constant 0 : i32
    return %c0_i32, %c0_i32_0 : i32, i32
  }
  func.func @transform_3(%arg0: i32) -> (i32, i32, i32) {
    %c0_i32 = arith.constant 0 : i32
    %c0_i32_0 = arith.constant 0 : i32
    %c0_i32_1 = arith.constant 0 : i32
    return %arg0, %c0_i32, %c0_i32_0 : i32, i32, i32
  }
}

module attributes {stable_mosaic.version = 11 : i64} {
  func.func @_mlp2_kernel(%arg0: i32, %arg1: memref<2x160xf32, #tpu.memory_space<vmem>>, %arg2: memref<160x32xf32, #tpu.memory_space<vmem>>, %arg3: memref<1x32xf32, #tpu.memory_space<vmem>>, %arg4: memref<32x6xf32, #tpu.memory_space<vmem>>, %arg5: memref<1x6xf32, #tpu.memory_space<vmem>>, %arg6: memref<2x6xf32, #tpu.memory_space<vmem>>) attributes {dimension_semantics = [#tpu.dimension_semantics<parallel>], iteration_bounds = array<i64: 1>, scalar_prefetch = 0 : i64, scratch_operands = 0 : i64, tpu.core_type = #tpu.core_type<tc>, window_params = [{transform_indices = @transform_0, window_bounds = array<i64: 2, 160>}, {pipeline_mode = #tpu.pipeline_mode<synchronous>, transform_indices = @transform_1, window_bounds = array<i64: 160, 32>}, {pipeline_mode = #tpu.pipeline_mode<synchronous>, transform_indices = @transform_2, window_bounds = array<i64: 1, 32>}, {pipeline_mode = #tpu.pipeline_mode<synchronous>, transform_indices = @transform_3, window_bounds = array<i64: 32, 6>}, {pipeline_mode = #tpu.pipeline_mode<synchronous>, transform_indices = @transform_4, window_bounds = array<i64: 1, 6>}, {transform_indices = @transform_5, window_bounds = array<i64: 2, 6>}]} {
    %c0 = arith.constant 0 : index
    %c0_0 = arith.constant 0 : index
    %0 = vector.load %arg1[%c0, %c0_0] : memref<2x160xf32, #tpu.memory_space<vmem>>, vector<2x160xf32>
    %c0_1 = arith.constant 0 : index
    %c0_2 = arith.constant 0 : index
    %1 = vector.load %arg2[%c0_1, %c0_2] : memref<160x32xf32, #tpu.memory_space<vmem>>, vector<160x32xf32>
    %cst = arith.constant dense<0.000000e+00> : vector<2x32xf32>
    %2 = tpu.matmul %0, %1, %cst {dimension_numbers = #tpu.dot_dimension_numbers<[1], [0], [0], [1], [0, 0, 1, 1], [], []>} : vector<2x160xf32>, vector<160x32xf32>, vector<2x32xf32> -> vector<2x32xf32>
    %c0_3 = arith.constant 0 : index
    %c0_4 = arith.constant 0 : index
    %3 = vector.load %arg3[%c0_3, %c0_4] : memref<1x32xf32, #tpu.memory_space<vmem>>, vector<1x32xf32>
    %4 = vector.broadcast %3 : vector<1x32xf32> to vector<2x32xf32>
    %5 = arith.addf %2, %4 : vector<2x32xf32>
    %cst_5 = arith.constant 0.000000e+00 : f32
    %6 = vector.broadcast %cst_5 : f32 to vector<2x32xf32>
    %7 = arith.maximumf %5, %6 : vector<2x32xf32>
    %c0_6 = arith.constant 0 : index
    %c0_7 = arith.constant 0 : index
    %8 = vector.load %arg4[%c0_6, %c0_7] : memref<32x6xf32, #tpu.memory_space<vmem>>, vector<32x6xf32>
    %cst_8 = arith.constant dense<0.000000e+00> : vector<2x6xf32>
    %9 = tpu.matmul %7, %8, %cst_8 {dimension_numbers = #tpu.dot_dimension_numbers<[1], [0], [0], [1], [0, 0, 1, 1], [], []>} : vector<2x32xf32>, vector<32x6xf32>, vector<2x6xf32> -> vector<2x6xf32>
    %c0_9 = arith.constant 0 : index
    %c0_10 = arith.constant 0 : index
    %10 = vector.load %arg5[%c0_9, %c0_10] : memref<1x6xf32, #tpu.memory_space<vmem>>, vector<1x6xf32>
    %11 = vector.broadcast %10 : vector<1x6xf32> to vector<2x6xf32>
    %12 = arith.addf %9, %11 : vector<2x6xf32>
    %c0_11 = arith.constant 0 : index
    %c0_12 = arith.constant 0 : index
    %13 = vector.load %arg6[%c0_11, %c0_12] : memref<2x6xf32, #tpu.memory_space<vmem>>, vector<2x6xf32>
    tpu.vector_store %arg6[%c0_11, %c0_12], %12 {strides = array<i32>} : memref<2x6xf32, #tpu.memory_space<vmem>>, vector<2x6xf32>,
    return
  }
  func.func @transform_0(%arg0: i32) -> (i32, i32) {
    %c0_i32 = arith.constant 0 : i32
    %c0_i32_0 = arith.constant 0 : i32
    return %arg0, %c0_i32 : i32, i32
  }
  func.func @transform_1(%arg0: i32) -> (i32, i32) {
    %c0_i32 = arith.constant 0 : i32
    %c0_i32_0 = arith.constant 0 : i32
    %c0_i32_1 = arith.constant 0 : i32
    return %c0_i32, %c0_i32_0 : i32, i32
  }
  func.func @transform_2(%arg0: i32) -> (i32, i32) {
    %c0_i32 = arith.constant 0 : i32
    %c0_i32_0 = arith.constant 0 : i32
    %c0_i32_1 = arith.constant 0 : i32
    return %c0_i32, %c0_i32_0 : i32, i32
  }
  func.func @transform_3(%arg0: i32) -> (i32, i32) {
    %c0_i32 = arith.constant 0 : i32
    %c0_i32_0 = arith.constant 0 : i32
    %c0_i32_1 = arith.constant 0 : i32
    return %c0_i32, %c0_i32_0 : i32, i32
  }
  func.func @transform_4(%arg0: i32) -> (i32, i32) {
    %c0_i32 = arith.constant 0 : i32
    %c0_i32_0 = arith.constant 0 : i32
    %c0_i32_1 = arith.constant 0 : i32
    return %c0_i32, %c0_i32_0 : i32, i32
  }
  func.func @transform_5(%arg0: i32) -> (i32, i32) {
    %c0_i32 = arith.constant 0 : i32
    %c0_i32_0 = arith.constant 0 : i32
    return %arg0, %c0_i32 : i32, i32
  }
}

module attributes {stable_mosaic.version = 11 : i64} {
  func.func @_grid_sample_kernel(%arg0: i32, %arg1: memref<1x1x896xf32, #tpu.memory_space<vmem>>, %arg2: memref<1x1x896xf32, #tpu.memory_space<vmem>>, %arg3: memref<1x1x32x32xf32, #tpu.memory_space<vmem>>, %arg4: memref<1x1x896xf32, #tpu.memory_space<vmem>>) attributes {dimension_semantics = [#tpu.dimension_semantics<parallel>], iteration_bounds = array<i64: 2>, scalar_prefetch = 0 : i64, scratch_operands = 0 : i64, tpu.core_type = #tpu.core_type<tc>, window_params = [{transform_indices = @transform_0, window_bounds = array<i64: 1, 1, 896>}, {transform_indices = @transform_1, window_bounds = array<i64: 1, 1, 896>}, {transform_indices = @transform_2, window_bounds = array<i64: 1, 1, 32, 32>}, {transform_indices = @transform_3, window_bounds = array<i64: 1, 1, 896>}]} {
    %c0 = arith.constant 0 : index
    %c0_0 = arith.constant 0 : index
    %c0_1 = arith.constant 0 : index
    %0 = vector.load %arg1[%c0, %c0_0, %c0_1] : memref<1x1x896xf32, #tpu.memory_space<vmem>>, vector<1x1x896xf32>
    %1 = vector.shape_cast %0 : vector<1x1x896xf32> to vector<1x896xf32>
    %c0_2 = arith.constant 0 : index
    %c0_3 = arith.constant 0 : index
    %c0_4 = arith.constant 0 : index
    %2 = vector.load %arg2[%c0_2, %c0_3, %c0_4] : memref<1x1x896xf32, #tpu.memory_space<vmem>>, vector<1x1x896xf32>
    %3 = vector.shape_cast %2 : vector<1x1x896xf32> to vector<1x896xf32>
    %4 = math.floor %1 : vector<1x896xf32>
    %5 = math.floor %3 : vector<1x896xf32>
    %6 = arith.subf %1, %4 : vector<1x896xf32>
    %7 = arith.subf %3, %5 : vector<1x896xf32>
    %8 = tpu.iota {dimensions = array<i32: 0>} : vector<32x896xi32>
    %9 = arith.sitofp %8 : vector<32x896xi32> to vector<32x896xf32>
    %10 = tpu.iota {dimensions = array<i32: 0>} : vector<32x896xi32>
    %11 = arith.sitofp %10 : vector<32x896xi32> to vector<32x896xf32>
    %12 = vector.broadcast %4 : vector<1x896xf32> to vector<32x896xf32>
    %13 = arith.cmpf oeq, %9, %12 : vector<32x896xf32>
    %cst = arith.constant 1.000000e+00 : f32
    %14 = vector.broadcast %cst : f32 to vector<1x896xf32>
    %15 = arith.subf %14, %6 : vector<1x896xf32>
    %cst_5 = arith.constant 0.000000e+00 : f32
    %16 = vector.shape_cast %15 : vector<1x896xf32> to vector<1x896xf32>
    %17 = vector.broadcast %16 : vector<1x896xf32> to vector<32x896xf32>
    %18 = vector.broadcast %cst_5 : f32 to vector<32x896xf32>
    %19 = arith.select %13, %17, %18 : vector<32x896xi1>, vector<32x896xf32>
    %cst_6 = arith.constant 1.000000e+00 : f32
    %20 = vector.broadcast %cst_6 : f32 to vector<1x896xf32>
    %21 = arith.addf %4, %20 : vector<1x896xf32>
    %22 = vector.broadcast %21 : vector<1x896xf32> to vector<32x896xf32>
    %23 = arith.cmpf oeq, %9, %22 : vector<32x896xf32>
    %cst_7 = arith.constant 0.000000e+00 : f32
    %24 = vector.shape_cast %6 : vector<1x896xf32> to vector<1x896xf32>
    %25 = vector.broadcast %24 : vector<1x896xf32> to vector<32x896xf32>
    %26 = vector.broadcast %cst_7 : f32 to vector<32x896xf32>
    %27 = arith.select %23, %25, %26 : vector<32x896xi1>, vector<32x896xf32>
    %28 = arith.addf %19, %27 : vector<32x896xf32>
    %29 = vector.broadcast %5 : vector<1x896xf32> to vector<32x896xf32>
    %30 = arith.cmpf oeq, %11, %29 : vector<32x896xf32>
    %cst_8 = arith.constant 1.000000e+00 : f32
    %31 = vector.broadcast %cst_8 : f32 to vector<1x896xf32>
    %32 = arith.subf %31, %7 : vector<1x896xf32>
    %cst_9 = arith.constant 0.000000e+00 : f32
    %33 = vector.shape_cast %32 : vector<1x896xf32> to vector<1x896xf32>
    %34 = vector.broadcast %33 : vector<1x896xf32> to vector<32x896xf32>
    %35 = vector.broadcast %cst_9 : f32 to vector<32x896xf32>
    %36 = arith.select %30, %34, %35 : vector<32x896xi1>, vector<32x896xf32>
    %cst_10 = arith.constant 1.000000e+00 : f32
    %37 = vector.broadcast %cst_10 : f32 to vector<1x896xf32>
    %38 = arith.addf %5, %37 : vector<1x896xf32>
    %39 = vector.broadcast %38 : vector<1x896xf32> to vector<32x896xf32>
    %40 = arith.cmpf oeq, %11, %39 : vector<32x896xf32>
    %cst_11 = arith.constant 0.000000e+00 : f32
    %41 = vector.shape_cast %7 : vector<1x896xf32> to vector<1x896xf32>
    %42 = vector.broadcast %41 : vector<1x896xf32> to vector<32x896xf32>
    %43 = vector.broadcast %cst_11 : f32 to vector<32x896xf32>
    %44 = arith.select %40, %42, %43 : vector<32x896xi1>, vector<32x896xf32>
    %45 = arith.addf %36, %44 : vector<32x896xf32>
    %c0_12 = arith.constant 0 : index
    %c0_13 = arith.constant 0 : index
    %c0_14 = arith.constant 0 : index
    %c0_15 = arith.constant 0 : index
    %46 = vector.load %arg3[%c0_12, %c0_13, %c0_14, %c0_15] : memref<1x1x32x32xf32, #tpu.memory_space<vmem>>, vector<1x1x32x32xf32>
    %47 = vector.shape_cast %46 : vector<1x1x32x32xf32> to vector<32x32xf32>
    %cst_16 = arith.constant dense<0.000000e+00> : vector<32x896xf32>
    %48 = tpu.matmul %47, %28, %cst_16 {dimension_numbers = #tpu.dot_dimension_numbers<[1], [0], [0], [1], [0, 0, 1, 1], [], []>} : vector<32x32xf32>, vector<32x896xf32>, vector<32x896xf32> -> vector<32x896xf32>
    %49 = arith.mulf %45, %48 : vector<32x896xf32>
    %cst_17 = arith.constant dense<0.000000e+00> : vector<896xf32>
    %50 = vector.multi_reduction <add>, %49, %cst_17 [0] : vector<32x896xf32> to vector<896xf32>
    %51 = vector.shape_cast %50 : vector<896xf32> to vector<1x896xf32>
    %c0_18 = arith.constant 0 : index
    %c0_19 = arith.constant 0 : index
    %c0_20 = arith.constant 0 : index
    %52 = vector.load %arg4[%c0_18, %c0_19, %c0_20] : memref<1x1x896xf32, #tpu.memory_space<vmem>>, vector<1x1x896xf32>
    %53 = vector.shape_cast %52 : vector<1x1x896xf32> to vector<1x896xf32>
    %54 = vector.shape_cast %51 : vector<1x896xf32> to vector<1x1x896xf32>
    tpu.vector_store %arg4[%c0_18, %c0_19, %c0_20], %54 {strides = array<i32>} : memref<1x1x896xf32, #tpu.memory_space<vmem>>, vector<1x1x896xf32>,
    return
  }
  func.func @transform_0(%arg0: i32) -> (i32, i32, i32) {
    %c0_i32 = arith.constant 0 : i32
    %c0_i32_0 = arith.constant 0 : i32
    %c0_i32_1 = arith.constant 0 : i32
    return %arg0, %c0_i32, %c0_i32_0 : i32, i32, i32
  }
  func.func @transform_1(%arg0: i32) -> (i32, i32, i32) {
    %c0_i32 = arith.constant 0 : i32
    %c0_i32_0 = arith.constant 0 : i32
    %c0_i32_1 = arith.constant 0 : i32
    return %arg0, %c0_i32, %c0_i32_0 : i32, i32, i32
  }
  func.func @transform_2(%arg0: i32) -> (i32, i32, i32, i32) {
    %c0_i32 = arith.constant 0 : i32
    %c0_i32_0 = arith.constant 0 : i32
    %c0_i32_1 = arith.constant 0 : i32
    %c0_i32_2 = arith.constant 0 : i32
    return %arg0, %c0_i32, %c0_i32_0, %c0_i32_1 : i32, i32, i32, i32
  }
  func.func @transform_3(%arg0: i32) -> (i32, i32, i32) {
    %c0_i32 = arith.constant 0 : i32
    %c0_i32_0 = arith.constant 0 : i32
    %c0_i32_1 = arith.constant 0 : i32
    return %arg0, %c0_i32, %c0_i32_0 : i32, i32, i32
  }
}

module attributes {stable_mosaic.version = 11 : i64} {
  func.func @_mlp2_kernel(%arg0: i32, %arg1: memref<2x1440xf32, #tpu.memory_space<vmem>>, %arg2: memref<1440x50xf32, #tpu.memory_space<vmem>>, %arg3: memref<1x50xf32, #tpu.memory_space<vmem>>, %arg4: memref<50x10xf32, #tpu.memory_space<vmem>>, %arg5: memref<1x10xf32, #tpu.memory_space<vmem>>, %arg6: memref<2x10xf32, #tpu.memory_space<vmem>>) attributes {dimension_semantics = [#tpu.dimension_semantics<parallel>], iteration_bounds = array<i64: 1>, scalar_prefetch = 0 : i64, scratch_operands = 0 : i64, tpu.core_type = #tpu.core_type<tc>, window_params = [{transform_indices = @transform_0, window_bounds = array<i64: 2, 1440>}, {pipeline_mode = #tpu.pipeline_mode<synchronous>, transform_indices = @transform_1, window_bounds = array<i64: 1440, 50>}, {pipeline_mode = #tpu.pipeline_mode<synchronous>, transform_indices = @transform_2, window_bounds = array<i64: 1, 50>}, {pipeline_mode = #tpu.pipeline_mode<synchronous>, transform_indices = @transform_3, window_bounds = array<i64: 50, 10>}, {pipeline_mode = #tpu.pipeline_mode<synchronous>, transform_indices = @transform_4, window_bounds = array<i64: 1, 10>}, {transform_indices = @transform_5, window_bounds = array<i64: 2, 10>}]} {
    %c0 = arith.constant 0 : index
    %c0_0 = arith.constant 0 : index
    %0 = vector.load %arg1[%c0, %c0_0] : memref<2x1440xf32, #tpu.memory_space<vmem>>, vector<2x1440xf32>
    %c0_1 = arith.constant 0 : index
    %c0_2 = arith.constant 0 : index
    %1 = vector.load %arg2[%c0_1, %c0_2] : memref<1440x50xf32, #tpu.memory_space<vmem>>, vector<1440x50xf32>
    %cst = arith.constant dense<0.000000e+00> : vector<2x50xf32>
    %2 = tpu.matmul %0, %1, %cst {dimension_numbers = #tpu.dot_dimension_numbers<[1], [0], [0], [1], [0, 0, 1, 1], [], []>} : vector<2x1440xf32>, vector<1440x50xf32>, vector<2x50xf32> -> vector<2x50xf32>
    %c0_3 = arith.constant 0 : index
    %c0_4 = arith.constant 0 : index
    %3 = vector.load %arg3[%c0_3, %c0_4] : memref<1x50xf32, #tpu.memory_space<vmem>>, vector<1x50xf32>
    %4 = vector.broadcast %3 : vector<1x50xf32> to vector<2x50xf32>
    %5 = arith.addf %2, %4 : vector<2x50xf32>
    %cst_5 = arith.constant 0.000000e+00 : f32
    %6 = vector.broadcast %cst_5 : f32 to vector<2x50xf32>
    %7 = arith.maximumf %5, %6 : vector<2x50xf32>
    %c0_6 = arith.constant 0 : index
    %c0_7 = arith.constant 0 : index
    %8 = vector.load %arg4[%c0_6, %c0_7] : memref<50x10xf32, #tpu.memory_space<vmem>>, vector<50x10xf32>
    %cst_8 = arith.constant dense<0.000000e+00> : vector<2x10xf32>
    %9 = tpu.matmul %7, %8, %cst_8 {dimension_numbers = #tpu.dot_dimension_numbers<[1], [0], [0], [1], [0, 0, 1, 1], [], []>} : vector<2x50xf32>, vector<50x10xf32>, vector<2x10xf32> -> vector<2x10xf32>
    %c0_9 = arith.constant 0 : index
    %c0_10 = arith.constant 0 : index
    %10 = vector.load %arg5[%c0_9, %c0_10] : memref<1x10xf32, #tpu.memory_space<vmem>>, vector<1x10xf32>
    %11 = vector.broadcast %10 : vector<1x10xf32> to vector<2x10xf32>
    %12 = arith.addf %9, %11 : vector<2x10xf32>
    %c0_11 = arith.constant 0 : index
    %c0_12 = arith.constant 0 : index
    %13 = vector.load %arg6[%c0_11, %c0_12] : memref<2x10xf32, #tpu.memory_space<vmem>>, vector<2x10xf32>
    tpu.vector_store %arg6[%c0_11, %c0_12], %12 {strides = array<i32>} : memref<2x10xf32, #tpu.memory_space<vmem>>, vector<2x10xf32>,
    return
  }
  func.func @transform_0(%arg0: i32) -> (i32, i32) {
    %c0_i32 = arith.constant 0 : i32
    %c0_i32_0 = arith.constant 0 : i32
    return %arg0, %c0_i32 : i32, i32
  }
  func.func @transform_1(%arg0: i32) -> (i32, i32) {
    %c0_i32 = arith.constant 0 : i32
    %c0_i32_0 = arith.constant 0 : i32
    %c0_i32_1 = arith.constant 0 : i32
    return %c0_i32, %c0_i32_0 : i32, i32
  }
  func.func @transform_2(%arg0: i32) -> (i32, i32) {
    %c0_i32 = arith.constant 0 : i32
    %c0_i32_0 = arith.constant 0 : i32
    %c0_i32_1 = arith.constant 0 : i32
    return %c0_i32, %c0_i32_0 : i32, i32
  }
  func.func @transform_3(%arg0: i32) -> (i32, i32) {
    %c0_i32 = arith.constant 0 : i32
    %c0_i32_0 = arith.constant 0 : i32
    %c0_i32_1 = arith.constant 0 : i32
    return %c0_i32, %c0_i32_0 : i32, i32
  }
  func.func @transform_4(%arg0: i32) -> (i32, i32) {
    %c0_i32 = arith.constant 0 : i32
    %c0_i32_0 = arith.constant 0 : i32
    %c0_i32_1 = arith.constant 0 : i32
    return %c0_i32, %c0_i32_0 : i32, i32
  }
  func.func @transform_5(%arg0: i32) -> (i32, i32) {
    %c0_i32 = arith.constant 0 : i32
    %c0_i32_0 = arith.constant 0 : i32
    return %arg0, %c0_i32 : i32, i32
  }
}

</mosaic_0001>

<bundles_post_ra>
// kernel: net_forward.6
= control target key start
LH: loop header
LB: loop body
LE: loop exit
PB: predicated region body
PF: predicated region fallthrough
CT: control target
= control target key end

     0   :  { %s1709_s12 = smov 0   ;;  %s2083_s0 = inlined_call_operand.vmem [shape: f32[2,4,144,25], index: 0, kind: input, shape index: {}]   ;;  %s2084_s1 = inlined_call_operand.vmem [shape: f32[25,128], index: 1, kind: input, shape index: {}]   ;;  %s2085_s2 = inlined_call_operand.vmem [shape: f32[1,128], index: 2, kind: input, shape index: {}]   ;;  %s2086_s3 = inlined_call_operand.vmem [shape: f32[2,144,128], index: 3, kind: output, shape index: {}]  }
   0x1 LB: > { %s1261_s13 = sadd.s32 4294967295, %s1686_s12   ;;  %p1265_p0 = scmp.ge.s32.totalorder %s1686_s12, 1  ;;  %s1686_s12 = sphi %s1709_s12, %s13_s12  }
   0x2   : > { %p137_p1 = scmp.lt.s32.totalorder %s1686_s12, 3 }
   0x4   : > { %p138_p2 = pnand %p1265_p0, %p137_p1 }
   0x5   : > { %v171_v0 = vld [vmem:[%s2084_s1] sm:$0xff] (!%p138_p2)  ;;  %v172_v1 = vld [vmem:[%s2084_s1 + $0x8] sm:$0xff] (!%p138_p2)  ;;  %v173_v2 = vld [vmem:[%s2084_s1 + $0x10] sm:$0xff] (!%p138_p2)  ;;  %vm248_vm0 = vcmask (!%p138_p2), 1040384   ;;  %p161_p3 = scmp.lt.s32.totalorder (!%p138_p2), %s1261_s13, 1  ;;  %vm1688_vm1 = vmmov (!%p138_p2), 1  }
   0x6   : > { %141 = sbr.rel (%p138_p2) target bundleno = 309 (0x135), region = 32  ;;  %v1629_v3 = vpack.c.bf16 (!%p138_p2), %v172_v1, %v171_v0  ;;  %v174_v4 = vld [vmem:[%s2084_s1 + $0x18] sm:$0x1] (!%p138_p2)  ;;  %vm1729_vm2 = vmpackc.low (!%p138_p2), %vm248_vm0, %vm1688_vm1  ;;  %vm193_vm3 = vcmask (!%p138_p2), 203776  }
   0x7   : > { %v1633_v5 = vpack.c.bf16 (!%p138_p2), %v174_v4, %v173_v2 }
   0x8   : > { %1630 = vmatprep.subr.bf16.mxu0 (!%p138_p2), %v1629_v3  ;;  %1640 = vmatprep.subr.bf16.mxu1 (!%p138_p2), %v1629_v3 }
   0x9   : > { %1632 = vmatpush3.bf16.msra.mxu0 (!%p138_p2), %v1629_v3  ;;  %1642 = vmatpush3.bf16.msra.mxu1 (!%p138_p2), %v1629_v3 }
   0xa   : > { %1635 = vmatprep.subr.msk.bf16.mxu0 (!%p138_p2), %vm1729_vm2, %v1633_v5  ;;  %1645 = vmatprep.subr.msk.bf16.mxu1 (!%p138_p2), %vm1729_vm2, %v1633_v5 }
   0xd   : > { %s2090_s13 = smov (!%p161_p3, %s1261_s13), 1  ;;  %1638 = vmatpush3.bf16.msk.msra.mxu0 %vm1729_vm2, %v1633_v5  ;;  %1648 = vmatpush3.bf16.msk.msra.mxu1 %vm1729_vm2, %v1633_v5 }
   0xe   : > { %s1669_s22 = smul.u32 576, %s2090_s13  ;;  %1650 = vmatprep.subr.bf16.mxu0 %v1629_v3  ;;  %1660 = vmatprep.subr.bf16.mxu1 %v1629_v3 }
   0xf   : > { %s1670_s26 = smul.u32 144, %s2090_s13 }
  0x10   : > { %s1743_s25 = scalar_lea.vmem %s2083_s0, %s1669_s22 }
  0x11   : > { %v175_v7 = vld [vmem:[%s1743_s25] sm:$0xff]  ;;  %v1287_v8 = vld [vmem:[%s1743_s25 + $0x90] sm:$0xff]  ;;  %v176_v9 = vld [vmem:[%s1743_s25 + $0x8] sm:$0xff]  ;;  %s2001_s4 = scalar_lea.vmem %s2086_s3, %s1670_s26 }
  0x12   : > { %v1288_v10 = vld [vmem:[%s1743_s25 + $0x98] sm:$0xff]  ;;  %1497 = vmatprep.mubr.msk.f32.mxu0 %vm193_vm3, %v175_v7  ;;  %1532 = vmatprep.mubr.msk.f32.mxu1 %vm193_vm3, %v1287_v8  ;;  %v177_v11 = vld [vmem:[%s1743_s25 + $0x10] sm:$0xff]  ;;  %v1289_v12 = vld [vmem:[%s1743_s25 + $0xa0] sm:$0xff] }
  0x13   : > { %1498 = vmatmul.mubr.msk.f32.vlgmr.msra.gmra.mrb[0].mxu0 %vm193_vm3, %v176_v9  ;;  %1533 = vmatmul.mubr.msk.f32.vlgmr.msra.gmra.mrb[0].mxu1 %vm193_vm3, %v1288_v10  ;;  %v178_v13 = vld [vmem:[%s1743_s25 + $0x18] sm:$0xff]  ;;  %v1290_v14 = vld [vmem:[%s1743_s25 + $0xa8] sm:$0xff]  ;;  %v179_v15 = vld [vmem:[%s1743_s25 + $0x20] sm:$0xff] }
  0x14   : > { %1652 = vmatpush3.bf16.msra.mxu0 %v1629_v3  ;;  %1500 = vmatprep.mubr.msk.f32.mxu0 %vm193_vm3, %v177_v11  ;;  %v1291_v16 = vld [vmem:[%s1743_s25 + $0xb0] sm:$0xff]  ;;  %v180_v17 = vld [vmem:[%s1743_s25 + $0x28] sm:$0xff]  ;;  %v1292_v18 = vld [vmem:[%s1743_s25 + $0xb8] sm:$0xff] }
  0x15   : > { %1535 = vmatprep.mubr.msk.f32.mxu1 %vm193_vm3, %v1289_v12  ;;  %1662 = vmatpush3.bf16.msra.mxu1 %v1629_v3  ;;  %v181_v19 = vld [vmem:[%s1743_s25 + $0x30] sm:$0xff]  ;;  %v1293_v20 = vld [vmem:[%s1743_s25 + $0xc0] sm:$0xff]  ;;  %v182_v21 = vld [vmem:[%s1743_s25 + $0x38] sm:$0xff] }
  0x16   : > { %1655 = vmatprep.subr.msk.bf16.mxu0 %vm1729_vm2, %v1633_v5  ;;  %1665 = vmatprep.subr.msk.bf16.mxu1 %vm1729_vm2, %v1633_v5  ;;  %v1294_v22 = vld [vmem:[%s1743_s25 + $0xc8] sm:$0xff]  ;;  %v183_v23 = vld [vmem:[%s1743_s25 + $0x40] sm:$0xff]  ;;  %v1295_v24 = vld [vmem:[%s1743_s25 + $0xd0] sm:$0xff] }
  0x17   : > { %1501 = vmatmul.mubr.msk.f32.gmra.mrb[2].mxu0 %vm193_vm3, %v178_v13  ;;  %1536 = vmatmul.mubr.msk.f32.gmra.mrb[2].mxu1 %vm193_vm3, %v1290_v14  ;;  %v184_v25 = vld [vmem:[%s1743_s25 + $0x48] sm:$0xff]  ;;  %v1296_v26 = vld [vmem:[%s1743_s25 + $0xd8] sm:$0xff]  ;;  %v185_v27 = vld [vmem:[%s1743_s25 + $0x50] sm:$0xff] }
  0x18   : > { %1503 = vmatprep.mubr.msk.f32.mxu0 %vm193_vm3, %v179_v15  ;;  %1538 = vmatprep.mubr.msk.f32.mxu1 %vm193_vm3, %v1291_v16  ;;  %v1297_v28 = vld [vmem:[%s1743_s25 + $0xe0] sm:$0xff]  ;;  %v186_v29 = vld [vmem:[%s1743_s25 + $0x58] sm:$0xff]  ;;  %v1298_v30 = vld [vmem:[%s1743_s25 + $0xe8] sm:$0xff] }
  0x19   : > { %1658 = vmatpush3.bf16.msk.msra.mxu0 %vm1729_vm2, %v1633_v5  ;;  %1668 = vmatpush3.bf16.msk.msra.mxu1 %vm1729_vm2, %v1633_v5  ;;  %v187_v31 = vld [vmem:[%s1743_s25 + $0x60] sm:$0xff]  ;;  %v1299_v32 = vld [vmem:[%s1743_s25 + $0xf0] sm:$0xff]  ;;  %v188_v33 = vld [vmem:[%s1743_s25 + $0x68] sm:$0xff] }
  0x1a   : > { %v1300_v34 = vld [vmem:[%s1743_s25 + $0xf8] sm:$0xff]  ;;  %v189_v35 = vld [vmem:[%s1743_s25 + $0x70] sm:$0xff]  ;;  %v1301_v36 = vld [vmem:[%s1743_s25 + $0x100] sm:$0xff] }
  0x1b   : > { %1504 = vmatmul.mubr.msk.f32.gmra.mrb[4].mxu0 %vm193_vm3, %v180_v17  ;;  %1539 = vmatmul.mubr.msk.f32.gmra.mrb[4].mxu1 %vm193_vm3, %v1292_v18  ;;  %v190_v37 = vld [vmem:[%s1743_s25 + $0x78] sm:$0xff]  ;;  %v1302_v38 = vld [vmem:[%s1743_s25 + $0x108] sm:$0xff]  ;;  %v191_v39 = vld [vmem:[%s1743_s25 + $0x80] sm:$0xff] }
  0x1c   : > { %1506 = vmatprep.mubr.msk.f32.mxu0 %vm193_vm3, %v181_v19  ;;  %1541 = vmatprep.mubr.msk.f32.mxu1 %vm193_vm3, %v1293_v20  ;;  %v1303_v40 = vld [vmem:[%s1743_s25 + $0x110] sm:$0xff]  ;;  %v192_v41 = vld [vmem:[%s1743_s25 + $0x88] sm:$0xff]  ;;  %v1304_v42 = vld [vmem:[%s1743_s25 + $0x118] sm:$0xff] }
  0x1d   : > { %v1324_v43 = vld [vmem:[%s1743_s25 + $0x120] sm:$0xff]  ;;  %v1361_v44 = vld [vmem:[%s1743_s25 + $0x1b0] sm:$0xff]  ;;  %v1325_v45 = vld [vmem:[%s1743_s25 + $0x128] sm:$0xff] }
  0x1e   : > { %v1362_v46 = vld [vmem:[%s1743_s25 + $0x1b8] sm:$0xff]  ;;  %v1326_v47 = vld [vmem:[%s1743_s25 + $0x130] sm:$0xff]  ;;  %v1363_v48 = vld [vmem:[%s1743_s25 + $0x1c0] sm:$0xff] }
  0x1f   : > { %1507 = vmatmul.mubr.msk.f32.gmra.mrb[6].mxu0 %vm193_vm3, %v182_v21  ;;  %1542 = vmatmul.mubr.msk.f32.gmra.mrb[6].mxu1 %vm193_vm3, %v1294_v22  ;;  %v1327_v49 = vld [vmem:[%s1743_s25 + $0x138] sm:$0xff]  ;;  %v1364_v50 = vld [vmem:[%s1743_s25 + $0x1c8] sm:$0xff]  ;;  %v1328_v51 = vld [vmem:[%s1743_s25 + $0x140] sm:$0xff] }
  0x20   : > { %1509 = vmatprep.mubr.msk.f32.mxu0 %vm193_vm3, %v183_v23  ;;  %1544 = vmatprep.mubr.msk.f32.mxu1 %vm193_vm3, %v1295_v24  ;;  %v1365_v52 = vld [vmem:[%s1743_s25 + $0x1d0] sm:$0xff]  ;;  %v1329_v53 = vld [vmem:[%s1743_s25 + $0x148] sm:$0xff]  ;;  %v1366_v54 = vld [vmem:[%s1743_s25 + $0x1d8] sm:$0xff] }
  0x21   : > { %v1330_v55 = vld [vmem:[%s1743_s25 + $0x150] sm:$0xff]  ;;  %v1367_v56 = vld [vmem:[%s1743_s25 + $0x1e0] sm:$0xff]  ;;  %v1331_v57 = vld [vmem:[%s1743_s25 + $0x158] sm:$0xff] }
  0x22   : > { %v1368_v58 = vld [vmem:[%s1743_s25 + $0x1e8] sm:$0xff]  ;;  %v1332_v59 = vld [vmem:[%s1743_s25 + $0x160] sm:$0xff]  ;;  %v1369_v60 = vld [vmem:[%s1743_s25 + $0x1f0] sm:$0xff] }
  0x23   : > { %1510 = vmatmul.mubr.msk.f32.gmra.mrb[8].mxu0 %vm193_vm3, %v184_v25  ;;  %1545 = vmatmul.mubr.msk.f32.gmra.mrb[8].mxu1 %vm193_vm3, %v1296_v26  ;;  %v1333_v61 = vld [vmem:[%s1743_s25 + $0x168] sm:$0xff]  ;;  %v1370_v62 = vld [vmem:[%s1743_s25 + $0x1f8] sm:$0xff]  ;;  %v1334_v63 = vld [vmem:[%s1743_s25 + $0x170] sm:$0xff] }
  0x24   : > { %1512 = vmatprep.mubr.msk.f32.mxu0 %vm193_vm3, %v185_v27  ;;  %1547 = vmatprep.mubr.msk.f32.mxu1 %vm193_vm3, %v1297_v28  ;;  %v1371_v0 = vld [vmem:[%s1743_s25 + $0x200] sm:$0xff]  ;;  %v1335_v1 = vld [vmem:[%s1743_s25 + $0x178] sm:$0xff]  ;;  %v1372_v2 = vld [vmem:[%s1743_s25 + $0x208] sm:$0xff] }
  0x25   : > { %v1336_v3 = vld [vmem:[%s1743_s25 + $0x180] sm:$0xff]  ;;  %v1373_v4 = vld [vmem:[%s1743_s25 + $0x210] sm:$0xff]  ;;  %v1337_v5 = vld [vmem:[%s1743_s25 + $0x188] sm:$0xff] }
  0x26   : > { %v1374_v6 = vld [vmem:[%s1743_s25 + $0x218] sm:$0xff]  ;;  %v1338_v7 = vld [vmem:[%s1743_s25 + $0x190] sm:$0xff]  ;;  %v1375_v8 = vld [vmem:[%s1743_s25 + $0x220] sm:$0xff] }
  0x27   : > { %1513 = vmatmul.mubr.msk.f32.gmra.mrb[10].mxu0 %vm193_vm3, %v186_v29  ;;  %1548 = vmatmul.mubr.msk.f32.gmra.mrb[10].mxu1 %vm193_vm3, %v1298_v30  ;;  %v1339_v9 = vld [vmem:[%s1743_s25 + $0x198] sm:$0xff]  ;;  %v1376_v10 = vld [vmem:[%s1743_s25 + $0x228] sm:$0xff]  ;;  %v1340_v11 = vld [vmem:[%s1743_s25 + $0x1a0] sm:$0xff] }
  0x28   : > { %1515 = vmatprep.mubr.msk.f32.mxu0 %vm193_vm3, %v187_v31  ;;  %1550 = vmatprep.mubr.msk.f32.mxu1 %vm193_vm3, %v1299_v32  ;;  %v1377_v12 = vld [vmem:[%s1743_s25 + $0x230] sm:$0xff]  ;;  %v1341_v13 = vld [vmem:[%s1743_s25 + $0x1a8] sm:$0xff]  ;;  %v1378_v14 = vld [vmem:[%s1743_s25 + $0x238] sm:$0xff] }
  0x2b   : > { %1516 = vmatmul.mubr.msk.f32.gmra.mrb[12].mxu0 %vm193_vm3, %v188_v33  ;;  %1551 = vmatmul.mubr.msk.f32.gmra.mrb[12].mxu1 %vm193_vm3, %v1300_v34 }
  0x2c   : > { %1518 = vmatprep.mubr.msk.f32.mxu0 %vm193_vm3, %v189_v35  ;;  %1553 = vmatprep.mubr.msk.f32.mxu1 %vm193_vm3, %v1301_v36 }
  0x2f   : > { %1519 = vmatmul.mubr.msk.f32.gmra.mrb[14].mxu0 %vm193_vm3, %v190_v37  ;;  %1554 = vmatmul.mubr.msk.f32.gmra.mrb[14].mxu1 %vm193_vm3, %v1302_v38 }
  0x30   : > { %1521 = vmatprep.mubr.msk.f32.mxu0 %vm193_vm3, %v191_v39  ;;  %1556 = vmatprep.mubr.msk.f32.mxu1 %vm193_vm3, %v1303_v40 }
  0x33   : > { %1522 = vmatmul.mubr.msk.f32.gmra.mrb[16].mxu0 %vm193_vm3, %v192_v41  ;;  %1557 = vmatmul.mubr.msk.f32.gmra.mrb[16].mxu1 %vm193_vm3, %v1304_v42 }
  0x34   : > { %1567 = vmatprep.mubr.msk.f32.mxu0 %vm193_vm3, %v1324_v43  ;;  %1602 = vmatprep.mubr.msk.f32.mxu1 %vm193_vm3, %v1361_v44 }
  0x37   : > { %1568 = vmatmul.mubr.msk.f32.vlgmr.msra.gmra.mrb[18].mxu0 %vm193_vm3, %v1325_v45  ;;  %1603 = vmatmul.mubr.msk.f32.vlgmr.msra.gmra.mrb[18].mxu1 %vm193_vm3, %v1362_v46 }
  0x38   : > { %1570 = vmatprep.mubr.msk.f32.mxu0 %vm193_vm3, %v1326_v47  ;;  %1605 = vmatprep.mubr.msk.f32.mxu1 %vm193_vm3, %v1363_v48 }
  0x3b   : > { %1571 = vmatmul.mubr.msk.f32.gmra.mrb[20].mxu0 %vm193_vm3, %v1327_v49  ;;  %1606 = vmatmul.mubr.msk.f32.gmra.mrb[20].mxu1 %vm193_vm3, %v1364_v50 }
  0x3c   : > { %1573 = vmatprep.mubr.msk.f32.mxu0 %vm193_vm3, %v1328_v51  ;;  %1608 = vmatprep.mubr.msk.f32.mxu1 %vm193_vm3, %v1365_v52 }
  0x3f   : > { %1574 = vmatmul.mubr.msk.f32.gmra.mrb[22].mxu0 %vm193_vm3, %v1329_v53  ;;  %1609 = vmatmul.mubr.msk.f32.gmra.mrb[22].mxu1 %vm193_vm3, %v1366_v54 }
  0x40   : > { %1576 = vmatprep.mubr.msk.f32.mxu0 %vm193_vm3, %v1330_v55  ;;  %1611 = vmatprep.mubr.msk.f32.mxu1 %vm193_vm3, %v1367_v56 }
  0x43   : > { %1577 = vmatmul.mubr.msk.f32.gmra.mrb[24].mxu0 %vm193_vm3, %v1331_v57  ;;  %1612 = vmatmul.mubr.msk.f32.gmra.mrb[24].mxu1 %vm193_vm3, %v1368_v58 }
  0x44   : > { %1579 = vmatprep.mubr.msk.f32.mxu0 %vm193_vm3, %v1332_v59  ;;  %1614 = vmatprep.mubr.msk.f32.mxu1 %vm193_vm3, %v1369_v60 }
  0x47   : > { %1580 = vmatmul.mubr.msk.f32.gmra.mrb[26].mxu0 %vm193_vm3, %v1333_v61  ;;  %1615 = vmatmul.mubr.msk.f32.gmra.mrb[26].mxu1 %vm193_vm3, %v1370_v62 }
  0x48   : > { %1582 = vmatprep.mubr.msk.f32.mxu0 %vm193_vm3, %v1334_v63  ;;  %1617 = vmatprep.mubr.msk.f32.mxu1 %vm193_vm3, %v1371_v0 }
  0x4b   : > { %1583 = vmatmul.mubr.msk.f32.gmra.mrb[28].mxu0 %vm193_vm3, %v1335_v1  ;;  %1618 = vmatmul.mubr.msk.f32.gmra.mrb[28].mxu1 %vm193_vm3, %v1372_v2 }
  0x4c   : > { %1585 = vmatprep.mubr.msk.f32.mxu0 %vm193_vm3, %v1336_v3  ;;  %1620 = vmatprep.mubr.msk.f32.mxu1 %vm193_vm3, %v1373_v4 }
  0x4f   : > { %1586 = vmatmul.mubr.msk.f32.gmra.mrb[30].mxu0 %vm193_vm3, %v1337_v5  ;;  %1621 = vmatmul.mubr.msk.f32.gmra.mrb[30].mxu1 %vm193_vm3, %v1374_v6 }
  0x50   : > { %1588 = vmatprep.mubr.msk.f32.mxu0 %vm193_vm3, %v1338_v7  ;;  %1623 = vmatprep.mubr.msk.f32.mxu1 %vm193_vm3, %v1375_v8 }
  0x53   : > { %1589 = vmatmul.mubr.msk.f32.gmra.mrb[32].mxu0 %vm193_vm3, %v1339_v9  ;;  %1624 = vmatmul.mubr.msk.f32.gmra.mrb[32].mxu1 %vm193_vm3, %v1376_v10 }
  0x54   : > { %1591 = vmatprep.mubr.msk.f32.mxu0 %vm193_vm3, %v1340_v11  ;;  %1626 = vmatprep.mubr.msk.f32.mxu1 %vm193_vm3, %v1377_v12  ;;  %v1995_v11 = vld [vmem:[%s2085_s2] ss:$0 sm:$0xff] }
  0x57   : > { %1592 = vmatmul.mubr.msk.f32.gmra.mrb[34].mxu0 %vm193_vm3, %v1341_v13  ;;  %1627 = vmatmul.mubr.msk.f32.gmra.mrb[34].mxu1 %vm193_vm3, %v1378_v14 }
  0xe6   : > { %v1499_v15 = vpop.f32.mrb[0].mxu0  ;;  %v1534_v16 = vpop.f32.mrb[0].mxu1 }
  0xe7   : > { %v636_v17 = vmax.f32 %v1499_v15, %v1534_v16  ;;  %v318_v18 = vpop.f32.mrb[1].mxu0  ;;  %v546_v19 = vpop.f32.mrb[1].mxu1 }
  0xe8   : > { %v635_v20 = vmax.f32 %v318_v18, %v546_v19 }
  0xea   : > { %v1502_v21 = vpop.f32.mrb[2].mxu0  ;;  %v1537_v22 = vpop.f32.mrb[2].mxu1 }
  0xeb   : > { %v638_v23 = vmax.f32 %v1502_v21, %v1537_v22  ;;  %v1901_v24 = vpop.f32.mrb[3].mxu0  ;;  %v1903_v25 = vpop.f32.mrb[3].mxu1 }
  0xec   : > { %v637_v26 = vmax.f32 %v1901_v24, %v1903_v25 }
  0xee   : > { %v1907_v27 = vpop.f32.mrb[4].mxu0  ;;  %v1909_v28 = vpop.f32.mrb[4].mxu1 }
  0xef   : > { %v640_v29 = vmax.f32 %v1907_v27, %v1909_v28  ;;  %v1913_v30 = vpop.f32.mrb[5].mxu0  ;;  %v1915_v31 = vpop.f32.mrb[5].mxu1 }
  0xf0   : > { %v639_v32 = vmax.f32 %v1913_v30, %v1915_v31 }
  0xf2   : > { %v1919_v33 = vpop.f32.mrb[6].mxu0  ;;  %v1921_v34 = vpop.f32.mrb[6].mxu1 }
  0xf3   : > { %v642_v35 = vmax.f32 %v1919_v33, %v1921_v34  ;;  %v1925_v36 = vpop.f32.mrb[7].mxu0  ;;  %v1927_v37 = vpop.f32.mrb[7].mxu1 }
  0xf4   : > { %v641_v38 = vmax.f32 %v1925_v36, %v1927_v37 }
  0xf6   : > { %v1931_v39 = vpop.f32.mrb[8].mxu0  ;;  %v1933_v40 = vpop.f32.mrb[8].mxu1 }
  0xf7   : > { %v644_v41 = vmax.f32 %v1931_v39, %v1933_v40  ;;  %v1937_v42 = vpop.f32.mrb[9].mxu0  ;;  %v1939_v43 = vpop.f32.mrb[9].mxu1 }
  0xf8   : > { %v643_v44 = vmax.f32 %v1937_v42, %v1939_v43 }
  0xfa   : > { %v1943_v45 = vpop.f32.mrb[10].mxu0  ;;  %v1945_v46 = vpop.f32.mrb[10].mxu1 }
  0xfb   : > { %v646_v47 = vmax.f32 %v1943_v45, %v1945_v46  ;;  %v1949_v48 = vpop.f32.mrb[11].mxu0  ;;  %v1951_v49 = vpop.f32.mrb[11].mxu1 }
  0xfc   : > { %v645_v50 = vmax.f32 %v1949_v48, %v1951_v49 }
  0xfe   : > { %v1955_v51 = vpop.f32.mrb[12].mxu0  ;;  %v1957_v52 = vpop.f32.mrb[12].mxu1 }
  0xff   : > { %v648_v53 = vmax.f32 %v1955_v51, %v1957_v52  ;;  %v1961_v54 = vpop.f32.mrb[13].mxu0  ;;  %v1963_v55 = vpop.f32.mrb[13].mxu1 }
 0x100   : > { %v647_v56 = vmax.f32 %v1961_v54, %v1963_v55 }
 0x102   : > { %v1967_v57 = vpop.f32.mrb[14].mxu0  ;;  %v1969_v58 = vpop.f32.mrb[14].mxu1 }
 0x103   : > { %v650_v59 = vmax.f32 %v1967_v57, %v1969_v58  ;;  %v1973_v60 = vpop.f32.mrb[15].mxu0  ;;  %v1975_v61 = vpop.f32.mrb[15].mxu1 }
 0x104   : > { %v649_v62 = vmax.f32 %v1973_v60, %v1975_v61 }
 0x106   : > { %v1979_v63 = vpop.f32.mrb[16].mxu0  ;;  %v1981_v0 = vpop.f32.mrb[16].mxu1 }
 0x107   : > { %v652_v1 = vmax.f32 %v1979_v63, %v1981_v0  ;;  %v1985_v2 = vpop.f32.mrb[17].mxu0  ;;  %v1987_v3 = vpop.f32.mrb[17].mxu1 }
 0x108   : > { %v651_v4 = vmax.f32 %v1985_v2, %v1987_v3 }
 0x10a   : > { %v1569_v5 = vpop.f32.mrb[18].mxu0  ;;  %v1604_v6 = vpop.f32.mrb[18].mxu1 }
 0x10b   : > { %v882_v7 = vmax.f32 %v636_v17, %v1569_v5  ;;  %v792_v8 = vpop.f32.mrb[19].mxu0  ;;  %v1038_v9 = vpop.f32.mrb[19].mxu1 }
 0x10c   : > { %v881_v10 = vmax.f32 %v635_v20, %v792_v8 }
 0x10d   : > { %v1128_v12 = vmax.f32 %v882_v7, %v1604_v6 }
 0x10e   : > { %v1127_v13 = vmax.f32 %v881_v10, %v1038_v9  ;;  %v1572_v14 = vpop.f32.mrb[20].mxu0  ;;  %v1607_v15 = vpop.f32.mrb[20].mxu1 }
 0x10f   : > { %v1153_v16 = vadd.f32 %v1995_v11, %v1128_v12  ;;  %v884_v18 = vmax.f32 %v638_v23, %v1572_v14  ;;  %v802_v19 = vpop.f32.mrb[21].mxu0  ;;  %v1048_v21 = vpop.f32.mrb[21].mxu1 }
 0x110   : > { %v1152_v17 = vadd.f32 %v1995_v11, %v1127_v13  ;;  %v883_v20 = vmax.f32 %v637_v26, %v802_v19 }
 0x111   : > { %v1171_v22 = vmax.f32 %v1153_v16, 0.0  ;;  %v1130_v24 = vmax.f32 %v884_v18, %v1607_v15 }
 0x112   : > { %v1170_v25 = vmax.f32 %v1152_v17, 0.0  ;;  %v1129_v5 = vmax.f32 %v883_v20, %v1048_v21  ;;  %v1575_v6 = vpop.f32.mrb[22].mxu0  ;;  %v1610_v7 = vpop.f32.mrb[22].mxu1 }
 0x113   : > { %1189 = vst [vmem:[%s2001_s4 + $0x8] sm:$0xff] %v1171_v22  ;;  %v1155_v23 = vadd.f32 %v1995_v11, %v1130_v24  ;;  %v886_v8 = vmax.f32 %v640_v29, %v1575_v6  ;;  %v812_v9 = vpop.f32.mrb[23].mxu0  ;;  %v1058_v10 = vpop.f32.mrb[23].mxu1 }
 0x114   : > { %1188 = vst [vmem:[%s2001_s4] sm:$0xff] %v1170_v25  ;;  %v1154_v26 = vadd.f32 %v1995_v11, %v1129_v5  ;;  %v885_v12 = vmax.f32 %v639_v32, %v812_v9 }
 0x115   : > { %v1173_v13 = vmax.f32 %v1155_v23, 0.0  ;;  %v1132_v14 = vmax.f32 %v886_v8, %v1610_v7 }
 0x116   : > { %v1172_v15 = vmax.f32 %v1154_v26, 0.0  ;;  %v1131_v16 = vmax.f32 %v885_v12, %v1058_v10  ;;  %v1578_v18 = vpop.f32.mrb[24].mxu0  ;;  %v1613_v19 = vpop.f32.mrb[24].mxu1 }
 0x117   : > { %1191 = vst [vmem:[%s2001_s4 + $0x18] sm:$0xff] %v1173_v13  ;;  %v1157_v27 = vadd.f32 %v1995_v11, %v1132_v14  ;;  %v888_v28 = vmax.f32 %v642_v35, %v1578_v18  ;;  %v822_v29 = vpop.f32.mrb[25].mxu0  ;;  %v1068_v21 = vpop.f32.mrb[25].mxu1 }
 0x118   : > { %1190 = vst [vmem:[%s2001_s4 + $0x10] sm:$0xff] %v1172_v15  ;;  %v1156_v30 = vadd.f32 %v1995_v11, %v1131_v16  ;;  %v887_v31 = vmax.f32 %v641_v38, %v822_v29 }
 0x119   : > { %v1175_v32 = vmax.f32 %v1157_v27, 0.0  ;;  %v1134_v17 = vmax.f32 %v888_v28, %v1613_v19 }
 0x11a   : > { %v1174_v20 = vmax.f32 %v1156_v30, 0.0  ;;  %v1133_v22 = vmax.f32 %v887_v31, %v1068_v21  ;;  %v1581_v24 = vpop.f32.mrb[26].mxu0  ;;  %v1616_v25 = vpop.f32.mrb[26].mxu1 }
 0x11b   : > { %1193 = vst [vmem:[%s2001_s4 + $0x28] sm:$0xff] %v1175_v32  ;;  %v1159_v33 = vadd.f32 %v1995_v11, %v1134_v17  ;;  %v890_v34 = vmax.f32 %v644_v41, %v1581_v24  ;;  %v832_v35 = vpop.f32.mrb[27].mxu0  ;;  %v1078_v5 = vpop.f32.mrb[27].mxu1 }
 0x11c   : > { %1192 = vst [vmem:[%s2001_s4 + $0x20] sm:$0xff] %v1174_v20  ;;  %v1158_v36 = vadd.f32 %v1995_v11, %v1133_v22  ;;  %v889_v37 = vmax.f32 %v643_v44, %v832_v35 }
 0x11d   : > { %v1177_v38 = vmax.f32 %v1159_v33, 0.0  ;;  %v1136_v6 = vmax.f32 %v890_v34, %v1616_v25 }
 0x11e   : > { %v1176_v7 = vmax.f32 %v1158_v36, 0.0  ;;  %v1135_v23 = vmax.f32 %v889_v37, %v1078_v5  ;;  %v1584_v8 = vpop.f32.mrb[28].mxu0  ;;  %v1619_v9 = vpop.f32.mrb[28].mxu1 }
 0x11f   : > { %1195 = vst [vmem:[%s2001_s4 + $0x38] sm:$0xff] %v1177_v38  ;;  %v1161_v39 = vadd.f32 %v1995_v11, %v1136_v6  ;;  %v892_v40 = vmax.f32 %v646_v47, %v1584_v8  ;;  %v842_v41 = vpop.f32.mrb[29].mxu0  ;;  %v1088_v10 = vpop.f32.mrb[29].mxu1 }
 0x120   : > { %1194 = vst [vmem:[%s2001_s4 + $0x30] sm:$0xff] %v1176_v7  ;;  %v1160_v42 = vadd.f32 %v1995_v11, %v1135_v23  ;;  %v891_v43 = vmax.f32 %v645_v50, %v842_v41 }
 0x121   : > { %v1179_v44 = vmax.f32 %v1161_v39, 0.0  ;;  %v1138_v26 = vmax.f32 %v892_v40, %v1619_v9 }
 0x122   : > { %v1178_v12 = vmax.f32 %v1160_v42, 0.0  ;;  %v1137_v13 = vmax.f32 %v891_v43, %v1088_v10  ;;  %v1587_v14 = vpop.f32.mrb[30].mxu0  ;;  %v1622_v15 = vpop.f32.mrb[30].mxu1 }
 0x123   : > { %1197 = vst [vmem:[%s2001_s4 + $0x48] sm:$0xff] %v1179_v44  ;;  %v1163_v45 = vadd.f32 %v1995_v11, %v1138_v26  ;;  %v894_v46 = vmax.f32 %v648_v53, %v1587_v14  ;;  %v852_v47 = vpop.f32.mrb[31].mxu0  ;;  %v1098_v16 = vpop.f32.mrb[31].mxu1 }
 0x124   : > { %1196 = vst [vmem:[%s2001_s4 + $0x40] sm:$0xff] %v1178_v12  ;;  %v1162_v48 = vadd.f32 %v1995_v11, %v1137_v13  ;;  %v893_v49 = vmax.f32 %v647_v56, %v852_v47 }
 0x125   : > { %v1181_v50 = vmax.f32 %v1163_v45, 0.0  ;;  %v1140_v18 = vmax.f32 %v894_v46, %v1622_v15 }
 0x126   : > { %v1180_v19 = vmax.f32 %v1162_v48, 0.0  ;;  %v1139_v27 = vmax.f32 %v893_v49, %v1098_v16  ;;  %v1590_v28 = vpop.f32.mrb[32].mxu0  ;;  %v1625_v29 = vpop.f32.mrb[32].mxu1 }
 0x127   : > { %1199 = vst [vmem:[%s2001_s4 + $0x58] sm:$0xff] %v1181_v50  ;;  %v1165_v51 = vadd.f32 %v1995_v11, %v1140_v18  ;;  %v896_v52 = vmax.f32 %v650_v59, %v1590_v28  ;;  %v862_v53 = vpop.f32.mrb[33].mxu0  ;;  %v1108_v21 = vpop.f32.mrb[33].mxu1 }
 0x128   : > { %1198 = vst [vmem:[%s2001_s4 + $0x50] sm:$0xff] %v1180_v19  ;;  %v1164_v54 = vadd.f32 %v1995_v11, %v1139_v27  ;;  %v895_v55 = vmax.f32 %v649_v62, %v862_v53 }
 0x129   : > { %v1183_v56 = vmax.f32 %v1165_v51, 0.0  ;;  %v1142_v30 = vmax.f32 %v896_v52, %v1625_v29 }
 0x12a   : > { %v1182_v31 = vmax.f32 %v1164_v54, 0.0  ;;  %v1141_v32 = vmax.f32 %v895_v55, %v1108_v21  ;;  %v1593_v17 = vpop.f32.mrb[34].mxu0  ;;  %v1628_v20 = vpop.f32.mrb[34].mxu1 }
 0x12b   : > { %1201 = vst [vmem:[%s2001_s4 + $0x68] sm:$0xff] %v1183_v56  ;;  %v1167_v57 = vadd.f32 %v1995_v11, %v1142_v30  ;;  %v898_v58 = vmax.f32 %v652_v1, %v1593_v17  ;;  %v872_v59 = vpop.f32.mrb[35].mxu0  ;;  %v1118_v60 = vpop.f32.mrb[35].mxu1 }
 0x12c   : > { %1200 = vst [vmem:[%s2001_s4 + $0x60] sm:$0xff] %v1182_v31  ;;  %v1166_v61 = vadd.f32 %v1995_v11, %v1141_v32  ;;  %v897_v62 = vmax.f32 %v651_v4, %v872_v59 }
 0x12d   : > { %v1185_v22 = vmax.f32 %v1167_v57, 0.0  ;;  %v1144_v24 = vmax.f32 %v898_v58, %v1628_v20 }
 0x12e   : > { %v1184_v25 = vmax.f32 %v1166_v61, 0.0  ;;  %v1143_v33 = vmax.f32 %v897_v62, %v1118_v60 }
 0x12f   : > { %1203 = vst [vmem:[%s2001_s4 + $0x78] sm:$0xff] %v1185_v22  ;;  %v1169_v34 = vadd.f32 %v1995_v11, %v1144_v24 }
 0x130   : > { %1202 = vst [vmem:[%s2001_s4 + $0x70] sm:$0xff] %v1184_v25  ;;  %v1168_v63 = vadd.f32 %v1995_v11, %v1143_v33 }
 0x131   : > { %v1187_v0 = vmax.f32 %v1169_v34, 0.0 }
 0x132   : > { %v1186_v1 = vmax.f32 %v1168_v63, 0.0 }
 0x133   : > { %1205 = vst [vmem:[%s2001_s4 + $0x88] sm:$0xff] %v1187_v0 }
 0x134   : > { %1204 = vst [vmem:[%s2001_s4 + $0x80] sm:$0xff] %v1186_v1 }
 0x135 PF: > { %s13_s12 = sadd.s32 1, %s1686_s12  }
 0x136   : > { %p10_p4 = scmp.ge.s32.totalorder %s13_s12, 4  }
 0x138   :  { %12 = sbr.rel (!%p10_p4) target bundleno = 1 (0x1), region = 65 }

// kernel: net_forward.7
= control target key start
LH: loop header
LB: loop body
LE: loop exit
PB: predicated region body
PF: predicated region fallthrough
CT: control target
= control target key end

     0   :  { %s832_s12 = smov 0   ;;  %s1087_s0 = inlined_call_operand.vmem [shape: f32[2,4,16,200], index: 0, kind: input, shape index: {}]   ;;  %s1088_s1 = inlined_call_operand.vmem [shape: f32[200,128], index: 1, kind: input, shape index: {}]   ;;  %s1089_s2 = inlined_call_operand.vmem [shape: f32[1,128], index: 2, kind: input, shape index: {}]   ;;  %s1090_s3 = inlined_call_operand.vmem [shape: f32[2,16,128], index: 3, kind: output, shape index: {}]  }
   0x1 LB: > { %s614_s13 = sadd.s32 4294967295, %s808_s12   ;;  %p618_p0 = scmp.ge.s32.totalorder %s808_s12, 1  ;;  %s808_s12 = sphi %s832_s12, %s13_s12  }
   0x2   : > { %p137_p1 = scmp.lt.s32.totalorder %s808_s12, 3 }
   0x4   : > { %p138_p2 = pnand %p618_p0, %p137_p1 }
   0x5   : > { %v171_v0 = vld [vmem:[%s1088_s1] sm:$0xff] (!%p138_p2)  ;;  %v172_v1 = vld [vmem:[%s1088_s1 + $0x8] sm:$0xff] (!%p138_p2)  ;;  %v173_v2 = vld [vmem:[%s1088_s1 + $0x10] sm:$0xff] (!%p138_p2)  ;;  %p161_p3 = scmp.lt.s32.totalorder (!%p138_p2), %s614_s13, 1  ;;  %v810_v3 = vmov (!%p138_p2), 0.0|0.0   ;;  %vm200_vm0 = vcmask (!%p138_p2), 588800  }
   0x6   : > { %141 = sbr.rel (%p138_p2) target bundleno = 332 (0x14c), region = 32  ;;  %648 = vmatprep.subr.bf16.mxu0 (!%p138_p2), %v810_v3  ;;  %v850_v4 = vpack.c.bf16 (!%p138_p2), %v172_v1, %v171_v0  ;;  %684 = vmatprep.subr.bf16.mxu1 (!%p138_p2), %v810_v3  ;;  %v174_v5 = vld [vmem:[%s1088_s1 + $0x18] sm:$0xff] (!%p138_p2)  ;;  %v175_v7 = vld [vmem:[%s1088_s1 + $0x20] sm:$0xff] (!%p138_p2)  ;;  %v176_v8 = vld [vmem:[%s1088_s1 + $0x28] sm:$0xff] (!%p138_p2)  ;;  %v811_v39 = vmov (!%p138_p2), 0.0  }
   0x7   : > { %v860_v6 = vpack.c.bf16 (!%p138_p2), %v174_v5, %v173_v2  ;;  %v878_v9 = vpack.c.bf16 (!%p138_p2), %v176_v8, %v175_v7  ;;  %v177_v10 = vld [vmem:[%s1088_s1 + $0x30] sm:$0xff] (!%p138_p2)  ;;  %v178_v11 = vld [vmem:[%s1088_s1 + $0x38] sm:$0xff] (!%p138_p2)  ;;  %v179_v15 = vld [vmem:[%s1088_s1 + $0x40] sm:$0xff] (!%p138_p2) }
   0x8   : > { %650 = vmatpush1.bf16.msra.mxu0 (!%p138_p2), %v850_v4  ;;  %686 = vmatpush1.bf16.msra.mxu1 (!%p138_p2), %v850_v4  ;;  %v894_v14 = vpack.c.bf16 (!%p138_p2), %v178_v11, %v177_v10  ;;  %v180_v16 = vld [vmem:[%s1088_s1 + $0x48] sm:$0xff] (!%p138_p2)  ;;  %v181_v18 = vld [vmem:[%s1088_s1 + $0x50] sm:$0xff] (!%p138_p2)  ;;  %v182_v19 = vld [vmem:[%s1088_s1 + $0x58] sm:$0xff] (!%p138_p2) }
   0x9   : > { %651 = vmatprep.subr.bf16.mxu0 (!%p138_p2), %v810_v3  ;;  %687 = vmatprep.subr.bf16.mxu1 (!%p138_p2), %v810_v3  ;;  %v906_v17 = vpack.c.bf16 (!%p138_p2), %v180_v16, %v179_v15  ;;  %v918_v20 = vpack.c.bf16 (!%p138_p2), %v182_v19, %v181_v18  ;;  %v183_v21 = vld [vmem:[%s1088_s1 + $0x60] sm:$0xff] (!%p138_p2)  ;;  %v184_v22 = vld [vmem:[%s1088_s1 + $0x68] sm:$0xff] (!%p138_p2)  ;;  %v185_v24 = vld [vmem:[%s1088_s1 + $0x70] sm:$0xff] (!%p138_p2) }
   0xa   : > { %v930_v23 = vpack.c.bf16 (!%p138_p2), %v184_v22, %v183_v21  ;;  %v186_v25 = vld [vmem:[%s1088_s1 + $0x78] sm:$0xff] (!%p138_p2)  ;;  %v187_v27 = vld [vmem:[%s1088_s1 + $0x80] sm:$0xff] (!%p138_p2)  ;;  %v188_v28 = vld [vmem:[%s1088_s1 + $0x88] sm:$0xff] (!%p138_p2) }
   0xb   : > { %v942_v26 = vpack.c.bf16 (!%p138_p2), %v186_v25, %v185_v24  ;;  %v954_v29 = vpack.c.bf16 (!%p138_p2), %v188_v28, %v187_v27  ;;  %v189_v30 = vld [vmem:[%s1088_s1 + $0x90] sm:$0xff] (!%p138_p2)  ;;  %v190_v31 = vld [vmem:[%s1088_s1 + $0x98] sm:$0xff] (!%p138_p2)  ;;  %v191_v33 = vld [vmem:[%s1088_s1 + $0xa0] sm:$0xff] (!%p138_p2) }
   0xc   : > { %653 = vmatpush1.bf16.msra.mxu0 (!%p138_p2), %v860_v6  ;;  %689 = vmatpush1.bf16.msra.mxu1 (!%p138_p2), %v860_v6  ;;  %v966_v32 = vpack.c.bf16 (!%p138_p2), %v190_v31, %v189_v30  ;;  %v192_v34 = vld [vmem:[%s1088_s1 + $0xa8] sm:$0xff] (!%p138_p2)  ;;  %v193_v36 = vld [vmem:[%s1088_s1 + $0xb0] sm:$0xff] (!%p138_p2)  ;;  %v194_v37 = vld [vmem:[%s1088_s1 + $0xb8] sm:$0xff] (!%p138_p2) }
   0xd   : > { %s1092_s13 = smov (!%p161_p3, %s614_s13), 1  ;;  %654 = vmatprep.subr.bf16.mxu0 %v810_v3  ;;  %690 = vmatprep.subr.bf16.mxu1 %v810_v3  ;;  %v978_v35 = vpack.c.bf16 %v192_v34, %v191_v33  ;;  %v990_v38 = vpack.c.bf16 %v194_v37, %v193_v36  ;;  %v1000_v40 = vld [vmem:[%s1088_s1 + $0xc0] sm:$0xff] }
   0xe   : > { %s646_s26 = sshll.u32 %s1092_s13, 7  ;;  %v643_v5 = vld [vmem:[%s1089_s2] ss:$0 sm:$0xff] }
   0xf   : > { %s874_s29 = scalar_lea.vmem %s1087_s0, %s646_s26 }
  0x10   : > { %v197_v12 = vld [vmem:[%s874_s29 + $0x8] sm:$0xff]  ;;  %656 = vmatpush1.bf16.msra.mxu0 %v878_v9  ;;  %692 = vmatpush1.bf16.msra.mxu1 %v878_v9  ;;  %v196_v41 = vld [vmem:[%s874_s29] sm:$0xff]  ;;  %v199_v43 = vld [vmem:[%s874_s29 + $0x18] sm:$0xff] }
  0x11   : > { %623 = vmatprep.mubr.msk.f32.mxu0 %vm200_vm0, %v197_v12  ;;  %v626_v13 = vld [vmem:[%s874_s29 + $0x28] sm:$0xff]  ;;  %657 = vmatprep.subr.bf16.mxu0 %v810_v3  ;;  %v625_v42 = vld [vmem:[%s874_s29 + $0x20] sm:$0xff]  ;;  %v198_v44 = vld [vmem:[%s874_s29 + $0x10] sm:$0xff] }
  0x12   : > { %629 = vmatprep.mubr.msk.f32.mxu1 %vm200_vm0, %v626_v13  ;;  %693 = vmatprep.subr.bf16.mxu1 %v810_v3  ;;  %v628_v45 = vld [vmem:[%s874_s29 + $0x38] sm:$0xff]  ;;  %v627_v46 = vld [vmem:[%s874_s29 + $0x30] sm:$0xff]  ;;  %v632_v47 = vld [vmem:[%s874_s29 + $0x48] sm:$0xff] }
  0x13   : > { %v638_v48 = vld [vmem:[%s874_s29 + $0x68] sm:$0xff]  ;;  %v631_v49 = vld [vmem:[%s874_s29 + $0x40] sm:$0xff]  ;;  %v634_v50 = vld [vmem:[%s874_s29 + $0x58] sm:$0xff] }
  0x14   : > { %659 = vmatpush1.bf16.msra.mxu0 %v894_v14  ;;  %695 = vmatpush1.bf16.msra.mxu1 %v894_v14  ;;  %v637_v51 = vld [vmem:[%s874_s29 + $0x60] sm:$0xff]  ;;  %v640_v52 = vld [vmem:[%s874_s29 + $0x78] sm:$0xff]  ;;  %v633_v53 = vld [vmem:[%s874_s29 + $0x50] sm:$0xff] }
  0x15   : > { %660 = vmatprep.subr.bf16.mxu0 %v810_v3  ;;  %696 = vmatprep.subr.bf16.mxu1 %v810_v3  ;;  %v639_v54 = vld [vmem:[%s874_s29 + $0x70] sm:$0xff]  ;;  %s647_s29 = sshll.u32 %s1092_s13, 4 }
  0x16   : > { %s170_s23 = scalar_lea.vmem %s1090_s3, %s647_s29 }
  0x18   : > { %662 = vmatpush1.bf16.msra.mxu0 %v906_v17  ;;  %698 = vmatpush1.bf16.msra.mxu1 %v906_v17 }
  0x19   : > { %663 = vmatprep.subr.bf16.mxu0 %v810_v3  ;;  %699 = vmatprep.subr.bf16.mxu1 %v810_v3 }
  0x1c   : > { %665 = vmatpush1.bf16.msra.mxu0 %v918_v20  ;;  %701 = vmatpush1.bf16.msra.mxu1 %v918_v20 }
  0x1d   : > { %666 = vmatprep.subr.bf16.mxu0 %v810_v3  ;;  %702 = vmatprep.subr.bf16.mxu1 %v810_v3 }
  0x20   : > { %668 = vmatpush1.bf16.msra.mxu0 %v930_v23  ;;  %704 = vmatpush1.bf16.msra.mxu1 %v930_v23 }
  0x21   : > { %669 = vmatprep.subr.bf16.mxu0 %v810_v3  ;;  %705 = vmatprep.subr.bf16.mxu1 %v810_v3 }
  0x24   : > { %671 = vmatpush1.bf16.msra.mxu0 %v942_v26  ;;  %707 = vmatpush1.bf16.msra.mxu1 %v942_v26 }
  0x25   : > { %672 = vmatprep.subr.bf16.mxu0 %v810_v3  ;;  %708 = vmatprep.subr.bf16.mxu1 %v810_v3 }
  0x28   : > { %674 = vmatpush1.bf16.msra.mxu0 %v954_v29  ;;  %710 = vmatpush1.bf16.msra.mxu1 %v954_v29 }
  0x29   : > { %675 = vmatprep.subr.bf16.mxu0 %v810_v3  ;;  %711 = vmatprep.subr.bf16.mxu1 %v810_v3 }
  0x2c   : > { %677 = vmatpush1.bf16.msra.mxu0 %v966_v32  ;;  %713 = vmatpush1.bf16.msra.mxu1 %v966_v32 }
  0x2d   : > { %678 = vmatprep.subr.bf16.mxu0 %v810_v3  ;;  %714 = vmatprep.subr.bf16.mxu1 %v810_v3 }
  0x30   : > { %680 = vmatpush1.bf16.msra.mxu0 %v978_v35  ;;  %716 = vmatpush1.bf16.msra.mxu1 %v978_v35 }
  0x31   : > { %681 = vmatprep.subr.bf16.mxu0 %v810_v3  ;;  %717 = vmatprep.subr.bf16.mxu1 %v810_v3 }
  0x34   : > { %683 = vmatpush1.bf16.msra.mxu0 %v990_v38  ;;  %719 = vmatpush1.bf16.msra.mxu1 %v990_v38 }
  0x35   : > { %255 = vmatprep.subr.mxu0 %v811_v39  ;;  %341 = vmatprep.subr.mxu1 %v811_v39 }
  0x38   : > { %256 = vmatpush1.msra.mxu0 %v1000_v40  ;;  %342 = vmatpush1.msra.mxu1 %v1000_v40 }
  0x39   : > { %272 = vmatmul.mubr.f32.vlgmr.msra.gmra.mrb[0].mxu0 %v196_v41  ;;  %720 = vmatprep.subr.bf16.mxu0 %v810_v3 }
  0x3a   : > { %358 = vmatmul.mubr.f32.vlgmr.msra.gmra.mrb[0].mxu1 %v625_v42  ;;  %722 = vmatpush1.bf16.msra.mxu0 %v850_v4 }
  0x3b   : > { %756 = vmatprep.subr.bf16.mxu1 %v810_v3  ;;  %723 = vmatprep.subr.bf16.mxu0 %v810_v3 }
  0x3c   : > { %758 = vmatpush1.bf16.msra.mxu1 %v850_v4  ;;  %624 = vmatprep.mubr.msk.f32.mxu0 %vm200_vm0, %v199_v43 }
  0x3d   : > { %759 = vmatprep.subr.bf16.mxu1 %v810_v3  ;;  %277 = vmatmul.mubr.f32.gmra.mrb[2].mxu0 %v198_v44 }
  0x3e   : > { %725 = vmatpush1.bf16.msra.mxu0 %v860_v6  ;;  %630 = vmatprep.mubr.msk.f32.mxu1 %vm200_vm0, %v628_v45 }
  0x3f   : > { %726 = vmatprep.subr.bf16.mxu0 %v810_v3  ;;  %363 = vmatmul.mubr.f32.gmra.mrb[2].mxu1 %v627_v46 }
  0x40   : > { %761 = vmatpush1.bf16.msra.mxu1 %v860_v6  ;;  %635 = vmatprep.mubr.msk.f32.mxu0 %vm200_vm0, %v632_v47 }
  0x41   : > { %762 = vmatprep.subr.bf16.mxu1 %v810_v3  ;;  %641 = vmatprep.mubr.msk.f32.mxu1 %vm200_vm0, %v638_v48 }
  0x42   : > { %728 = vmatpush1.bf16.msra.mxu0 %v878_v9 }
  0x43   : > { %729 = vmatprep.subr.bf16.mxu0 %v810_v3 }
  0x44   : > { %764 = vmatpush1.bf16.msra.mxu1 %v878_v9 }
  0x45   : > { %765 = vmatprep.subr.bf16.mxu1 %v810_v3 }
  0x46   : > { %731 = vmatpush1.bf16.msra.mxu0 %v894_v14 }
  0x47   : > { %732 = vmatprep.subr.bf16.mxu0 %v810_v3 }
  0x48   : > { %767 = vmatpush1.bf16.msra.mxu1 %v894_v14 }
  0x49   : > { %768 = vmatprep.subr.bf16.mxu1 %v810_v3 }
  0x4a   : > { %734 = vmatpush1.bf16.msra.mxu0 %v906_v17 }
  0x4b   : > { %735 = vmatprep.subr.bf16.mxu0 %v810_v3 }
  0x4c   : > { %770 = vmatpush1.bf16.msra.mxu1 %v906_v17 }
  0x4d   : > { %771 = vmatprep.subr.bf16.mxu1 %v810_v3 }
  0x4e   : > { %737 = vmatpush1.bf16.msra.mxu0 %v918_v20 }
  0x4f   : > { %738 = vmatprep.subr.bf16.mxu0 %v810_v3 }
  0x50   : > { %773 = vmatpush1.bf16.msra.mxu1 %v918_v20 }
  0x51   : > { %774 = vmatprep.subr.bf16.mxu1 %v810_v3 }
  0x52   : > { %740 = vmatpush1.bf16.msra.mxu0 %v930_v23 }
  0x53   : > { %741 = vmatprep.subr.bf16.mxu0 %v810_v3 }
  0x54   : > { %776 = vmatpush1.bf16.msra.mxu1 %v930_v23 }
  0x55   : > { %777 = vmatprep.subr.bf16.mxu1 %v810_v3 }
  0x56   : > { %743 = vmatpush1.bf16.msra.mxu0 %v942_v26 }
  0x57   : > { %744 = vmatprep.subr.bf16.mxu0 %v810_v3 }
  0x58   : > { %779 = vmatpush1.bf16.msra.mxu1 %v942_v26 }
  0x59   : > { %780 = vmatprep.subr.bf16.mxu1 %v810_v3 }
  0x5a   : > { %746 = vmatpush1.bf16.msra.mxu0 %v954_v29 }
  0x5b   : > { %747 = vmatprep.subr.bf16.mxu0 %v810_v3 }
  0x5c   : > { %782 = vmatpush1.bf16.msra.mxu1 %v954_v29 }
  0x5d   : > { %783 = vmatprep.subr.bf16.mxu1 %v810_v3 }
  0x5e   : > { %749 = vmatpush1.bf16.msra.mxu0 %v966_v32 }
  0x5f   : > { %750 = vmatprep.subr.bf16.mxu0 %v810_v3 }
  0x60   : > { %785 = vmatpush1.bf16.msra.mxu1 %v966_v32 }
  0x61   : > { %786 = vmatprep.subr.bf16.mxu1 %v810_v3 }
  0x62   : > { %752 = vmatpush1.bf16.msra.mxu0 %v978_v35 }
  0x63   : > { %753 = vmatprep.subr.bf16.mxu0 %v810_v3 }
  0x64   : > { %788 = vmatpush1.bf16.msra.mxu1 %v978_v35 }
  0x65   : > { %789 = vmatprep.subr.bf16.mxu1 %v810_v3 }
  0x66   : > { %755 = vmatpush1.bf16.msra.mxu0 %v990_v38 }
  0x67   : > { %429 = vmatprep.subr.mxu0 %v811_v39 }
  0x68   : > { %791 = vmatpush1.bf16.msra.mxu1 %v990_v38 }
  0x69   : > { %517 = vmatprep.subr.mxu1 %v811_v39 }
  0x6a   : > { %430 = vmatpush1.msra.mxu0 %v1000_v40 }
  0x6b   : > { %446 = vmatmul.mubr.f32.vlgmr.msra.gmra.mrb[4].mxu0 %v631_v49 }
  0x6c   : > { %518 = vmatpush1.msra.mxu1 %v1000_v40  ;;  %636 = vmatprep.mubr.msk.f32.mxu0 %vm200_vm0, %v634_v50 }
  0x6d   : > { %534 = vmatmul.mubr.f32.vlgmr.msra.gmra.mrb[4].mxu1 %v637_v51 }
  0x6e   : > { %642 = vmatprep.mubr.msk.f32.mxu1 %vm200_vm0, %v640_v52 }
  0x6f   : > { %451 = vmatmul.mubr.f32.gmra.mrb[6].mxu0 %v633_v53 }
  0x71   : > { %539 = vmatmul.mubr.f32.gmra.mrb[6].mxu1 %v639_v54 }
 0x10c   : > { %v273_v55 = vpop.f32.mrb[0].mxu0 }
 0x10d   : > { %v275_v56 = vpop.f32.mrb[1].mxu0  ;;  %v359_v57 = vpop.f32.mrb[0].mxu1 }
 0x10e   : > { %v368_v58 = vmax.f32 %v273_v55, %v359_v57  ;;  %v361_v59 = vpop.f32.mrb[1].mxu1 }
 0x110   : > { %v278_v60 = vpop.f32.mrb[2].mxu0 }
 0x111   : > { %v280_v61 = vpop.f32.mrb[3].mxu0 }
 0x112   : > { %v364_v62 = vpop.f32.mrb[2].mxu1 }
 0x113   : > { %v369_v63 = vmax.f32 %v278_v60, %v364_v62  ;;  %v366_v0 = vpop.f32.mrb[3].mxu1 }
 0x13e   : > { %v447_v1 = vpop.f32.mrb[4].mxu0 }
 0x13f   : > { %v456_v2 = vmax.f32 %v368_v58, %v447_v1  ;;  %v449_v3 = vpop.f32.mrb[5].mxu0 }
 0x140   : > { %v535_v4 = vpop.f32.mrb[4].mxu1 }
 0x141   : > { %v544_v6 = vmax.f32 %v456_v2, %v535_v4  ;;  %v537_v7 = vpop.f32.mrb[5].mxu1 }
 0x142   : > { %v452_v8 = vpop.f32.mrb[6].mxu0 }
 0x143   : > { %v553_v9 = vadd.f32 %v643_v5, %v544_v6  ;;  %v457_v10 = vmax.f32 %v369_v63, %v452_v8  ;;  %v454_v11 = vpop.f32.mrb[7].mxu0 }
 0x144   : > { %v540_v12 = vpop.f32.mrb[6].mxu1 }
 0x145   : > { %v555_v13 = vmax.f32 %v553_v9, 0.0  ;;  %v545_v14 = vmax.f32 %v457_v10, %v540_v12  ;;  %v542_v15 = vpop.f32.mrb[7].mxu1 }
 0x147   : > { %557 = vst [vmem:[%s170_s23] sm:$0xff] %v555_v13  ;;  %v554_v16 = vadd.f32 %v643_v5, %v545_v14 }
 0x149   : > { %v556_v17 = vmax.f32 %v554_v16, 0.0 }
 0x14b   : > { %558 = vst [vmem:[%s170_s23 + $0x8] sm:$0xff] %v556_v17 }
 0x14c PF: > { %s13_s12 = sadd.s32 1, %s808_s12  }
 0x14d   : > { %p10_p4 = scmp.ge.s32.totalorder %s13_s12, 4  }
 0x14f   :  { %12 = sbr.rel (!%p10_p4) target bundleno = 1 (0x1), region = 65 }

// kernel: net_forward.8
= control target key start
LH: loop header
LB: loop body
LE: loop exit
PB: predicated region body
PF: predicated region fallthrough
CT: control target
= control target key end

     0   :  { %v282_v0 = vmov 0.0|0.0   ;;  %vm58_vm0 = vcmask 261120   ;;  %vm283_vm1 = vmmov 0   ;;  %v284_v39 = vmov 0.0   ;;  %s401_s1 = inlined_call_operand.vmem [shape: f32[160,32], index: 1, kind: input, shape index: {}]   ;;  %s402_s0 = inlined_call_operand.vmem [shape: f32[2,160], index: 0, kind: input, shape index: {}]   ;;  %s403_s3 = inlined_call_operand.vmem [shape: f32[32,6], index: 3, kind: input, shape index: {}]   ;;  %s404_s2 = inlined_call_operand.vmem [shape: f32[1,32], index: 2, kind: input, shape index: {}]   ;;  %s405_s4 = inlined_call_operand.vmem [shape: f32[1,6], index: 4, kind: input, shape index: {}]   ;;  %s406_s5 = inlined_call_operand.vmem [shape: f32[2,6], index: 5, kind: output, shape index: {}]  }
   0x1   :  { %243 = vmatprep.subr.bf16.mxu0 %v282_v0  ;;  %v21_v1 = vld [vmem:[%s401_s1] sm:$0xff]  ;;  %v22_v2 = vld [vmem:[%s401_s1 + $0x8] sm:$0xff]  ;;  %v23_v3 = vld [vmem:[%s401_s1 + $0x10] sm:$0xff]  ;;  %273 = vmatprep.subr.bf16.mxu1 %v282_v0  ;;  %vm216_vm2 = vcmask 41984  }
   0x2   :  { %v244_v4 = vpack.c.bf16 %v22_v2, %v21_v1  ;;  %v24_v5 = vld [vmem:[%s401_s1 + $0x18] sm:$0xff]  ;;  %v25_v7 = vld [vmem:[%s401_s1 + $0x20] sm:$0xff]  ;;  %v26_v8 = vld [vmem:[%s401_s1 + $0x28] sm:$0xff]  ;;  %240 = vmatprep.mubr.msk.f32.mxu1 %vm283_vm1, %v284_v39 }
   0x3   :  { %v247_v6 = vpack.c.bf16 %v24_v5, %v23_v3  ;;  %v223_v9 = vld.sshfl [vmem:[%s402_s0] sm:$0x33 pattern:$0x76325410]  ;;  %v250_v10 = vpack.c.bf16 %v26_v8, %v25_v7  ;;  %v133_v13 = vld [vmem:[%s403_s3 + $0x8] sm:$0xff]  ;;  %v27_v14 = vld [vmem:[%s401_s1 + $0x30] sm:$0xff] }
   0x4   :  { %245 = vmatpush1.bf16.msra.mxu0 %v244_v4  ;;  %v56_v11 = vcombine.high %v223_v9, %v223_v9  ;;  %v132_v12 = vld [vmem:[%s403_s3] sm:$0xff]  ;;  %v28_v15 = vld [vmem:[%s401_s1 + $0x38] sm:$0xff]  ;;  %v30_v19 = vld [vmem:[%s401_s1 + $0x48] sm:$0xff] }
   0x5   :  { %246 = vmatprep.subr.bf16.mxu0 %v282_v0  ;;  %v274_v16 = vpack.c.bf16 %v133_v13, %v132_v12  ;;  %v253_v17 = vpack.c.bf16 %v28_v15, %v27_v14  ;;  %v29_v18 = vld [vmem:[%s401_s1 + $0x40] sm:$0xff]  ;;  %v31_v21 = vld [vmem:[%s401_s1 + $0x50] sm:$0xff]  ;;  %v32_v22 = vld [vmem:[%s401_s1 + $0x58] sm:$0xff] }
   0x6   :  { %224 = vmatprep.mubr.msk.f32.mxu0 %vm58_vm0, %v56_v11  ;;  %v256_v20 = vpack.c.bf16 %v30_v19, %v29_v18  ;;  %v259_v23 = vpack.c.bf16 %v32_v22, %v31_v21  ;;  %v33_v24 = vld [vmem:[%s401_s1 + $0x60] sm:$0xff]  ;;  %v34_v25 = vld [vmem:[%s401_s1 + $0x68] sm:$0xff]  ;;  %v35_v27 = vld [vmem:[%s401_s1 + $0x70] sm:$0xff] }
   0x7   :  { %275 = vmatpush3.bf16.msra.mxu1 %v274_v16  ;;  %v262_v26 = vpack.c.bf16 %v34_v25, %v33_v24  ;;  %v36_v28 = vld [vmem:[%s401_s1 + $0x78] sm:$0xff]  ;;  %v37_v30 = vld [vmem:[%s401_s1 + $0x80] sm:$0xff]  ;;  %v38_v31 = vld [vmem:[%s401_s1 + $0x88] sm:$0xff] }
   0x8   :  { %248 = vmatpush1.bf16.msra.mxu0 %v247_v6  ;;  %276 = vmatprep.subr.bf16.mxu1 %v282_v0  ;;  %v265_v29 = vpack.c.bf16 %v36_v28, %v35_v27  ;;  %v268_v32 = vpack.c.bf16 %v38_v31, %v37_v30  ;;  %v39_v33 = vld [vmem:[%s401_s1 + $0x90] sm:$0xff]  ;;  %v40_v34 = vld [vmem:[%s401_s1 + $0x98] sm:$0xff]  ;;  %v222_v40 = vld [vmem:[%s404_s2] ss:$0 sm:$0xff] }
   0x9   :  { %249 = vmatprep.subr.bf16.mxu0 %v282_v0  ;;  %v271_v35 = vpack.c.bf16 %v40_v34, %v39_v33  ;;  %v134_v36 = vld [vmem:[%s403_s3 + $0x10] sm:$0xff]  ;;  %v135_v37 = vld [vmem:[%s403_s3 + $0x18] sm:$0xff]  ;;  %v225_v45 = vld [vmem:[%s405_s4] ss:$0 sm:$0xff] }
   0xa   :  { %v277_v38 = vpack.c.bf16 %v135_v37, %v134_v36 }
   0xc   :  { %251 = vmatpush1.bf16.msra.mxu0 %v250_v10  ;;  %278 = vmatpush3.bf16.msra.mxu1 %v277_v38 }
   0xd   :  { %252 = vmatprep.subr.bf16.mxu0 %v282_v0 }
  0x10   :  { %254 = vmatpush1.bf16.msra.mxu0 %v253_v17 }
  0x11   :  { %255 = vmatprep.subr.bf16.mxu0 %v282_v0 }
  0x14   :  { %257 = vmatpush1.bf16.msra.mxu0 %v256_v20 }
  0x15   :  { %258 = vmatprep.subr.bf16.mxu0 %v282_v0 }
  0x18   :  { %260 = vmatpush1.bf16.msra.mxu0 %v259_v23 }
  0x19   :  { %261 = vmatprep.subr.bf16.mxu0 %v282_v0 }
  0x1c   :  { %263 = vmatpush1.bf16.msra.mxu0 %v262_v26 }
  0x1d   :  { %264 = vmatprep.subr.bf16.mxu0 %v282_v0 }
  0x20   :  { %266 = vmatpush1.bf16.msra.mxu0 %v265_v29 }
  0x21   :  { %267 = vmatprep.subr.bf16.mxu0 %v282_v0 }
  0x24   :  { %269 = vmatpush1.bf16.msra.mxu0 %v268_v32 }
  0x25   :  { %270 = vmatprep.subr.bf16.mxu0 %v282_v0 }
  0x28   :  { %272 = vmatpush1.bf16.msra.mxu0 %v271_v35 }
  0x2b   :  { %126 = vmatmul.mubr.f32.vlgmr.msra.gmra.mrb[0].mxu0 %v223_v9 }
  0xfe   :  { %v127_v41 = vpop.f32.mrb[0].mxu0 }
  0xff   :  { %v128_v42 = vadd.f32 %v222_v40, %v127_v41  ;;  %v129_v43 = vpop.f32.mrb[1].mxu0 }
 0x101   :  { %v131_v44 = vmax.f32 %v128_v42, 0.0 }
 0x103   :  { %241 = vmatmul.mubr.msk.f32.vlgmr.msra.gmra.mrb[0].mxu1 %vm58_vm0, %v131_v44 }
 0x1d6   :  { %v212_v46 = vpop.f32.mrb[0].mxu1 }
 0x1d7   :  { %v213_v47 = vadd.f32 %v225_v45, %v212_v46  ;;  %v242_v48 = vpop.f32.mrb[1].mxu1 }
 0x1d9   :  { %217 = vst.msk [vmem:[%s406_s5] sm:$0x3] %vm216_vm2, %v213_v47 }

// kernel: net_forward.9
= control target key start
LH: loop header
LB: loop body
LE: loop exit
PB: predicated region body
PF: predicated region fallthrough
CT: control target
= control target key end

     0   :  { %s1509_s12 = smov 0   ;;  %s2197_s0 = inlined_call_operand.vmem [shape: f32[2,1,896], index: 0, kind: input, shape index: {}]   ;;  %s2198_s1 = inlined_call_operand.vmem [shape: f32[2,1,896], index: 1, kind: input, shape index: {}]   ;;  %s2199_s2 = inlined_call_operand.vmem [shape: f32[2,1,32,32], index: 2, kind: input, shape index: {}]   ;;  %s2200_s3 = inlined_call_operand.vmem [shape: f32[2,1,896], index: 3, kind: output, shape index: {}]  }
   0x1 LB: > { %s1388_s13 = sadd.s32 4294967295, %s1485_s12   ;;  %p1392_p0 = scmp.ge.s32.totalorder %s1485_s12, 1  ;;  %s1485_s12 = sphi %s1509_s12, %s13_s12  }
   0x2   : > { %p155_p1 = scmp.lt.s32.totalorder %s1485_s12, 3 }
   0x4   : > { %p156_p2 = pnand %p1392_p0, %p155_p1 }
   0x5   : > { %p186_p3 = scmp.lt.s32.totalorder (!%p156_p2), %s1388_s13, 1  ;;  %v209_v0 = vlaneseq (!%p156_p2)  ;;  %v1487_v1 = vmov (!%p156_p2), 0.0  }
   0x6   : > { %159 = sbr.rel (%p156_p2) target bundleno = 323 (0x143), region = 32  ;;  %871 = vmatprep.mubr.f32.mxu0 (!%p156_p2), %v1487_v1  ;;  %960 = vmatprep.mubr.f32.mxu1 (!%p156_p2), %v1487_v1 }
   0x7   : > { %v1522_v2 = vshrl.u32 (!%p156_p2), %v209_v0, 7 }
   0x9   : > { %v211_v3 = vadd.s32 (!%p156_p2), 8, %v1522_v2  ;;  %v212_v4 = vadd.s32 (!%p156_p2), 16, %v1522_v2  ;;  %v213_v5 = vadd.s32 (!%p156_p2), 24, %v1522_v2  ;;  %v1535_v6 = vsub.s32 (!%p156_p2), 1, %v1522_v2 }
   0xa   : > { %v1538_v7 = vsub.s32 (!%p156_p2), 3, %v1522_v2  ;;  %v1541_v9 = vsub.s32 (!%p156_p2), 0, %v1522_v2  ;;  %v1544_v10 = vsub.s32 (!%p156_p2), 2, %v1522_v2  ;;  %v1547_v11 = vsub.s32 (!%p156_p2), 5, %v1522_v2 }
   0xb   : > { %v1550_v12 = vsub.s32 (!%p156_p2), 4, %v1522_v2  ;;  %v1555_v14 = vcvt.s32.f32 (!%p156_p2), %v1522_v2  ;;  %v1557_v15 = vcvt.s32.f32 (!%p156_p2), %v211_v3  ;;  %v1559_v16 = vcvt.s32.f32 (!%p156_p2), %v212_v4 }
   0xc   : > { %v1561_v17 = vcvt.s32.f32 (!%p156_p2), %v213_v5  ;;  %v1564_v18 = vsub.s32 (!%p156_p2), 6, %v1522_v2 }
   0xd   : > { %s2202_s13 = smov (!%p186_p3, %s1388_s13), 1 }
   0xe   : > { %s1525_s14 = smul.u32 7, %s2202_s13  ;;  %s1413_s18 = sshll.u32 %s2202_s13, 5 }
   0xf   : > { %s1714_s21 = scalar_lea.vmem %s2199_s2, %s1413_s18 }
  0x10   : > { %s189_s17 = scalar_lea.vmem %s2197_s0, %s1525_s14  ;;  %s193_s24 = scalar_lea.vmem %s2198_s1, %s1525_s14 }
  0x11   : > { %v203_v8 = vld [vmem:[%s189_s17] sm:$0xff]  ;;  %s202_s27 = scalar_lea.vmem %s2200_s3, %s1525_s14 }
  0x12   : > { %v1552_v13 = vfloor.f32 %v203_v8 }
  0x14   : > { %v1567_v19 = vsub.f32 %v203_v8, %v1552_v13  ;;  %v1571_v20 = vrot.slane %v1552_v13, %v1535_v6  ;;  %v1574_v21 = vadd.f32 1.0, %v1552_v13  ;;  %v1578_v22 = vrot.slane %v1552_v13, %v1538_v7 }
  0x15   : > { %v1582_v23 = vrot.slane %v1552_v13, %v1541_v9  ;;  %v1586_v24 = vrot.slane %v1552_v13, %v1544_v10  ;;  %v1590_v25 = vrot.slane %v1552_v13, %v1547_v11  ;;  %v1594_v26 = vrot.slane %v1552_v13, %v1550_v12 }
  0x16   : > { %vm255_vm0 = vcmp.eq.f32.partialorder %v1555_v14, %v1571_v20  ;;  %vm262_vm1 = vcmp.eq.f32.partialorder %v1557_v15, %v1571_v20  ;;  %v1601_v27 = vsub.f32 1.0, %v1567_v19  ;;  %v1605_v28 = vrot.slane %v1574_v21, %v1535_v6 }
  0x17   : > { %v420_v29 = vrot.slane %v1567_v19, %v1535_v6  ;;  %vm257_vm2 = vcmp.eq.f32.partialorder %v1555_v14, %v1578_v22  ;;  %vm264_vm3 = vcmp.eq.f32.partialorder %v1557_v15, %v1578_v22  ;;  %v1615_v30 = vrot.slane %v1574_v21, %v1538_v7 }
  0x18   : > { %v291_v31 = vrot.slane %v1601_v27, %v1535_v6  ;;  %vm385_vm4 = vcmp.eq.f32.partialorder %v1555_v14, %v1605_v28  ;;  %vm392_vm5 = vcmp.eq.f32.partialorder %v1557_v15, %v1605_v28  ;;  %v299_v32 = vrot.slane %v1601_v27, %v1538_v7 }
  0x19   : > { %v449_v33 = vsel %vm385_vm4, %v420_v29, 0.0  ;;  %v456_v34 = vsel %vm392_vm5, %v420_v29, 0.0  ;;  %vm387_vm6 = vcmp.eq.f32.partialorder %v1555_v14, %v1615_v30  ;;  %vm394_vm7 = vcmp.eq.f32.partialorder %v1557_v15, %v1615_v30 }
  0x1a   : > { %v320_v35 = vsel %vm255_vm0, %v291_v31, 0.0  ;;  %v327_v36 = vsel %vm262_vm1, %v291_v31, 0.0  ;;  %v322_v37 = vsel %vm257_vm2, %v299_v32, 0.0  ;;  %v329_v38 = vsel %vm264_vm3, %v299_v32, 0.0 }
  0x1b   : > { %v477_v39 = vadd.f32 %v449_v33, %v320_v35  ;;  %v484_v40 = vadd.f32 %v456_v34, %v327_v36  ;;  %v428_v41 = vrot.slane %v1567_v19, %v1538_v7  ;;  %vm254_vm8 = vcmp.eq.f32.partialorder %v1555_v14, %v1582_v23 }
  0x1c   : > { %vm261_vm9 = vcmp.eq.f32.partialorder %v1557_v15, %v1582_v23  ;;  %v287_v42 = vrot.slane %v1601_v27, %v1541_v9  ;;  %v1645_v43 = vrot.slane %v1574_v21, %v1541_v9  ;;  %v1649_v44 = vrot.slane %v1567_v19, %v1541_v9 }
  0x1d   : > { %v1436_v45 = vpack.c.bf16 %v484_v40, %v477_v39  ;;  %v451_v46 = vsel %vm387_vm6, %v428_v41, 0.0  ;;  %v458_v47 = vsel %vm394_vm7, %v428_v41, 0.0  ;;  %vm256_vm10 = vcmp.eq.f32.partialorder %v1555_v14, %v1586_v24 }
  0x1e   : > { %v479_v48 = vadd.f32 %v451_v46, %v322_v37  ;;  %v486_v49 = vadd.f32 %v458_v47, %v329_v38  ;;  %v319_v50 = vsel %vm254_vm8, %v287_v42, 0.0  ;;  %v326_v51 = vsel %vm261_vm9, %v287_v42, 0.0 }
  0x1f   : > { %1437 = vmatprep.subr.bf16.mxu0 %v1436_v45  ;;  %vm384_vm11 = vcmp.eq.f32.partialorder %v1555_v14, %v1645_v43  ;;  %vm391_vm12 = vcmp.eq.f32.partialorder %v1557_v15, %v1645_v43  ;;  %vm263_vm13 = vcmp.eq.f32.partialorder %v1557_v15, %v1586_v24  ;;  %v295_v52 = vrot.slane %v1601_v27, %v1544_v10 }
  0x20   : > { %v1444_v53 = vpack.c.bf16 %v486_v49, %v479_v48  ;;  %v448_v54 = vsel %vm384_vm11, %v1649_v44, 0.0  ;;  %v455_v55 = vsel %vm391_vm12, %v1649_v44, 0.0  ;;  %v1665_v56 = vrot.slane %v1574_v21, %v1544_v10 }
  0x21   : > { %v476_v57 = vadd.f32 %v448_v54, %v319_v50  ;;  %v483_v58 = vadd.f32 %v455_v55, %v326_v51  ;;  %v321_v59 = vsel %vm256_vm10, %v295_v52, 0.0  ;;  %v328_v60 = vsel %vm263_vm13, %v295_v52, 0.0 }
  0x22   : > { %1445 = vmatprep.subr.bf16.mxu1 %v1444_v53  ;;  %vm386_vm14 = vcmp.eq.f32.partialorder %v1555_v14, %v1665_v56  ;;  %vm393_vm15 = vcmp.eq.f32.partialorder %v1557_v15, %v1665_v56  ;;  %v424_v61 = vrot.slane %v1567_v19, %v1544_v10  ;;  %vm269_vm0 = vcmp.eq.f32.partialorder %v1559_v16, %v1571_v20  ;;  %v1725_v53 = vld [vmem:[%s1714_s21] sm:$0xff] }
  0x23   : > { %v1438_v62 = vpack.c.bf16 %v483_v58, %v476_v57  ;;  %vm276_vm1 = vcmp.eq.f32.partialorder %v1561_v17, %v1571_v20  ;;  %v334_v63 = vsel %vm269_vm0, %v291_v31, 0.0  ;;  %vm399_vm2 = vcmp.eq.f32.partialorder %v1559_v16, %v1605_v28 }
  0x24   : > { %v450_v3 = vsel %vm386_vm14, %v424_v61, 0.0  ;;  %v457_v4 = vsel %vm393_vm15, %v424_v61, 0.0  ;;  %v341_v5 = vsel %vm276_vm1, %v291_v31, 0.0  ;;  %vm406_vm3 = vcmp.eq.f32.partialorder %v1561_v17, %v1605_v28 }
  0x25   : > { %1439 = vmatpush1.bf16.msra.mxu0 %v1438_v62  ;;  %v478_v8 = vadd.f32 %v450_v3, %v321_v59  ;;  %v485_v33 = vadd.f32 %v457_v4, %v328_v60  ;;  %v463_v34 = vsel %vm399_vm2, %v420_v29, 0.0  ;;  %v470_v35 = vsel %vm406_vm3, %v420_v29, 0.0 }
  0x26   : > { %v491_v36 = vadd.f32 %v463_v34, %v334_v63  ;;  %v498_v37 = vadd.f32 %v470_v35, %v341_v5  ;;  %vm271_vm4 = vcmp.eq.f32.partialorder %v1559_v16, %v1578_v22  ;;  %vm278_vm5 = vcmp.eq.f32.partialorder %v1561_v17, %v1578_v22 }
  0x27   : > { %v1446_v20 = vpack.c.bf16 %v485_v33, %v478_v8  ;;  %v336_v38 = vsel %vm271_vm4, %v299_v32, 0.0  ;;  %v343_v39 = vsel %vm278_vm5, %v299_v32, 0.0  ;;  %vm401_vm6 = vcmp.eq.f32.partialorder %v1559_v16, %v1615_v30  ;;  %v1754_v8 = vld [vmem:[%s1714_s21 + $0x8] sm:$0xff] }
  0x28   : > { %v1440_v28 = vpack.c.bf16 %v498_v37, %v491_v36  ;;  %vm408_vm7 = vcmp.eq.f32.partialorder %v1561_v17, %v1615_v30  ;;  %v465_v29 = vsel %vm401_vm6, %v428_v41, 0.0  ;;  %vm268_vm8 = vcmp.eq.f32.partialorder %v1559_v16, %v1582_v23 }
  0x29   : > { %vm794_vm9 = vcmask 261120   ;;  %1447 = vmatpush1.bf16.msra.mxu1 %v1446_v20  ;;  %v472_v31 = vsel %vm408_vm7, %v428_v41, 0.0  ;;  %v493_v40 = vadd.f32 %v465_v29, %v336_v38  ;;  %vm275_vm10 = vcmp.eq.f32.partialorder %v1561_v17, %v1582_v23 }
  0x2a   : > { %v333_v22 = vsel %vm268_vm8, %v287_v42, 0.0  ;;  %1441 = vmatprep.subr.bf16.mxu0 %v1440_v28  ;;  %v500_v32 = vadd.f32 %v472_v31, %v343_v39  ;;  %v340_v45 = vsel %vm275_vm10, %v287_v42, 0.0  ;;  %vm398_vm11 = vcmp.eq.f32.partialorder %v1559_v16, %v1645_v43 }
  0x2b   : > { %vm405_vm12 = vcmp.eq.f32.partialorder %v1561_v17, %v1645_v43  ;;  %v462_v30 = vsel %vm398_vm11, %v1649_v44, 0.0  ;;  %vm270_vm13 = vcmp.eq.f32.partialorder %v1559_v16, %v1586_v24  ;;  %vm277_vm14 = vcmp.eq.f32.partialorder %v1561_v17, %v1586_v24 }
  0x2c   : > { %v469_v46 = vsel %vm405_vm12, %v1649_v44, 0.0  ;;  %v1448_v23 = vpack.c.bf16 %v500_v32, %v493_v40  ;;  %v490_v41 = vadd.f32 %v462_v30, %v333_v22  ;;  %v335_v47 = vsel %vm270_vm13, %v295_v52, 0.0  ;;  %v1775_v22 = vld [vmem:[%s1714_s21 + $0x10] sm:$0xff] }
  0x2d   : > { %v497_v42 = vadd.f32 %v469_v46, %v340_v45  ;;  %v342_v48 = vsel %vm277_vm14, %v295_v52, 0.0  ;;  %vm400_vm15 = vcmp.eq.f32.partialorder %v1559_v16, %v1665_v56  ;;  %vm407_vm0 = vcmp.eq.f32.partialorder %v1561_v17, %v1665_v56 }
  0x2e   : > { %vm259_vm1 = vcmp.eq.f32.partialorder %v1555_v14, %v1590_v25  ;;  %1449 = vmatprep.subr.bf16.mxu1 %v1448_v23  ;;  %v464_v43 = vsel %vm400_vm15, %v424_v61, 0.0  ;;  %v471_v44 = vsel %vm407_vm0, %v424_v61, 0.0  ;;  %vm266_vm2 = vcmp.eq.f32.partialorder %v1557_v15, %v1590_v25 }
  0x2f   : > { %v1442_v24 = vpack.c.bf16 %v497_v42, %v490_v41  ;;  %v492_v49 = vadd.f32 %v464_v43, %v335_v47  ;;  %v499_v50 = vadd.f32 %v471_v44, %v342_v48  ;;  %v307_v51 = vrot.slane %v1601_v27, %v1547_v11  ;;  %v793_v48 = vld [vmem:[%s1714_s21 + $0x18] sm:$0xff] }
  0x30   : > { %v372_v52 = vrot.slane %v1574_v21, %v1547_v11  ;;  %v436_v54 = vrot.slane %v1567_v19, %v1547_v11  ;;  %vm258_vm3 = vcmp.eq.f32.partialorder %v1555_v14, %v1594_v26  ;;  %vm265_vm4 = vcmp.eq.f32.partialorder %v1557_v15, %v1594_v26 }
  0x31   : > { %1443 = vmatpush1.bf16.msra.mxu0 %v1442_v24  ;;  %v1735_v55 = vrot.slane %v1601_v27, %v1550_v12  ;;  %v1450_v56 = vpack.c.bf16 %v499_v50, %v492_v49  ;;  %v324_v57 = vsel %vm259_vm1, %v307_v51, 0.0  ;;  %v331_v58 = vsel %vm266_vm2, %v307_v51, 0.0 }
  0x32   : > { %vm389_vm5 = vcmp.eq.f32.partialorder %v1555_v14, %v372_v52  ;;  %vm396_vm6 = vcmp.eq.f32.partialorder %v1557_v15, %v372_v52  ;;  %v1748_v3 = vrot.slane %v1574_v21, %v1550_v12  ;;  %v432_v4 = vrot.slane %v1567_v19, %v1550_v12 }
  0x33   : > { %v453_v59 = vsel %vm389_vm5, %v436_v54, 0.0  ;;  %v323_v60 = vsel %vm258_vm3, %v1735_v55, 0.0  ;;  %v330_v61 = vsel %vm265_vm4, %v1735_v55, 0.0  ;;  %1451 = vmatpush1.bf16.msra.mxu1 %v1450_v56  ;;  %v460_v62 = vsel %vm396_vm6, %v436_v54, 0.0 }
  0x34   : > { %1395 = vmatmul.mubr.msk.f32.vlgmr.msra.gmra.mrb[0].mxu0 %vm794_vm9, %v1725_v53  ;;  %v481_v63 = vadd.f32 %v453_v59, %v324_v57  ;;  %v488_v5 = vadd.f32 %v460_v62, %v331_v58  ;;  %vm273_vm7 = vcmp.eq.f32.partialorder %v1559_v16, %v1590_v25  ;;  %vm280_vm8 = vcmp.eq.f32.partialorder %v1561_v17, %v1590_v25 }
  0x35   : > { %877 = vmatprep.mubr.f32.mxu0 %v1487_v1  ;;  %vm403_vm10 = vcmp.eq.f32.partialorder %v1559_v16, %v372_v52  ;;  %vm388_vm11 = vcmp.eq.f32.partialorder %v1555_v14, %v1748_v3  ;;  %vm395_vm12 = vcmp.eq.f32.partialorder %v1557_v15, %v1748_v3  ;;  %v338_v33 = vsel %vm273_vm7, %v307_v51, 0.0 }
  0x36   : > { %v345_v34 = vsel %vm280_vm8, %v307_v51, 0.0  ;;  %1399 = vmatmul.mubr.msk.f32.vlgmr.msra.gmra.mrb[0].mxu1 %vm794_vm9, %v1725_v53  ;;  %v1452_v35 = vpack.c.bf16 %v488_v5, %v481_v63  ;;  %v452_v36 = vsel %vm388_vm11, %v432_v4, 0.0  ;;  %v459_v37 = vsel %vm395_vm12, %v432_v4, 0.0 }
  0x37   : > { %vm410_vm13 = vcmp.eq.f32.partialorder %v1561_v17, %v372_v52  ;;  %v480_v25 = vadd.f32 %v452_v36, %v323_v60  ;;  %v487_v20 = vadd.f32 %v459_v37, %v330_v61  ;;  %966 = vmatprep.mubr.f32.mxu1 %v1487_v1  ;;  %v467_v38 = vsel %vm403_vm10, %v436_v54, 0.0 }
  0x38   : > { %1396 = vmatmul.mubr.msk.f32.gmra.mrb[2].mxu0 %vm794_vm9, %v1754_v8  ;;  %v474_v39 = vsel %vm410_vm13, %v436_v54, 0.0  ;;  %1453 = vmatprep.subr.bf16.mxu0 %v1452_v35  ;;  %v495_v28 = vadd.f32 %v467_v38, %v338_v33  ;;  %v246_v31 = vrot.slane %v1552_v13, %v1564_v18  ;;  %v311_v32 = vrot.slane %v1601_v27, %v1564_v18 }
  0x39   : > { %883 = vmatprep.mubr.f32.mxu0 %v1487_v1  ;;  %v502_v29 = vadd.f32 %v474_v39, %v345_v34  ;;  %v1454_v40 = vpack.c.bf16 %v487_v20, %v480_v25  ;;  %v376_v45 = vrot.slane %v1574_v21, %v1564_v18  ;;  %v440_v30 = vrot.slane %v1567_v19, %v1564_v18 }
  0x3a   : > { %1400 = vmatmul.mubr.msk.f32.gmra.mrb[2].mxu1 %vm794_vm9, %v1754_v8  ;;  %vm260_vm14 = vcmp.eq.f32.partialorder %v1555_v14, %v246_v31  ;;  %vm267_vm15 = vcmp.eq.f32.partialorder %v1557_v15, %v246_v31  ;;  %vm272_vm0 = vcmp.eq.f32.partialorder %v1559_v16, %v1594_v26  ;;  %vm279_vm3 = vcmp.eq.f32.partialorder %v1561_v17, %v1594_v26 }
  0x3b   : > { %v1456_v46 = vpack.c.bf16 %v502_v29, %v495_v28  ;;  %1455 = vmatpush1.bf16.msra.mxu0 %v1454_v40  ;;  %972 = vmatprep.mubr.f32.mxu1 %v1487_v1  ;;  %v325_v13 = vsel %vm260_vm14, %v311_v32, 0.0  ;;  %v332_v21 = vsel %vm267_vm15, %v311_v32, 0.0  ;;  %vm390_vm1 = vcmp.eq.f32.partialorder %v1555_v14, %v376_v45 }
  0x3c   : > { %vm397_vm2 = vcmp.eq.f32.partialorder %v1557_v15, %v376_v45  ;;  %1397 = vmatmul.mubr.msk.f32.gmra.mrb[4].mxu0 %vm794_vm9, %v1775_v22  ;;  %v454_v19 = vsel %vm390_vm1, %v440_v30, 0.0  ;;  %v337_v23 = vsel %vm272_vm0, %v1735_v55, 0.0  ;;  %v344_v47 = vsel %vm279_vm3, %v1735_v55, 0.0 }
  0x3d   : > { %1457 = vmatprep.subr.bf16.mxu0 %v1456_v46  ;;  %v461_v27 = vsel %vm397_vm2, %v440_v30, 0.0  ;;  %v482_v41 = vadd.f32 %v454_v19, %v325_v13  ;;  %vm402_vm4 = vcmp.eq.f32.partialorder %v1559_v16, %v1748_v3  ;;  %889 = vmatprep.mubr.f32.mxu0 %v1487_v1  ;;  %vm409_vm5 = vcmp.eq.f32.partialorder %v1561_v17, %v1748_v3 }
  0x3e   : > { %v489_v42 = vadd.f32 %v461_v27, %v332_v21  ;;  %1401 = vmatmul.mubr.msk.f32.gmra.mrb[4].mxu1 %vm794_vm9, %v1775_v22  ;;  %v466_v24 = vsel %vm402_vm4, %v432_v4, 0.0  ;;  %vm274_vm6 = vcmp.eq.f32.partialorder %v1559_v16, %v246_v31  ;;  %vm281_vm7 = vcmp.eq.f32.partialorder %v1561_v17, %v246_v31 }
  0x3f   : > { %v473_v43 = vsel %vm409_vm5, %v432_v4, 0.0  ;;  %v494_v44 = vadd.f32 %v466_v24, %v337_v23  ;;  %978 = vmatprep.mubr.f32.mxu1 %v1487_v1  ;;  %v339_v49 = vsel %vm274_vm6, %v311_v32, 0.0  ;;  %v346_v51 = vsel %vm281_vm7, %v311_v32, 0.0 }
  0x40   : > { %v1460_v26 = vpack.c.bf16 %v489_v42, %v482_v41  ;;  %v501_v50 = vadd.f32 %v473_v43, %v344_v47  ;;  %1398 = vmatmul.mubr.msk.f32.gmra.mrb[6].mxu0 %vm794_vm9, %v793_v48  ;;  %vm404_vm8 = vcmp.eq.f32.partialorder %v1559_v16, %v376_v45  ;;  %vm411_vm10 = vcmp.eq.f32.partialorder %v1561_v17, %v376_v45 }
  0x41   : > { %v468_v52 = vsel %vm404_vm8, %v440_v30, 0.0  ;;  %v475_v54 = vsel %vm411_vm10, %v440_v30, 0.0  ;;  %1049 = vmatprep.mubr.f32.mxu0 %v1487_v1 }
  0x42   : > { %1461 = vmatprep.subr.bf16.mxu1 %v1460_v26  ;;  %v1458_v55 = vpack.c.bf16 %v501_v50, %v494_v44  ;;  %v496_v56 = vadd.f32 %v468_v52, %v339_v49  ;;  %v503_v57 = vadd.f32 %v475_v54, %v346_v51  ;;  %1402 = vmatmul.mubr.msk.f32.gmra.mrb[6].mxu1 %vm794_vm9, %v793_v48 }
  0x43   : > { %1463 = vmatpush3.bf16.msra.mxu1 %v1460_v26  ;;  %1430 = vmatprep.mubr.msk.f32.mxu1 %vm794_vm9, %v1725_v53 }
  0x44   : > { %1459 = vmatpush1.bf16.msra.mxu0 %v1458_v55  ;;  %v1464_v58 = vpack.c.bf16 %v503_v57, %v496_v56 }
  0x46   : > { %1465 = vmatprep.subr.bf16.mxu1 %v1464_v58 }
  0x47   : > { %1467 = vmatpush3.bf16.msra.mxu1 %v1464_v58  ;;  %1403 = vmatmul.mubr.msk.f32.vlgmr.msra.gmra.mrb[8].mxu0 %vm794_vm9, %v1725_v53  ;;  %v204_v53 = vld [vmem:[%s193_s24] sm:$0xff] }
  0x48   : > { %1055 = vmatprep.mubr.f32.mxu0 %v1487_v1  ;;  %v1835_v59 = vfloor.f32 %v204_v53 }
  0x4a   : > { %1431 = vmatmul.mubr.msk.f32.vlgmr.msra.gmra.mrb[8].mxu1 %vm794_vm9, %v1754_v8  ;;  %v1838_v60 = vsub.f32 %v204_v53, %v1835_v59  ;;  %v1841_v61 = vadd.f32 1.0, %v1835_v59  ;;  %v1845_v62 = vrot.slane %v1835_v59, %v1541_v9  ;;  %v1856_v3 = vrot.slane %v1835_v59, %v1535_v6 }
  0x4b   : > { %1433 = vmatprep.mubr.msk.f32.mxu1 %vm794_vm9, %v1775_v22  ;;  %1404 = vmatmul.mubr.msk.f32.gmra.mrb[10].mxu0 %vm794_vm9, %v1754_v8  ;;  %v1907_v25 = vrot.slane %v1835_v59, %v1538_v7 }
  0x4c   : > { %1061 = vmatprep.mubr.f32.mxu0 %v1487_v1  ;;  %v1852_v63 = vrot.slane %v1841_v61, %v1541_v9  ;;  %v1860_v4 = vrot.slane %v1841_v61, %v1535_v6  ;;  %v1870_v8 = vrot.slane %v1838_v60, %v1541_v9  ;;  %v1880_v34 = vrot.slane %v1838_v60, %v1535_v6 }
  0x4d   : > { %vm547_vm12 = vcmp.eq.f32.partialorder %v1557_v15, %v1845_v62  ;;  %vm541_vm13 = vcmp.eq.f32.partialorder %v1555_v14, %v1856_v3  ;;  %vm548_vm0 = vcmp.eq.f32.partialorder %v1557_v15, %v1856_v3  ;;  %v710_v40 = vrot.slane %v1838_v60, %v1544_v10 }
  0x4e   : > { %1434 = vmatmul.mubr.msk.f32.gmra.mrb[10].mxu1 %vm794_vm9, %v793_v48  ;;  %vm670_vm11 = vcmp.eq.f32.partialorder %v1555_v14, %v1852_v63  ;;  %vm671_vm14 = vcmp.eq.f32.partialorder %v1555_v14, %v1860_v4  ;;  %vm677_vm15 = vcmp.eq.f32.partialorder %v1557_v15, %v1852_v63  ;;  %vm678_vm1 = vcmp.eq.f32.partialorder %v1557_v15, %v1860_v4 }
  0x4f   : > { %1405 = vmatmul.mubr.msk.f32.gmra.mrb[12].mxu0 %vm794_vm9, %v1775_v22  ;;  %v734_v36 = vsel %vm670_vm11, %v1870_v8, 0.0  ;;  %v735_v38 = vsel %vm671_vm14, %v1880_v34, 0.0  ;;  %v741_v39 = vsel %vm677_vm15, %v1870_v8, 0.0  ;;  %v742_v29 = vsel %vm678_vm1, %v1880_v34, 0.0 }
  0x50   : > { %1067 = vmatprep.mubr.f32.mxu0 %v1487_v1  ;;  %v1848_v1 = vsub.f32 1.0, %v1838_v60  ;;  %v1920_v22 = vrot.slane %v1841_v61, %v1538_v7  ;;  %vm543_vm4 = vcmp.eq.f32.partialorder %v1555_v14, %v1907_v25  ;;  %v1942_v13 = vrot.slane %v1838_v60, %v1538_v7 }
  0x51   : > { %vm554_vm6 = vcmp.eq.f32.partialorder %v1559_v16, %v1845_v62  ;;  %vm684_vm7 = vcmp.eq.f32.partialorder %v1559_v16, %v1852_v63  ;;  %vm685_vm11 = vcmp.eq.f32.partialorder %v1559_v16, %v1860_v4 }
  0x52   : > { %v1866_v5 = vrot.slane %v1848_v1, %v1541_v9  ;;  %v1876_v33 = vrot.slane %v1848_v1, %v1535_v6  ;;  %v1896_v6 = vrot.slane %v1835_v59, %v1544_v10  ;;  %v1900_v9 = vrot.slane %v1841_v61, %v1544_v10 }
  0x53   : > { %1406 = vmatmul.mubr.msk.f32.gmra.mrb[14].mxu0 %vm794_vm9, %v793_v48  ;;  %vm540_vm9 = vcmp.eq.f32.partialorder %v1555_v14, %v1845_v62  ;;  %v581_v31 = vrot.slane %v1848_v1, %v1544_v10  ;;  %v1928_v32 = vrot.slane %v1848_v1, %v1538_v7  ;;  %vm673_vm5 = vcmp.eq.f32.partialorder %v1555_v14, %v1920_v22 }
  0x54   : > { %v605_v35 = vsel %vm540_vm9, %v1866_v5, 0.0  ;;  %v612_v37 = vsel %vm547_vm12, %v1866_v5, 0.0  ;;  %v606_v20 = vsel %vm541_vm13, %v1876_v33, 0.0  ;;  %v613_v28 = vsel %vm548_vm0, %v1876_v33, 0.0 }
  0x55   : > { %vm542_vm2 = vcmp.eq.f32.partialorder %v1555_v14, %v1896_v6  ;;  %vm672_vm3 = vcmp.eq.f32.partialorder %v1555_v14, %v1900_v9  ;;  %v1930_v45 = vadd.f32 %v734_v36, %v605_v35  ;;  %v1934_v10 = vadd.f32 %v735_v38, %v606_v20 }
  0x56   : > { %v1936_v30 = vadd.f32 %v741_v39, %v612_v37  ;;  %v1938_v46 = vadd.f32 %v742_v29, %v613_v28  ;;  %v607_v21 = vsel %vm542_vm2, %v581_v31, 0.0  ;;  %v736_v19 = vsel %vm672_vm3, %v710_v40, 0.0 }
  0x57   : > { %v608_v27 = vsel %vm543_vm4, %v1928_v32, 0.0  ;;  %vm549_vm8 = vcmp.eq.f32.partialorder %v1557_v15, %v1896_v6  ;;  %vm679_vm10 = vcmp.eq.f32.partialorder %v1557_v15, %v1900_v9  ;;  %vm555_vm9 = vcmp.eq.f32.partialorder %v1559_v16, %v1856_v3 }
  0x58   : > { %vm550_vm12 = vcmp.eq.f32.partialorder %v1557_v15, %v1907_v25  ;;  %vm680_vm13 = vcmp.eq.f32.partialorder %v1557_v15, %v1920_v22  ;;  %v737_v7 = vsel %vm673_vm5, %v1942_v13, 0.0  ;;  %v619_v23 = vsel %vm554_vm6, %v1866_v5, 0.0 }
  0x59   : > { %vm556_vm14 = vcmp.eq.f32.partialorder %v1559_v16, %v1896_v6  ;;  %vm686_vm15 = vcmp.eq.f32.partialorder %v1559_v16, %v1900_v9  ;;  %v1969_v41 = vadd.f32 %v736_v19, %v607_v21  ;;  %v748_v42 = vsel %vm684_vm7, %v1870_v8, 0.0 }
  0x5a   : > { %v614_v47 = vsel %vm549_vm8, %v581_v31, 0.0  ;;  %v743_v48 = vsel %vm679_vm10, %v710_v40, 0.0  ;;  %v620_v24 = vsel %vm555_vm9, %v1876_v33, 0.0  ;;  %v749_v26 = vsel %vm685_vm11, %v1880_v34, 0.0 }
  0x5b   : > { %v615_v43 = vsel %vm550_vm12, %v1928_v32, 0.0  ;;  %v744_v44 = vsel %vm680_vm13, %v1942_v13, 0.0  ;;  %v1976_v49 = vadd.f32 %v737_v7, %v608_v27  ;;  %v621_v50 = vsel %vm556_vm14, %v581_v31, 0.0 }
  0x5c   : > { %v750_v51 = vsel %vm686_vm15, %v710_v40, 0.0  ;;  %vm557_vm0 = vcmp.eq.f32.partialorder %v1559_v16, %v1907_v25  ;;  %v1980_v52 = vadd.f32 %v748_v42, %v619_v23  ;;  %vm687_vm1 = vcmp.eq.f32.partialorder %v1559_v16, %v1920_v22 }
  0x5d   : > { %vm561_vm2 = vcmp.eq.f32.partialorder %v1561_v17, %v1845_v62  ;;  %vm691_vm3 = vcmp.eq.f32.partialorder %v1561_v17, %v1852_v63  ;;  %v1988_v54 = vadd.f32 %v743_v48, %v614_v47  ;;  %v1990_v55 = vadd.f32 %v749_v26, %v620_v24 }
  0x5e   : > { %v1992_v56 = vadd.f32 %v744_v44, %v615_v43  ;;  %vm563_vm4 = vcmp.eq.f32.partialorder %v1561_v17, %v1896_v6  ;;  %v1996_v57 = vadd.f32 %v750_v51, %v621_v50  ;;  %v622_v58 = vsel %vm557_vm0, %v1928_v32, 0.0 }
  0x5f   : > { %vm693_vm5 = vcmp.eq.f32.partialorder %v1561_v17, %v1900_v9  ;;  %vm562_vm6 = vcmp.eq.f32.partialorder %v1561_v17, %v1856_v3  ;;  %v751_v53 = vsel %vm687_vm1, %v1942_v13, 0.0  ;;  %v626_v62 = vsel %vm561_vm2, %v1866_v5, 0.0 }
  0x60   : > { %v755_v63 = vsel %vm691_vm3, %v1870_v8, 0.0  ;;  %v2008_v35 = vrot.slane %v1835_v59, %v1550_v12  ;;  %v628_v6 = vsel %vm563_vm4, %v581_v31, 0.0  ;;  %v2012_v36 = vrot.slane %v1841_v61, %v1550_v12 }
  0x61   : > { %v2016_v9 = vrot.slane %v1835_v59, %v1547_v11  ;;  %v2020_v3 = vrot.slane %v1841_v61, %v1547_v11  ;;  %v757_v5 = vsel %vm693_vm5, %v710_v40, 0.0  ;;  %v627_v8 = vsel %vm562_vm6, %v1876_v33, 0.0 }
  0x62   : > { %vm692_vm7 = vcmp.eq.f32.partialorder %v1561_v17, %v1860_v4  ;;  %vm564_vm8 = vcmp.eq.f32.partialorder %v1561_v17, %v1907_v25  ;;  %vm694_vm10 = vcmp.eq.f32.partialorder %v1561_v17, %v1920_v22  ;;  %v2031_v37 = vrot.slane %v1848_v1, %v1550_v12 }
  0x63   : > { %v2035_v20 = vrot.slane %v1835_v59, %v1564_v18  ;;  %v2039_v33 = vrot.slane %v1841_v61, %v1564_v18  ;;  %vm544_vm9 = vcmp.eq.f32.partialorder %v1555_v14, %v2008_v35  ;;  %v2045_v4 = vrot.slane %v1838_v60, %v1550_v12 }
  0x64   : > { %v2049_v25 = vrot.slane %v1848_v1, %v1547_v11  ;;  %v2053_v38 = vrot.slane %v1838_v60, %v1547_v11  ;;  %vm674_vm11 = vcmp.eq.f32.partialorder %v1555_v14, %v2012_v36  ;;  %vm545_vm12 = vcmp.eq.f32.partialorder %v1555_v14, %v2016_v9 }
  0x65   : > { %vm675_vm13 = vcmp.eq.f32.partialorder %v1555_v14, %v2020_v3  ;;  %v756_v12 = vsel %vm692_vm7, %v1880_v34, 0.0  ;;  %v629_v59 = vsel %vm564_vm8, %v1928_v32, 0.0  ;;  %v2065_v61 = vrot.slane %v1848_v1, %v1564_v18 }
  0x66   : > { %v2069_v11 = vrot.slane %v1838_v60, %v1564_v18  ;;  %v758_v39 = vsel %vm694_vm10, %v1942_v13, 0.0  ;;  %v609_v28 = vsel %vm544_vm9, %v2031_v37, 0.0  ;;  %vm553_vm14 = vcmp.eq.f32.partialorder %v1557_v15, %v2035_v20 }
  0x67   : > { %vm683_vm15 = vcmp.eq.f32.partialorder %v1557_v15, %v2039_v33  ;;  %v1488_v29 = vmov 1966171168   ;;  %v738_v1 = vsel %vm674_vm11, %v2045_v4, 0.0  ;;  %v610_v40 = vsel %vm545_vm12, %v2049_v25, 0.0 }
  0x68   : > { %v2077_v31 = vunpack.c.l.s4 %v1488_v29  ;;  %v739_v18 = vsel %vm675_vm13, %v2053_v38, 0.0  ;;  %v779_v32 = vadd.f32 %v751_v53, %v622_v58  ;;  %vm546_vm0 = vcmp.eq.f32.partialorder %v1555_v14, %v2035_v20 }
  0x69   : > { %vm676_vm1 = vcmp.eq.f32.partialorder %v1555_v14, %v2039_v33  ;;  %v783_v13 = vadd.f32 %v755_v63, %v626_v62  ;;  %v2087_v21 = vadd.f32 %v757_v5, %v628_v6  ;;  %v618_v19 = vsel %vm553_vm14, %v2065_v61, 0.0 }
  0x6a   : > { %v747_v27 = vsel %vm683_vm15, %v2069_v11, 0.0  ;;  %v784_v23 = vadd.f32 %v756_v12, %v627_v8  ;;  %v2091_v42 = vadd.f32 %v758_v39, %v629_v59  ;;  %v2095_v47 = vadd.f32 %v739_v18, %v610_v40 }
  0x6b   : > { %v1262_v26 = vunpack.c.0.s8 %v2077_v31  ;;  %v611_v14 = vsel %vm546_vm0, %v2065_v61, 0.0  ;;  %v740_v43 = vsel %vm676_vm1, %v2069_v11, 0.0  ;;  %vm551_vm2 = vcmp.eq.f32.partialorder %v1557_v15, %v2008_v35 }
  0x6c   : > { %v2103_v51 = vadd.f32 %v747_v27, %v618_v19  ;;  %vm681_vm3 = vcmp.eq.f32.partialorder %v1557_v15, %v2012_v36  ;;  %vm567_vm4 = vcmp.eq.f32.partialorder %v1561_v17, %v2035_v20  ;;  %vm697_vm5 = vcmp.eq.f32.partialorder %v1561_v17, %v2039_v33 }
  0x6d   : > { %vm552_vm6 = vcmp.eq.f32.partialorder %v1557_v15, %v2016_v9  ;;  %vm682_vm7 = vcmp.eq.f32.partialorder %v1557_v15, %v2020_v3  ;;  %v2126_v59 = vadd.f32 %v740_v43, %v611_v14  ;;  %v632_v39 = vsel %vm567_vm4, %v2065_v61, 0.0 }
  0x6e   : > { %v617_v15 = vsel %vm552_vm6, %v2049_v25, 0.0  ;;  %vm560_vm8 = vcmp.eq.f32.partialorder %v1559_v16, %v2035_v20  ;;  %vm690_vm10 = vcmp.eq.f32.partialorder %v1559_v16, %v2039_v33  ;;  %vm558_vm9 = vcmp.eq.f32.partialorder %v1559_v16, %v2008_v35 }
  0x6f   : > { %v625_v20 = vsel %vm560_vm8, %v2065_v61, 0.0  ;;  %vm688_vm11 = vcmp.eq.f32.partialorder %v1559_v16, %v2012_v36  ;;  %vm559_vm12 = vcmp.eq.f32.partialorder %v1559_v16, %v2016_v9  ;;  %vm689_vm13 = vcmp.eq.f32.partialorder %v1559_v16, %v2020_v3 }
  0x70   : > { %vm565_vm14 = vcmp.eq.f32.partialorder %v1561_v17, %v2008_v35  ;;  %vm695_vm15 = vcmp.eq.f32.partialorder %v1561_v17, %v2012_v36  ;;  %vm566_vm0 = vcmp.eq.f32.partialorder %v1561_v17, %v2016_v9  ;;  %vm696_vm1 = vcmp.eq.f32.partialorder %v1561_v17, %v2020_v3 }
 0x107   : > { %v873_v34 = vpop.f32.mrb[0].mxu0 }
 0x108   : > { %v1159_v60 = vmul.f32 %v873_v34, %v1930_v45  ;;  %v875_v22 = vpop.f32.mrb[1].mxu0  ;;  %v2093_v45 = vadd.f32 %v738_v1, %v609_v28  ;;  %v746_v1 = vsel %vm682_vm7, %v2053_v38, 0.0 }
 0x109   : > { %v962_v7 = vpop.f32.mrb[0].mxu1  ;;  %v1160_v58 = vmul.f32 %v875_v22, %v1934_v10 }
 0x10a   : > { %v964_v24 = vpop.f32.mrb[1].mxu1  ;;  %v1161_v62 = vmul.f32 %v962_v7, %v1969_v41  ;;  %v745_v41 = vsel %vm681_vm3, %v2045_v4, 0.0 }
 0x10b   : > { %v879_v48 = vpop.f32.mrb[2].mxu0 }
 0x10c   : > { %v1166_v44 = vmul.f32 %v879_v48, %v1936_v30  ;;  %v881_v50 = vpop.f32.mrb[3].mxu0  ;;  %v1162_v30 = vmul.f32 %v964_v24, %v1976_v49 }
 0x10d   : > { %v1167_v53 = vmul.f32 %v881_v50, %v1938_v46  ;;  %v968_v6 = vpop.f32.mrb[2].mxu1  ;;  %v616_v46 = vsel %vm551_vm2, %v2031_v37, 0.0  ;;  %vm1308_vm2 = vcmp.lt.s32.totalorder %v209_v0, 896 }
 0x10e   : > { %v1187_v63 = vadd.f32 %v1166_v44, %v1159_v60  ;;  %v1168_v10 = vmul.f32 %v968_v6, %v1988_v54  ;;  %v970_v8 = vpop.f32.mrb[3].mxu1  ;;  %v761_v54 = vsel %vm697_vm5, %v2069_v11, 0.0  ;;  %v2137_v60 = vadd.f32 %v745_v41, %v616_v46 }
 0x10f   : > { %v1196_v5 = vadd.f32 %v1167_v53, %v1160_v58  ;;  %v885_v12 = vpop.f32.mrb[4].mxu0  ;;  %v1169_v49 = vmul.f32 %v970_v8, %v1992_v56  ;;  %v753_v6 = vsel %vm689_vm13, %v2053_v38, 0.0 }
 0x110   : > { %v1173_v28 = vmul.f32 %v885_v12, %v1980_v52  ;;  %v1205_v34 = vadd.f32 %v1168_v10, %v1161_v62  ;;  %v887_v29 = vpop.f32.mrb[5].mxu0  ;;  %v2142_v52 = vadd.f32 %v761_v54, %v632_v39  ;;  %v623_v62 = vsel %vm558_vm9, %v2031_v37, 0.0 }
 0x111   : > { %v1174_v40 = vmul.f32 %v887_v29, %v1990_v55  ;;  %v1214_v56 = vadd.f32 %v1169_v49, %v1162_v30  ;;  %v974_v18 = vpop.f32.mrb[4].mxu1  ;;  %v774_v55 = vadd.f32 %v746_v1, %v617_v15  ;;  %v759_v10 = vsel %vm695_vm15, %v2045_v4, 0.0 }
 0x112   : > { %v1188_v22 = vadd.f32 %v1187_v63, %v1173_v28  ;;  %v1175_v19 = vmul.f32 %v974_v18, %v1996_v57  ;;  %v976_v27 = vpop.f32.mrb[5].mxu1  ;;  %v752_v63 = vsel %vm688_vm11, %v2045_v4, 0.0  ;;  %v631_v15 = vsel %vm566_vm0, %v2049_v25, 0.0 }
 0x113   : > { %v1197_v7 = vadd.f32 %v1196_v5, %v1174_v40  ;;  %v1176_v48 = vmul.f32 %v976_v27, %v779_v32  ;;  %v891_v24 = vpop.f32.mrb[6].mxu0  ;;  %v780_v49 = vadd.f32 %v752_v63, %v623_v62  ;;  %v760_v1 = vsel %vm696_vm1, %v2053_v38, 0.0 }
 0x114   : > { %v1206_v14 = vadd.f32 %v1205_v34, %v1175_v19  ;;  %v1180_v43 = vmul.f32 %v891_v24, %v783_v13  ;;  %v893_v44 = vpop.f32.mrb[7].mxu0  ;;  %v754_v13 = vsel %vm690_vm10, %v2069_v11, 0.0  ;;  %v624_v11 = vsel %vm559_vm12, %v2049_v25, 0.0 }
 0x115   : > { %v1215_v57 = vadd.f32 %v1214_v56, %v1176_v48  ;;  %v1181_v50 = vmul.f32 %v893_v44, %v784_v23  ;;  %v980_v58 = vpop.f32.mrb[6].mxu1  ;;  %v782_v12 = vadd.f32 %v754_v13, %v625_v20  ;;  %v781_v28 = vadd.f32 %v753_v6, %v624_v11 }
 0x116   : > { %v1189_v32 = vadd.f32 %v1188_v22, %v1180_v43  ;;  %v1182_v61 = vmul.f32 %v980_v58, %v2087_v21  ;;  %v982_v53 = vpop.f32.mrb[7].mxu1  ;;  %v630_v21 = vsel %vm565_vm14, %v2031_v37, 0.0 }
 0x117   : > { %v1198_v23 = vadd.f32 %v1197_v7, %v1181_v50  ;;  %v1183_v33 = vmul.f32 %v982_v53, %v2091_v42  ;;  %v787_v37 = vadd.f32 %v759_v10, %v630_v21 }
 0x118   : > { %v1190_v30 = vrot.slane %v1189_v32, 4  ;;  %v1207_v5 = vadd.f32 %v1206_v14, %v1182_v61 }
 0x119   : > { %v1199_v36 = vrot.slane %v1198_v23, 4  ;;  %v1216_v46 = vadd.f32 %v1215_v57, %v1183_v33 }
 0x11a   : > { %v1191_v8 = vadd.f32 %v1190_v30, %v1189_v32  ;;  %v1051_v41 = vpop.f32.mrb[8].mxu0  ;;  %v1208_v16 = vrot.slane %v1207_v5, 4  ;;  %v788_v30 = vadd.f32 %v760_v1, %v631_v15 }
 0x11b   : > { %v1200_v35 = vadd.f32 %v1199_v36, %v1198_v23  ;;  %v1053_v42 = vpop.f32.mrb[9].mxu0  ;;  %v1217_v54 = vrot.slane %v1216_v46, 4  ;;  %v1163_v17 = vmul.f32 %v1051_v41, %v2093_v45 }
 0x11c   : > { %v1192_v39 = vrot.slane %v1191_v8, 2  ;;  %v1209_v34 = vadd.f32 %v1208_v16, %v1207_v5  ;;  %v1164_v25 = vmul.f32 %v1053_v42, %v2095_v47  ;;  %v1265_v47 = vsub.s32 %v1262_v26, %v1522_v2 }
 0x11d   : > { %v1201_v4 = vrot.slane %v1200_v35, 2  ;;  %v1432_v29 = vpop.f32.mrb[8].mxu1  ;;  %v1218_v40 = vadd.f32 %v1217_v54, %v1216_v46 }
 0x11e   : > { %v1193_v9 = vadd.f32 %v1192_v39, %v1191_v8  ;;  %v1172_v3 = vmul.f32 %v1432_v29, %v2103_v51  ;;  %v1140_v56 = vpop.f32.mrb[9].mxu1  ;;  %v1057_v18 = vpop.f32.mrb[10].mxu0  ;;  %v1210_v22 = vrot.slane %v1209_v34, 2 }
 0x11f   : > { %v1202_v19 = vadd.f32 %v1201_v4, %v1200_v35  ;;  %v1165_v27 = vmul.f32 %v1140_v56, %v2126_v59  ;;  %v1170_v7 = vmul.f32 %v1057_v18, %v2137_v60  ;;  %v1059_v48 = vpop.f32.mrb[11].mxu0  ;;  %v1219_v14 = vrot.slane %v1218_v40, 2 }
 0x120   : > { %v1194_v24 = vrot.slane %v1193_v9, 1  ;;  %v1171_v38 = vmul.f32 %v1059_v48, %v774_v55  ;;  %v1211_v43 = vadd.f32 %v1210_v22, %v1209_v34 }
 0x121   : > { %v1203_v44 = vrot.slane %v1202_v19, 1  ;;  %v1241_v20 = vadd.f32 %v1172_v3, %v1165_v27  ;;  %v1223_v45 = vadd.f32 %v1170_v7, %v1163_v17  ;;  %v1435_v57 = vpop.f32.mrb[10].mxu1  ;;  %v1220_v50 = vadd.f32 %v1219_v14, %v1218_v40 }
 0x122   : > { %v1195_v51 = vadd.f32 %v1194_v24, %v1193_v9  ;;  %v1186_v32 = vmul.f32 %v1435_v57, %v2142_v52  ;;  %v1232_v58 = vadd.f32 %v1171_v38, %v1164_v25  ;;  %v1150_v13 = vpop.f32.mrb[11].mxu1  ;;  %v1063_v59 = vpop.f32.mrb[12].mxu0  ;;  %v1212_v61 = vrot.slane %v1211_v43, 1 }
 0x123   : > { %v1204_v60 = vadd.f32 %v1203_v44, %v1202_v19  ;;  %v1179_v23 = vmul.f32 %v1150_v13, %v782_v12  ;;  %v1177_v53 = vmul.f32 %v1063_v59, %v780_v49  ;;  %v1065_v62 = vpop.f32.mrb[13].mxu0  ;;  %v1221_v55 = vrot.slane %v1220_v50, 1 }
 0x124   : > { %v1178_v63 = vmul.f32 %v1065_v62, %v781_v28  ;;  %v1213_v33 = vadd.f32 %v1212_v61, %v1211_v43 }
 0x125   : > { %v1257_v11 = vcombine.low %v1195_v51, %v1204_v60  ;;  %v1242_v6 = vadd.f32 %v1241_v20, %v1179_v23  ;;  %v1224_v5 = vadd.f32 %v1223_v45, %v1177_v53  ;;  %v1222_v52 = vadd.f32 %v1221_v55, %v1220_v50 }
 0x126   : > { %v1233_v36 = vadd.f32 %v1232_v58, %v1178_v63  ;;  %v1069_v21 = vpop.f32.mrb[14].mxu0 }
 0x127   : > { %v1243_v10 = vadd.f32 %v1242_v6, %v1186_v32  ;;  %v1184_v8 = vmul.f32 %v1069_v21, %v787_v37  ;;  %v1071_v46 = vpop.f32.mrb[15].mxu0  ;;  %v1266_v41 = vrot.slane %v1257_v11, %v1265_v47  ;;  %v1258_v16 = vcombine.low %v1213_v33, %v1222_v52 }
 0x128   : > { %v1185_v35 = vmul.f32 %v1071_v46, %v788_v30 }
 0x129   : > { %v1244_v42 = vrot.slane %v1243_v10, 4  ;;  %v1225_v12 = vadd.f32 %v1224_v5, %v1184_v8  ;;  %v1273_v31 = vrot.slane %v1258_v16, %v1265_v47 }
 0x12a   : > { %v1234_v2 = vadd.f32 %v1233_v36, %v1185_v35 }
 0x12b   : > { %v1245_v26 = vadd.f32 %v1244_v42, %v1243_v10  ;;  %v1226_v49 = vrot.slane %v1225_v12, 4  ;;  %v1288_v39 = vcombine.low %v1266_v41, %v1273_v31 }
 0x12c   : > { %v1235_v54 = vrot.slane %v1234_v2, 4 }
 0x12d   : > { %v1246_v28 = vrot.slane %v1245_v26, 2  ;;  %v1227_v34 = vadd.f32 %v1226_v49, %v1225_v12  ;;  %v1296_v24 = vrot.slane %v1288_v39, %v1265_v47 }
 0x12e   : > { %v1236_v4 = vadd.f32 %v1235_v54, %v1234_v2 }
 0x12f   : > { %v1247_v29 = vadd.f32 %v1246_v28, %v1245_v26  ;;  %v1228_v15 = vrot.slane %v1227_v34, 2 }
 0x130   : > { %v1237_v1 = vrot.slane %v1236_v4, 2 }
 0x131   : > { %v1229_v37 = vadd.f32 %v1228_v15, %v1227_v34  ;;  %v1248_v9 = vrot.slane %v1247_v29, 1 }
 0x132   : > { %v1238_v40 = vadd.f32 %v1237_v1, %v1236_v4 }
 0x133   : > { %v1230_v17 = vrot.slane %v1229_v37, 1  ;;  %v1249_v18 = vadd.f32 %v1248_v9, %v1247_v29 }
 0x134   : > { %v1239_v3 = vrot.slane %v1238_v40, 1 }
 0x135   : > { %v1231_v56 = vadd.f32 %v1230_v17, %v1229_v37  ;;  %v1287_v27 = vrot.slane %v1249_v18, %v1265_v47 }
 0x136   : > { %v1240_v22 = vadd.f32 %v1239_v3, %v1238_v40 }
 0x138   : > { %v1259_v19 = vcombine.low %v1231_v56, %v1240_v22 }
 0x13a   : > { %v1280_v7 = vrot.slane %v1259_v19, %v1265_v47 }
 0x13c   : > { %v1289_v48 = vcombine.low %v1280_v7, %v1287_v27 }
 0x13e   : > { %v1303_v14 = vrot.slane %v1289_v48, %v1265_v47 }
 0x140   : > { %v1304_v25 = vcombine.low %v1296_v24, %v1303_v14 }
 0x142   : > { %1310 = vst.msk [vmem:[%s202_s27] sm:$0x7f] %vm1308_vm2, %v1304_v25 }
 0x143 PF: > { %s13_s12 = sadd.s32 1, %s1485_s12  }
 0x144   : > { %p10_p4 = scmp.ge.s32.totalorder %s13_s12, 4  }
 0x146   :  { %12 = sbr.rel (!%p10_p4) target bundleno = 1 (0x1), region = 68 }

// kernel: net_forward.11
= control target key start
LH: loop header
LB: loop body
LE: loop exit
PB: predicated region body
PF: predicated region fallthrough
CT: control target
= control target key end

     0   :  { %v1244_v47 = vmov 1983009808   ;;  %v218_v49 = vlaneseq  ;;  %s1908_s0 = inlined_call_operand.vmem [shape: f32[2,1440], index: 0, kind: input, shape index: {}]   ;;  %s1909_s1 = inlined_call_operand.vmem [shape: f32[1440,50], index: 1, kind: input, shape index: {}]   ;;  %s1910_s2 = inlined_call_operand.vmem [shape: f32[1,50], index: 2, kind: input, shape index: {}]   ;;  %s1911_s3 = inlined_call_operand.vmem [shape: f32[50,10], index: 3, kind: input, shape index: {}]   ;;  %s1912_s4 = inlined_call_operand.vmem [shape: f32[1,10], index: 4, kind: input, shape index: {}]   ;;  %s1913_s5 = inlined_call_operand.hbm [shape: f32[2,10], index: 5, kind: output, shape index: {}]  }
   0x1   :  { %v40_v0 = vld [vmem:[%s1909_s1 + $0x80] sm:$0xff]  ;;  %v41_v1 = vld [vmem:[%s1909_s1 + $0x88] sm:$0xff]  ;;  %v42_v11 = vld [vmem:[%s1909_s1 + $0x90] sm:$0xff]  ;;  %v216_v48 = vunpack.c.l.s4 %v1244_v47 }
   0x2   :  { %v72_v2 = vld [vmem:[%s1909_s1 + $0x180] sm:$0xff]  ;;  %v1013_v3 = vpack.c.bf16 %v41_v1, %v40_v0  ;;  %v73_v4 = vld [vmem:[%s1909_s1 + $0x188] sm:$0xff]  ;;  %v43_v13 = vld [vmem:[%s1909_s1 + $0x98] sm:$0xff]  ;;  %v219_v0 = vshrl.u32 %v218_v49, 7 }
   0x3   :  { %v24_v5 = vld [vmem:[%s1909_s1] sm:$0xff]  ;;  %v25_v6 = vld [vmem:[%s1909_s1 + $0x8] sm:$0xff]  ;;  %v1045_v7 = vpack.c.bf16 %v73_v4, %v72_v2  ;;  %v74_v14 = vld [vmem:[%s1909_s1 + $0x190] sm:$0xff]  ;;  %v1017_v16 = vpack.c.bf16 %v43_v13, %v42_v11  ;;  %v217_v63 = vunpack.c.0.s8 %v216_v48 }
   0x4   :  { %v1015_v8 = vpack.c.bf16 %v25_v6, %v24_v5  ;;  %v56_v9 = vld [vmem:[%s1909_s1 + $0x100] sm:$0xff]  ;;  %v57_v10 = vld [vmem:[%s1909_s1 + $0x108] sm:$0xff]  ;;  %1014 = vmatprep.subr.bf16.mxu0 %v1013_v3  ;;  %v75_v15 = vld [vmem:[%s1909_s1 + $0x198] sm:$0xff] }
   0x5   :  { %v1047_v12 = vpack.c.bf16 %v57_v10, %v56_v9  ;;  %1046 = vmatprep.subr.bf16.mxu1 %v1045_v7  ;;  %v1049_v17 = vpack.c.bf16 %v75_v15, %v74_v14  ;;  %v26_v18 = vld [vmem:[%s1909_s1 + $0x10] sm:$0xff]  ;;  %v27_v19 = vld [vmem:[%s1909_s1 + $0x18] sm:$0xff]  ;;  %v44_v23 = vld [vmem:[%s1909_s1 + $0xa0] sm:$0xff]  ;;  %v1429_v13 = vsub.s32 %v217_v63, %v219_v0 }
   0x6   :  { %1016 = vmatpush3.bf16.msra.mxu0 %v1015_v8  ;;  %v58_v20 = vld [vmem:[%s1909_s1 + $0x110] sm:$0xff]  ;;  %v1019_v21 = vpack.c.bf16 %v27_v19, %v26_v18  ;;  %v59_v22 = vld [vmem:[%s1909_s1 + $0x118] sm:$0xff]  ;;  %v45_v24 = vld [vmem:[%s1909_s1 + $0xa8] sm:$0xff] }
   0x7   :  { %1048 = vmatpush3.bf16.msra.mxu1 %v1047_v12  ;;  %1018 = vmatprep.subr.bf16.mxu0 %v1017_v16  ;;  %v1051_v25 = vpack.c.bf16 %v59_v22, %v58_v20  ;;  %v1021_v26 = vpack.c.bf16 %v45_v24, %v44_v23  ;;  %v76_v27 = vld [vmem:[%s1909_s1 + $0x1a0] sm:$0xff]  ;;  %v77_v28 = vld [vmem:[%s1909_s1 + $0x1a8] sm:$0xff]  ;;  %v46_v35 = vld [vmem:[%s1909_s1 + $0xb0] sm:$0xff] }
   0x8   :  { %1050 = vmatprep.subr.bf16.mxu1 %v1049_v17  ;;  %v28_v29 = vld [vmem:[%s1909_s1 + $0x20] sm:$0xff]  ;;  %v1053_v30 = vpack.c.bf16 %v77_v28, %v76_v27  ;;  %v29_v31 = vld [vmem:[%s1909_s1 + $0x28] sm:$0xff]  ;;  %v47_v36 = vld [vmem:[%s1909_s1 + $0xb8] sm:$0xff] }
   0x9   :  { %v60_v32 = vld [vmem:[%s1909_s1 + $0x120] sm:$0xff]  ;;  %v61_v33 = vld [vmem:[%s1909_s1 + $0x128] sm:$0xff]  ;;  %v1023_v34 = vpack.c.bf16 %v29_v31, %v28_v29  ;;  %v78_v37 = vld [vmem:[%s1909_s1 + $0x1b0] sm:$0xff]  ;;  %v1025_v39 = vpack.c.bf16 %v47_v36, %v46_v35 }
   0xa   :  { %1020 = vmatpush3.bf16.msra.mxu0 %v1019_v21  ;;  %v1055_v38 = vpack.c.bf16 %v61_v33, %v60_v32  ;;  %v79_v40 = vld [vmem:[%s1909_s1 + $0x1b8] sm:$0xff]  ;;  %v30_v41 = vld [vmem:[%s1909_s1 + $0x30] sm:$0xff]  ;;  %v48_v46 = vld [vmem:[%s1909_s1 + $0xc0] sm:$0xff] }
   0xb   :  { %1052 = vmatpush3.bf16.msra.mxu1 %v1051_v25  ;;  %1022 = vmatprep.subr.bf16.mxu0 %v1021_v26  ;;  %v31_v42 = vld [vmem:[%s1909_s1 + $0x38] sm:$0xff]  ;;  %v1057_v43 = vpack.c.bf16 %v79_v40, %v78_v37  ;;  %v62_v44 = vld [vmem:[%s1909_s1 + $0x130] sm:$0xff]  ;;  %v49_v50 = vld [vmem:[%s1909_s1 + $0xc8] sm:$0xff] }
   0xc   :  { %1054 = vmatprep.subr.bf16.mxu1 %v1053_v30  ;;  %v63_v45 = vld [vmem:[%s1909_s1 + $0x138] sm:$0xff]  ;;  %v80_v51 = vld [vmem:[%s1909_s1 + $0x1c0] sm:$0xff]  ;;  %v81_v52 = vld [vmem:[%s1909_s1 + $0x1c8] sm:$0xff]  ;;  %v1027_v53 = vpack.c.bf16 %v31_v42, %v30_v41  ;;  %v1029_v55 = vpack.c.bf16 %v49_v50, %v48_v46 }
   0xd   :  { %v1059_v54 = vpack.c.bf16 %v63_v45, %v62_v44  ;;  %v32_v56 = vld [vmem:[%s1909_s1 + $0x40] sm:$0xff]  ;;  %v33_v57 = vld [vmem:[%s1909_s1 + $0x48] sm:$0xff]  ;;  %v1061_v59 = vpack.c.bf16 %v81_v52, %v80_v51  ;;  %v50_v61 = vld [vmem:[%s1909_s1 + $0xd0] sm:$0xff] }
   0xe   :  { %1024 = vmatpush3.bf16.msra.mxu0 %v1023_v34  ;;  %v64_v58 = vld [vmem:[%s1909_s1 + $0x140] sm:$0xff]  ;;  %v65_v60 = vld [vmem:[%s1909_s1 + $0x148] sm:$0xff]  ;;  %v51_v62 = vld [vmem:[%s1909_s1 + $0xd8] sm:$0xff]  ;;  %v1031_v3 = vpack.c.bf16 %v33_v57, %v32_v56 }
   0xf   :  { %1056 = vmatpush3.bf16.msra.mxu1 %v1055_v38  ;;  %1026 = vmatprep.subr.bf16.mxu0 %v1025_v39  ;;  %v82_v1 = vld [vmem:[%s1909_s1 + $0x1d0] sm:$0xff]  ;;  %v83_v2 = vld [vmem:[%s1909_s1 + $0x1d8] sm:$0xff]  ;;  %v1063_v4 = vpack.c.bf16 %v65_v60, %v64_v58  ;;  %v1033_v5 = vpack.c.bf16 %v51_v62, %v50_v61  ;;  %v52_v11 = vld [vmem:[%s1909_s1 + $0xe0] sm:$0xff] }
  0x10   :  { %1058 = vmatprep.subr.bf16.mxu1 %v1057_v43  ;;  %v34_v6 = vld [vmem:[%s1909_s1 + $0x50] sm:$0xff]  ;;  %v35_v7 = vld [vmem:[%s1909_s1 + $0x58] sm:$0xff]  ;;  %v1065_v9 = vpack.c.bf16 %v83_v2, %v82_v1  ;;  %v53_v12 = vld [vmem:[%s1909_s1 + $0xe8] sm:$0xff] }
  0x11   :  { %v66_v8 = vld [vmem:[%s1909_s1 + $0x150] sm:$0xff]  ;;  %v67_v10 = vld [vmem:[%s1909_s1 + $0x158] sm:$0xff]  ;;  %v84_v14 = vld [vmem:[%s1909_s1 + $0x1e0] sm:$0xff]  ;;  %v1035_v16 = vpack.c.bf16 %v35_v7, %v34_v6  ;;  %v1037_v19 = vpack.c.bf16 %v53_v12, %v52_v11 }
  0x12   :  { %1028 = vmatpush3.bf16.msra.mxu0 %v1027_v53  ;;  %v85_v15 = vld [vmem:[%s1909_s1 + $0x1e8] sm:$0xff]  ;;  %v36_v17 = vld [vmem:[%s1909_s1 + $0x60] sm:$0xff]  ;;  %v1067_v18 = vpack.c.bf16 %v67_v10, %v66_v8  ;;  %v54_v25 = vld [vmem:[%s1909_s1 + $0xf0] sm:$0xff] }
  0x13   :  { %1060 = vmatpush3.bf16.msra.mxu1 %v1059_v54  ;;  %1030 = vmatprep.subr.bf16.mxu0 %v1029_v55  ;;  %v37_v20 = vld [vmem:[%s1909_s1 + $0x68] sm:$0xff]  ;;  %v68_v21 = vld [vmem:[%s1909_s1 + $0x160] sm:$0xff]  ;;  %v1069_v23 = vpack.c.bf16 %v85_v15, %v84_v14  ;;  %v55_v26 = vld [vmem:[%s1909_s1 + $0xf8] sm:$0xff] }
  0x14   :  { %1062 = vmatprep.subr.bf16.mxu1 %v1061_v59  ;;  %v21_v22 = vld [vmem:[%s1908_s0] sm:$0xff]  ;;  %v69_v24 = vld [vmem:[%s1909_s1 + $0x168] sm:$0xff]  ;;  %v86_v29 = vld [vmem:[%s1909_s1 + $0x1f0] sm:$0xff]  ;;  %v1039_v31 = vpack.c.bf16 %v37_v20, %v36_v17  ;;  %v1041_v35 = vpack.c.bf16 %v55_v26, %v54_v25 }
  0x15   :  { %v221_v27 = vrot.slane %v21_v22, %v1429_v13  ;;  %v214_v28 = vcombine.high %v21_v22, %v21_v22  ;;  %v87_v30 = vld [vmem:[%s1909_s1 + $0x1f8] sm:$0xff]  ;;  %v1071_v34 = vpack.c.bf16 %v69_v24, %v68_v21  ;;  %v38_v36 = vld [vmem:[%s1909_s1 + $0x70] sm:$0xff]  ;;  %v104_v42 = vld [vmem:[%s1909_s1 + $0x280] sm:$0xff] }
  0x16   :  { %1032 = vmatpush3.bf16.msra.mxu0 %v1031_v3  ;;  %v39_v37 = vld [vmem:[%s1909_s1 + $0x78] sm:$0xff]  ;;  %v70_v38 = vld [vmem:[%s1909_s1 + $0x170] sm:$0xff]  ;;  %v1073_v39 = vpack.c.bf16 %v87_v30, %v86_v29  ;;  %v105_v43 = vld [vmem:[%s1909_s1 + $0x288] sm:$0xff] }
  0x17   :  { %1064 = vmatpush3.bf16.msra.mxu1 %v1063_v4  ;;  %1034 = vmatprep.subr.bf16.mxu0 %v1033_v5  ;;  %v229_v32 = vcombine.high %v221_v27, %v221_v27  ;;  %v228_v33 = vrot.slane %v214_v28, %v1429_v13  ;;  %v71_v40 = vld [vmem:[%s1909_s1 + $0x178] sm:$0xff]  ;;  %v136_v44 = vld [vmem:[%s1909_s1 + $0x380] sm:$0xff]  ;;  %v137_v45 = vld [vmem:[%s1909_s1 + $0x388] sm:$0xff]  ;;  %v1043_v46 = vpack.c.bf16 %v39_v37, %v38_v36 }
  0x18   :  { %1066 = vmatprep.subr.bf16.mxu1 %v1065_v9  ;;  %v1075_v47 = vpack.c.bf16 %v71_v40, %v70_v38  ;;  %v1077_v48 = vpack.c.bf16 %v105_v43, %v104_v42  ;;  %v88_v49 = vld [vmem:[%s1909_s1 + $0x200] sm:$0xff]  ;;  %v89_v50 = vld [vmem:[%s1909_s1 + $0x208] sm:$0xff]  ;;  %v1109_v52 = vpack.c.bf16 %v137_v45, %v136_v44  ;;  %v106_v54 = vld [vmem:[%s1909_s1 + $0x290] sm:$0xff] }
  0x19   :  { %343 = vmatprep.mubr.f32.mxu0 %v229_v32  ;;  %v230_v41 = vcombine.high %v228_v33, %v228_v33  ;;  %v120_v51 = vld [vmem:[%s1909_s1 + $0x300] sm:$0xff]  ;;  %v121_v53 = vld [vmem:[%s1909_s1 + $0x308] sm:$0xff]  ;;  %v107_v55 = vld [vmem:[%s1909_s1 + $0x298] sm:$0xff]  ;;  %v1079_v58 = vpack.c.bf16 %v89_v50, %v88_v49 }
  0x1a   :  { %1036 = vmatpush3.bf16.msra.mxu0 %v1035_v16  ;;  %v138_v56 = vld [vmem:[%s1909_s1 + $0x390] sm:$0xff]  ;;  %v139_v57 = vld [vmem:[%s1909_s1 + $0x398] sm:$0xff]  ;;  %v1111_v59 = vpack.c.bf16 %v121_v53, %v120_v51  ;;  %v1081_v60 = vpack.c.bf16 %v107_v55, %v106_v54  ;;  %v108_v2 = vld [vmem:[%s1909_s1 + $0x2a0] sm:$0xff] }
  0x1b   :  { %1068 = vmatpush3.bf16.msra.mxu1 %v1067_v18  ;;  %1038 = vmatprep.subr.bf16.mxu0 %v1037_v19  ;;  %v90_v61 = vld [vmem:[%s1909_s1 + $0x210] sm:$0xff]  ;;  %v91_v62 = vld [vmem:[%s1909_s1 + $0x218] sm:$0xff]  ;;  %v1113_v0 = vpack.c.bf16 %v139_v57, %v138_v56  ;;  %v109_v3 = vld [vmem:[%s1909_s1 + $0x2a8] sm:$0xff] }
  0x1c   :  { %1070 = vmatprep.subr.bf16.mxu1 %v1069_v23  ;;  %413 = vmatprep.mubr.f32.mxu1 %v230_v41  ;;  %v122_v63 = vld [vmem:[%s1909_s1 + $0x310] sm:$0xff]  ;;  %v123_v1 = vld [vmem:[%s1909_s1 + $0x318] sm:$0xff]  ;;  %v140_v4 = vld [vmem:[%s1909_s1 + $0x3a0] sm:$0xff]  ;;  %v1083_v6 = vpack.c.bf16 %v91_v62, %v90_v61  ;;  %v1085_v8 = vpack.c.bf16 %v109_v3, %v108_v2 }
  0x1d   :  { %v141_v5 = vld [vmem:[%s1909_s1 + $0x3a8] sm:$0xff]  ;;  %v1115_v7 = vpack.c.bf16 %v123_v1, %v122_v63  ;;  %v92_v9 = vld [vmem:[%s1909_s1 + $0x220] sm:$0xff]  ;;  %v110_v15 = vld [vmem:[%s1909_s1 + $0x2b0] sm:$0xff] }
  0x1e   :  { %1040 = vmatpush3.bf16.msra.mxu0 %v1039_v31  ;;  %v93_v10 = vld [vmem:[%s1909_s1 + $0x228] sm:$0xff]  ;;  %v124_v11 = vld [vmem:[%s1909_s1 + $0x320] sm:$0xff]  ;;  %v1117_v12 = vpack.c.bf16 %v141_v5, %v140_v4  ;;  %v111_v16 = vld [vmem:[%s1909_s1 + $0x2b8] sm:$0xff] }
  0x1f   :  { %1072 = vmatpush3.bf16.msra.mxu1 %v1071_v34  ;;  %1042 = vmatprep.subr.bf16.mxu0 %v1041_v35  ;;  %v125_v14 = vld [vmem:[%s1909_s1 + $0x328] sm:$0xff]  ;;  %v142_v17 = vld [vmem:[%s1909_s1 + $0x3b0] sm:$0xff]  ;;  %v143_v18 = vld [vmem:[%s1909_s1 + $0x3b8] sm:$0xff]  ;;  %v1087_v19 = vpack.c.bf16 %v93_v10, %v92_v9  ;;  %v1089_v21 = vpack.c.bf16 %v111_v16, %v110_v15 }
  0x20   :  { %1074 = vmatprep.subr.bf16.mxu1 %v1073_v39  ;;  %v1119_v20 = vpack.c.bf16 %v125_v14, %v124_v11  ;;  %v94_v22 = vld [vmem:[%s1909_s1 + $0x230] sm:$0xff]  ;;  %v95_v23 = vld [vmem:[%s1909_s1 + $0x238] sm:$0xff]  ;;  %v1121_v25 = vpack.c.bf16 %v143_v18, %v142_v17  ;;  %v113_v28 = vld [vmem:[%s1909_s1 + $0x2c8] sm:$0xff] }
  0x21   :  { %v126_v24 = vld [vmem:[%s1909_s1 + $0x330] sm:$0xff]  ;;  %v127_v26 = vld [vmem:[%s1909_s1 + $0x338] sm:$0xff]  ;;  %v144_v29 = vld [vmem:[%s1909_s1 + $0x3c0] sm:$0xff]  ;;  %v1091_v32 = vpack.c.bf16 %v95_v23, %v94_v22 }
  0x22   :  { %1044 = vmatpush3.bf16.msra.mxu0 %v1043_v46  ;;  %v145_v30 = vld [vmem:[%s1909_s1 + $0x3c8] sm:$0xff]  ;;  %v1123_v35 = vpack.c.bf16 %v127_v26, %v126_v24  ;;  %v96_v37 = vld [vmem:[%s1909_s1 + $0x240] sm:$0xff]  ;;  %v114_v42 = vld [vmem:[%s1909_s1 + $0x2d0] sm:$0xff] }
  0x23   :  { %1076 = vmatpush3.bf16.msra.mxu1 %v1075_v47  ;;  %1078 = vmatprep.subr.bf16.mxu0 %v1077_v48  ;;  %v22_v31 = vld [vmem:[%s1908_s0 + $0x8] sm:$0xff]  ;;  %v128_v39 = vld [vmem:[%s1909_s1 + $0x340] sm:$0xff]  ;;  %v1125_v40 = vpack.c.bf16 %v145_v30, %v144_v29  ;;  %v115_v43 = vld [vmem:[%s1909_s1 + $0x2d8] sm:$0xff] }
  0x24   :  { %1110 = vmatprep.subr.bf16.mxu1 %v1109_v52  ;;  %v231_v34 = vcombine.high %v22_v31, %v22_v31  ;;  %v97_v38 = vld [vmem:[%s1909_s1 + $0x248] sm:$0xff]  ;;  %v146_v46 = vld [vmem:[%s1909_s1 + $0x3d0] sm:$0xff]  ;;  %v147_v47 = vld [vmem:[%s1909_s1 + $0x3d8] sm:$0xff]  ;;  %v1097_v51 = vpack.c.bf16 %v115_v43, %v114_v42 }
  0x25   :  { %344 = vmatmul.mubr.f32.vlgmr.msra.gmra.mrb[0].mxu0 %v221_v27  ;;  %v112_v27 = vld [vmem:[%s1909_s1 + $0x2c0] sm:$0xff]  ;;  %v129_v41 = vld [vmem:[%s1909_s1 + $0x348] sm:$0xff]  ;;  %v1095_v48 = vpack.c.bf16 %v97_v38, %v96_v37  ;;  %v98_v52 = vld [vmem:[%s1909_s1 + $0x250] sm:$0xff]  ;;  %v1129_v55 = vpack.c.bf16 %v147_v47, %v146_v46 }
  0x26   :  { %414 = vmatmul.mubr.f32.vlgmr.msra.gmra.mrb[0].mxu1 %v228_v33  ;;  %1080 = vmatpush3.bf16.msra.mxu0 %v1079_v58  ;;  %v1590_v33 = vrot.slane %v22_v31, %v1429_v13  ;;  %v1093_v36 = vpack.c.bf16 %v113_v28, %v112_v27  ;;  %v1613_v45 = vrot.slane %v231_v34, %v1429_v13  ;;  %v99_v53 = vld [vmem:[%s1909_s1 + $0x258] sm:$0xff]  ;;  %v130_v54 = vld [vmem:[%s1909_s1 + $0x350] sm:$0xff]  ;;  %v116_v57 = vld [vmem:[%s1909_s1 + $0x2e0] sm:$0xff] }
  0x27   :  { %1112 = vmatpush3.bf16.msra.mxu1 %v1111_v59  ;;  %1082 = vmatprep.subr.bf16.mxu0 %v1081_v60  ;;  %v1127_v50 = vpack.c.bf16 %v129_v41, %v128_v39  ;;  %v131_v56 = vld [vmem:[%s1909_s1 + $0x358] sm:$0xff]  ;;  %v117_v58 = vld [vmem:[%s1909_s1 + $0x2e8] sm:$0xff]  ;;  %v148_v59 = vld [vmem:[%s1909_s1 + $0x3e0] sm:$0xff]  ;;  %v1099_v61 = vpack.c.bf16 %v99_v53, %v98_v52 }
  0x28   :  { %1114 = vmatprep.subr.bf16.mxu1 %v1113_v0  ;;  %v246_v44 = vcombine.high %v1590_v33, %v1590_v33  ;;  %v247_v49 = vcombine.high %v1613_v45, %v1613_v45  ;;  %v149_v60 = vld [vmem:[%s1909_s1 + $0x3e8] sm:$0xff]  ;;  %v1131_v62 = vpack.c.bf16 %v131_v56, %v130_v54  ;;  %v1101_v63 = vpack.c.bf16 %v117_v58, %v116_v57  ;;  %v100_v0 = vld [vmem:[%s1909_s1 + $0x260] sm:$0xff]  ;;  %v118_v5 = vld [vmem:[%s1909_s1 + $0x2f0] sm:$0xff] }
  0x29   :  { %v101_v1 = vld [vmem:[%s1909_s1 + $0x268] sm:$0xff]  ;;  %v132_v2 = vld [vmem:[%s1909_s1 + $0x360] sm:$0xff]  ;;  %v1133_v3 = vpack.c.bf16 %v149_v60, %v148_v59  ;;  %v103_v14 = vld [vmem:[%s1909_s1 + $0x278] sm:$0xff] }
  0x2a   :  { %1084 = vmatpush3.bf16.msra.mxu0 %v1083_v6  ;;  %483 = vmatprep.mubr.f32.mxu0 %v246_v44  ;;  %v133_v4 = vld [vmem:[%s1909_s1 + $0x368] sm:$0xff]  ;;  %v119_v6 = vld [vmem:[%s1909_s1 + $0x2f8] sm:$0xff]  ;;  %v1103_v9 = vpack.c.bf16 %v101_v1, %v100_v0  ;;  %v134_v15 = vld [vmem:[%s1909_s1 + $0x370] sm:$0xff] }
  0x2b   :  { %1116 = vmatpush3.bf16.msra.mxu1 %v1115_v7  ;;  %1086 = vmatprep.subr.bf16.mxu0 %v1085_v8  ;;  %v150_v7 = vld [vmem:[%s1909_s1 + $0x3f0] sm:$0xff]  ;;  %v151_v8 = vld [vmem:[%s1909_s1 + $0x3f8] sm:$0xff]  ;;  %v1135_v10 = vpack.c.bf16 %v133_v4, %v132_v2  ;;  %v1105_v11 = vpack.c.bf16 %v119_v6, %v118_v5  ;;  %v168_v18 = vld [vmem:[%s1909_s1 + $0x480] sm:$0xff] }
  0x2c   :  { %1118 = vmatprep.subr.bf16.mxu1 %v1117_v12  ;;  %553 = vmatprep.mubr.f32.mxu1 %v247_v49  ;;  %v102_v12 = vld [vmem:[%s1909_s1 + $0x270] sm:$0xff]  ;;  %v1137_v16 = vpack.c.bf16 %v151_v8, %v150_v7  ;;  %v135_v17 = vld [vmem:[%s1909_s1 + $0x378] sm:$0xff]  ;;  %v152_v22 = vld [vmem:[%s1909_s1 + $0x400] sm:$0xff] }
  0x2d   :  { %v1139_v24 = vpack.c.bf16 %v135_v17, %v134_v15  ;;  %v153_v26 = vld [vmem:[%s1909_s1 + $0x408] sm:$0xff]  ;;  %v184_v27 = vld [vmem:[%s1909_s1 + $0x500] sm:$0xff] }
  0x2e   :  { %1088 = vmatpush3.bf16.msra.mxu0 %v1087_v19  ;;  %v169_v19 = vld [vmem:[%s1909_s1 + $0x488] sm:$0xff] }
  0x2f   :  { %1120 = vmatpush3.bf16.msra.mxu1 %v1119_v20  ;;  %1090 = vmatprep.subr.bf16.mxu0 %v1089_v21  ;;  %v23_v20 = vld [vmem:[%s1908_s0 + $0x10] sm:$0xff]  ;;  %v1107_v21 = vpack.c.bf16 %v103_v14, %v102_v12 }
  0x30   :  { %1122 = vmatprep.subr.bf16.mxu1 %v1121_v25  ;;  %v248_v23 = vcombine.high %v23_v20, %v23_v20  ;;  %v1141_v25 = vpack.c.bf16 %v169_v19, %v168_v18 }
  0x32   :  { %1092 = vmatpush3.bf16.msra.mxu0 %v1091_v32 }
  0x33   :  { %1124 = vmatpush3.bf16.msra.mxu1 %v1123_v35  ;;  %1094 = vmatprep.subr.bf16.mxu0 %v1093_v36 }
  0x34   :  { %1126 = vmatprep.subr.bf16.mxu1 %v1125_v40 }
  0x36   :  { %1096 = vmatpush3.bf16.msra.mxu0 %v1095_v48 }
  0x37   :  { %1128 = vmatpush3.bf16.msra.mxu1 %v1127_v50  ;;  %1098 = vmatprep.subr.bf16.mxu0 %v1097_v51 }
  0x38   :  { %1130 = vmatprep.subr.bf16.mxu1 %v1129_v55 }
  0x3a   :  { %1100 = vmatpush3.bf16.msra.mxu0 %v1099_v61 }
  0x3b   :  { %1132 = vmatpush3.bf16.msra.mxu1 %v1131_v62  ;;  %1102 = vmatprep.subr.bf16.mxu0 %v1101_v63 }
  0x3c   :  { %1134 = vmatprep.subr.bf16.mxu1 %v1133_v3 }
  0x3e   :  { %1104 = vmatpush3.bf16.msra.mxu0 %v1103_v9 }
  0x3f   :  { %1136 = vmatpush3.bf16.msra.mxu1 %v1135_v10  ;;  %1106 = vmatprep.subr.bf16.mxu0 %v1105_v11 }
  0x40   :  { %10 = vsyncpa [#allocation3], 0  ;;  %1138 = vmatprep.subr.bf16.mxu1 %v1137_v16  ;;  %v185_v28 = vld [vmem:[%s1909_s1 + $0x508] sm:$0xff]  ;;  %v170_v29 = vld [vmem:[%s1909_s1 + $0x490] sm:$0xff]  ;;  %v1711_v31 = vrot.slane %v23_v20, %v1429_v13  ;;  %v1714_v32 = vrot.slane %v248_v23, %v1429_v13  ;;  %v1143_v34 = vpack.c.bf16 %v153_v26, %v152_v22  ;;  %v1245_v13 = vmov 0.0|0.0   ;;  %s1248_s19 = smov [#allocation2]  }
  0x41   :  { %v171_v30 = vld [vmem:[%s1909_s1 + $0x498] sm:$0xff]  ;;  %v1174_v35 = vpack.c.bf16 %v185_v28, %v184_v27  ;;  %v154_v37 = vld [vmem:[%s1909_s1 + $0x410] sm:$0xff]  ;;  %v172_v41 = vld [vmem:[%s1909_s1 + $0x4a0] sm:$0xff]  ;;  %vm276_vm0 = vcmask 261120   ;;  %vm718_vm1 = vcmask 1041408   ;;  %vm1247_vm2 = vmmov 0  }
  0x42   :  { %1108 = vmatpush3.bf16.msra.mxu0 %v1107_v21  ;;  %v1145_v36 = vpack.c.bf16 %v171_v30, %v170_v29  ;;  %v155_v38 = vld [vmem:[%s1909_s1 + $0x418] sm:$0xff]  ;;  %v186_v39 = vld [vmem:[%s1909_s1 + $0x510] sm:$0xff]  ;;  %v173_v42 = vld [vmem:[%s1909_s1 + $0x4a8] sm:$0xff]  ;;  %v263_v43 = vcombine.high %v1711_v31, %v1711_v31  ;;  %v264_v44 = vcombine.high %v1714_v32, %v1714_v32  ;;  %vm714_vm3 = vcmask 408576   ;;  %s800_s20 = sshll.u32 %s1248_s19, 4  ;;  %s801_s20 = int_to_ptr.vmem [resolvable:$true] %s800_s20 }
  0x43   :  { %1140 = vmatpush3.bf16.msra.mxu1 %v1139_v24  ;;  %1142 = vmatprep.subr.bf16.mxu0 %v1141_v25  ;;  %v187_v40 = vld [vmem:[%s1909_s1 + $0x518] sm:$0xff]  ;;  %v1147_v46 = vpack.c.bf16 %v155_v38, %v154_v37  ;;  %v1149_v48 = vpack.c.bf16 %v173_v42, %v172_v41  ;;  %v156_v49 = vld [vmem:[%s1909_s1 + $0x420] sm:$0xff]  ;;  %v174_v51 = vld [vmem:[%s1909_s1 + $0x4b0] sm:$0xff]  ;;  %vm792_vm4 = vcmask 74752   ;;  %s1220_s21 = scalar_lea.vmem %s801_s20, 32  ;;  %p1225_p1 = scmp.lt.s32.totalorder %s801_s20, %s801_s20 }
  0x44   :  { %1173 = vmatprep.subr.bf16.mxu1 %v1245_v13  ;;  %v1177_v47 = vpack.c.bf16 %v187_v40, %v186_v39  ;;  %v188_v50 = vld [vmem:[%s1909_s1 + $0x520] sm:$0xff]  ;;  %v175_v52 = vld [vmem:[%s1909_s1 + $0x4b8] sm:$0xff]  ;;  %v158_v56 = vld [vmem:[%s1909_s1 + $0x430] sm:$0xff]  ;;  %p1221_p0 = scmp.ne.s32.totalorder %s801_s20, %s1220_s21  ;;  %p1226_p2 = scmp.lt.s32.totalorder %s1220_s21, %s1220_s21 }
  0x45   :  { %484 = vmatmul.mubr.f32.vlgmr.msra.gmra.mrb[2].mxu0 %v1590_v33  ;;  %v157_v33 = vld [vmem:[%s1909_s1 + $0x428] sm:$0xff]  ;;  %v1153_v55 = vpack.c.bf16 %v175_v52, %v174_v51  ;;  %v159_v57 = vld [vmem:[%s1909_s1 + $0x438] sm:$0xff]  ;;  %v190_v58 = vld [vmem:[%s1909_s1 + $0x530] sm:$0xff] }
  0x46   :  { %554 = vmatmul.mubr.f32.vlgmr.msra.gmra.mrb[2].mxu1 %v1613_v45  ;;  %1144 = vmatpush3.bf16.msra.mxu0 %v1143_v34  ;;  %v189_v45 = vld [vmem:[%s1909_s1 + $0x528] sm:$0xff]  ;;  %v1151_v53 = vpack.c.bf16 %v157_v33, %v156_v49  ;;  %v191_v59 = vld [vmem:[%s1909_s1 + $0x538] sm:$0xff]  ;;  %v176_v60 = vld [vmem:[%s1909_s1 + $0x4c0] sm:$0xff]  ;;  %v1155_v62 = vpack.c.bf16 %v159_v57, %v158_v56  ;;  %p1227_p3 = por %p1226_p2, %p1225_p1 }
  0x47   :  { %1175 = vmatpush1.bf16.msra.mxu1 %v1174_v35  ;;  %1146 = vmatprep.subr.bf16.mxu0 %v1145_v36  ;;  %v1180_v54 = vpack.c.bf16 %v189_v45, %v188_v50  ;;  %v177_v61 = vld [vmem:[%s1909_s1 + $0x4c8] sm:$0xff]  ;;  %v1183_v63 = vpack.c.bf16 %v191_v59, %v190_v58  ;;  %v160_v1 = vld [vmem:[%s1909_s1 + $0x440] sm:$0xff]  ;;  %v178_v5 = vld [vmem:[%s1909_s1 + $0x4d0] sm:$0xff]  ;;  %v1246_v45 = vmov 0.0  }
  0x48   :  { %1176 = vmatprep.subr.bf16.mxu1 %v1245_v13  ;;  %623 = vmatprep.mubr.f32.mxu0 %v263_v43  ;;  %v1157_v0 = vpack.c.bf16 %v177_v61, %v176_v60  ;;  %v161_v2 = vld [vmem:[%s1909_s1 + $0x448] sm:$0xff]  ;;  %v192_v3 = vld [vmem:[%s1909_s1 + $0x540] sm:$0xff]  ;;  %v179_v6 = vld [vmem:[%s1909_s1 + $0x4d8] sm:$0xff]  ;;  %p1228_p4 = pnand %p1227_p3, %p1221_p0 }
  0x49   :  { %809 = vmatprep.mubr.msk.f32.mxu1 %vm276_vm0, %v264_v44  ;;  %v193_v4 = vld [vmem:[%s1909_s1 + $0x548] sm:$0xff]  ;;  %v1159_v7 = vpack.c.bf16 %v161_v2, %v160_v1  ;;  %v1161_v9 = vpack.c.bf16 %v179_v6, %v178_v5  ;;  %v162_v10 = vld [vmem:[%s1909_s1 + $0x450] sm:$0xff]  ;;  %v163_v11 = vld [vmem:[%s1909_s1 + $0x458] sm:$0xff] }
  0x4a   :  { %1148 = vmatpush3.bf16.msra.mxu0 %v1147_v46  ;;  %v1186_v8 = vpack.c.bf16 %v193_v4, %v192_v3  ;;  %v194_v12 = vld [vmem:[%s1909_s1 + $0x550] sm:$0xff]  ;;  %v195_v14 = vld [vmem:[%s1909_s1 + $0x558] sm:$0xff]  ;;  %v180_v15 = vld [vmem:[%s1909_s1 + $0x4e0] sm:$0xff]  ;;  %v1163_v17 = vpack.c.bf16 %v163_v11, %v162_v10 }
  0x4b   :  { %1178 = vmatpush1.bf16.msra.mxu1 %v1177_v47  ;;  %1150 = vmatprep.subr.bf16.mxu0 %v1149_v48  ;;  %v181_v16 = vld [vmem:[%s1909_s1 + $0x4e8] sm:$0xff]  ;;  %v1189_v18 = vpack.c.bf16 %v195_v14, %v194_v12  ;;  %v164_v20 = vld [vmem:[%s1909_s1 + $0x460] sm:$0xff]  ;;  %v182_v24 = vld [vmem:[%s1909_s1 + $0x4f0] sm:$0xff] }
  0x4c   :  { %1179 = vmatprep.subr.bf16.mxu1 %v1245_v13  ;;  %v1165_v19 = vpack.c.bf16 %v181_v16, %v180_v15  ;;  %v165_v21 = vld [vmem:[%s1909_s1 + $0x468] sm:$0xff]  ;;  %v196_v22 = vld [vmem:[%s1909_s1 + $0x560] sm:$0xff]  ;;  %v183_v25 = vld [vmem:[%s1909_s1 + $0x4f8] sm:$0xff] }
  0x4d   :  { %v197_v23 = vld [vmem:[%s1909_s1 + $0x568] sm:$0xff]  ;;  %v1167_v26 = vpack.c.bf16 %v165_v21, %v164_v20  ;;  %v1169_v28 = vpack.c.bf16 %v183_v25, %v182_v24  ;;  %v166_v29 = vld [vmem:[%s1909_s1 + $0x470] sm:$0xff]  ;;  %v167_v30 = vld [vmem:[%s1909_s1 + $0x478] sm:$0xff] }
  0x4e   :  { %1152 = vmatpush3.bf16.msra.mxu0 %v1151_v53  ;;  %v1192_v27 = vpack.c.bf16 %v197_v23, %v196_v22  ;;  %v198_v34 = vld [vmem:[%s1909_s1 + $0x570] sm:$0xff]  ;;  %v199_v35 = vld [vmem:[%s1909_s1 + $0x578] sm:$0xff]  ;;  %v1171_v36 = vpack.c.bf16 %v167_v30, %v166_v29  ;;  %v200_v38 = vld [vmem:[%s1909_s1 + $0x580] sm:$0xff] }
  0x4f   :  { %1181 = vmatpush1.bf16.msra.mxu1 %v1180_v54  ;;  %1154 = vmatprep.subr.bf16.mxu0 %v1153_v55  ;;  %v1195_v37 = vpack.c.bf16 %v199_v35, %v198_v34  ;;  %v201_v39 = vld [vmem:[%s1909_s1 + $0x588] sm:$0xff]  ;;  %v202_v41 = vld [vmem:[%s1909_s1 + $0x590] sm:$0xff]  ;;  %v203_v42 = vld [vmem:[%s1909_s1 + $0x598] sm:$0xff] }
  0x50   :  { %1182 = vmatprep.subr.bf16.mxu1 %v1245_v13  ;;  %v1198_v40 = vpack.c.bf16 %v201_v39, %v200_v38  ;;  %v1201_v43 = vpack.c.bf16 %v203_v42, %v202_v41  ;;  %v700_v44 = vld [vmem:[%s1911_s3] sm:$0xff]  ;;  %v701_v46 = vld [vmem:[%s1911_s3 + $0x8] sm:$0xff]  ;;  %v706_v51 = vld [vmem:[%s1911_s3 + $0x30] sm:$0x3] }
  0x51   :  { %v1204_v47 = vpack.c.bf16 %v701_v46, %v700_v44  ;;  %v704_v49 = vld [vmem:[%s1911_s3 + $0x20] sm:$0xff]  ;;  %v705_v33 = vld [vmem:[%s1911_s3 + $0x28] sm:$0xff] }
  0x52   :  { %1156 = vmatpush3.bf16.msra.mxu0 %v1155_v62  ;;  %v1210_v50 = vpack.c.bf16 %v705_v33, %v704_v49  ;;  %v808_v53 = vld [vmem:[%s1910_s2] ss:$0 sm:$0xff] }
  0x53   :  { %1184 = vmatpush1.bf16.msra.mxu1 %v1183_v63  ;;  %1158 = vmatprep.subr.bf16.mxu0 %v1157_v0  ;;  %v810_v12 = vld [vmem:[%s1912_s4] ss:$0 sm:$0xff] }
  0x54   :  { %1185 = vmatprep.subr.bf16.mxu1 %v1245_v13 }
  0x56   :  { %1160 = vmatpush3.bf16.msra.mxu0 %v1159_v7 }
  0x57   :  { %1187 = vmatpush1.bf16.msra.mxu1 %v1186_v8  ;;  %1162 = vmatprep.subr.bf16.mxu0 %v1161_v9 }
  0x58   :  { %1188 = vmatprep.subr.bf16.mxu1 %v1245_v13 }
  0x5a   :  { %1164 = vmatpush3.bf16.msra.mxu0 %v1163_v17 }
  0x5b   :  { %1190 = vmatpush1.bf16.msra.mxu1 %v1189_v18  ;;  %1166 = vmatprep.subr.bf16.mxu0 %v1165_v19 }
  0x5c   :  { %1191 = vmatprep.subr.bf16.mxu1 %v1245_v13 }
  0x5e   :  { %1168 = vmatpush3.bf16.msra.mxu0 %v1167_v26 }
  0x5f   :  { %1193 = vmatpush1.bf16.msra.mxu1 %v1192_v27  ;;  %1170 = vmatprep.subr.bf16.mxu0 %v1169_v28 }
  0x60   :  { %1194 = vmatprep.subr.bf16.mxu1 %v1245_v13 }
  0x62   :  { %1172 = vmatpush3.bf16.msra.mxu0 %v1171_v36 }
  0x63   :  { %1196 = vmatpush1.bf16.msra.mxu1 %v1195_v37  ;;  %1203 = vmatprep.subr.bf16.mxu0 %v1245_v13 }
  0x64   :  { %1197 = vmatprep.subr.bf16.mxu1 %v1245_v13 }
  0x65   :  { %624 = vmatmul.mubr.f32.vlgmr.msra.gmra.mrb[4].mxu0 %v1711_v31  ;;  %v702_v31 = vld [vmem:[%s1911_s3 + $0x10] sm:$0xff] }
  0x66   :  { %1205 = vmatpush3.bf16.msra.mxu0 %v1204_v47  ;;  %1010 = vmatprep.mubr.msk.f32.mxu0 %vm1247_vm2, %v1246_v45 }
  0x67   :  { %1199 = vmatpush1.bf16.msra.mxu1 %v1198_v40  ;;  %1206 = vmatprep.subr.bf16.mxu0 %v1245_v13 }
  0x68   :  { %1200 = vmatprep.subr.bf16.mxu1 %v1245_v13 }
  0x6b   :  { %1202 = vmatpush1.bf16.msra.mxu1 %v1201_v43 }
  0x6e   :  { %694 = vmatmul.mubr.f32.vlgmr.msra.gmra.mrb[4].mxu1 %v1714_v32  ;;  %v703_v32 = vld [vmem:[%s1911_s3 + $0x18] sm:$0xff] }
  0x6f   :  { %v1207_v48 = vpack.c.bf16 %v703_v32, %v702_v31 }
  0x71   :  { %1208 = vmatpush3.bf16.msra.mxu0 %v1207_v48 }
  0x72   :  { %1209 = vmatprep.subr.bf16.mxu0 %v1245_v13 }
  0x75   :  { %1211 = vmatpush3.bf16.msra.mxu0 %v1210_v50 }
  0x76   :  { %1008 = vmatprep.subr.mxu0 %v1246_v45 }
  0x79   :  { %1009 = vmatpush3.msk.msra.mxu0 %vm718_vm1, %v706_v51 }
  0xf8   :  { %v845_v13 = vpop.f32.mrb[0].mxu0 }
  0xf9   :  { %v880_v52 = vpop.f32.mrb[0].mxu1  ;;  %v846_v54 = vpop.f32.mrb[1].mxu0 }
  0xfa   :  { %v847_v55 = vadd.f32 %v846_v54, %v845_v13  ;;  %v881_v56 = vpop.f32.mrb[1].mxu1 }
  0xfb   :  { %v882_v57 = vadd.f32 %v881_v56, %v880_v52 }
  0xfc   :  { %v346_v58 = vadd.f32 %v847_v55, %v808_v53 }
  0xfe   :  { %v416_v59 = vadd.f32 %v882_v57, %v346_v58 }
 0x118   :  { %v915_v60 = vpop.f32.mrb[2].mxu0 }
 0x119   :  { %v950_v61 = vpop.f32.mrb[2].mxu1  ;;  %v916_v62 = vpop.f32.mrb[3].mxu0 }
 0x11a   :  { %v917_v63 = vadd.f32 %v916_v62, %v915_v60  ;;  %v951_v0 = vpop.f32.mrb[3].mxu1 }
 0x11b   :  { %v952_v1 = vadd.f32 %v951_v0, %v950_v61 }
 0x11c   :  { %v486_v2 = vadd.f32 %v917_v63, %v416_v59 }
 0x11e   :  { %v556_v3 = vadd.f32 %v952_v1, %v486_v2 }
 0x138   :  { %v985_v4 = vpop.f32.mrb[4].mxu0 }
 0x139   :  { %v986_v5 = vpop.f32.mrb[5].mxu0 }
 0x13a   :  { %v987_v6 = vadd.f32 %v986_v5, %v985_v4 }
 0x13c   :  { %v626_v7 = vadd.f32 %v987_v6, %v556_v3 }
 0x141   :  { %v695_v8 = vpop.f32.mrb[4].mxu1 }
 0x142   :  { %v696_v9 = vadd.f32 %v695_v8, %v626_v7  ;;  %v697_v10 = vpop.f32.mrb[5].mxu1 }
 0x144   :  { %v699_v11 = vmax.f32 %v696_v9, 0.0 }
 0x146   :  { %1011 = vmatmul.mubr.msk.f32.vlgmr.msra.gmra.mrb[6].mxu0 %vm714_vm3, %v699_v11 }
 0x219   :  { %v788_v14 = vpop.f32.mrb[6].mxu0 }
 0x21a   :  { %v789_v15 = vadd.f32 %v810_v12, %v788_v14  ;;  %v1012_v16 = vpop.f32.mrb[7].mxu0 }
 0x21c   :  { %793 = vst.msk [vmem:[#allocation2] sm:$0x3] %vm792_vm4, %v789_v15 }
 0x21d   :  { %1231 = shalt.err (!%p1228_p4)
}
 0x21e   :  { %s1232_s24 = scalar_lea.hbm %s1913_s5, 32 }
 0x21f   :  { %p1233_p5 = scmp.ne.s32.totalorder %s1913_s5, %s1232_s24  ;;  %p1236_p6 = scmp.lt.u32.totalorder %s1232_s24, %s1913_s5 }
 0x221   :  { %p1238_p7 = pnand %p1236_p6, %p1233_p5 }
 0x223   :  { %1241 = shalt.err (!%p1238_p7)
}
 0x224   :  { %803 = dma.vmem_to_hbm [thread:$0]  %s801_s20, 32, %s1913_s5, [#allocation3]  }
 0x225   :  { %1242 = dma.done.wait [#allocation3], 32  }
 0x226   :  { %1243 = vsyncadd [#allocation3], 4294967264 }
 0x227   :  { %807 = vsyncpa [#allocation3], 1 }

</bundles_post_ra>
